<compile_context>
chip_gen: v7x
topology: tpu7x:2x2x1
jax: 0.10.0
libtpu: 0.0.40
codegen_flags: <defaults>
</compile_context>

<pallas_src>
import functools

import jax
import jax.numpy as jnp
from jax.experimental import pallas as pl
from jax.experimental.pallas import tpu as pltpu

STEM_C, WIDTH, GROUPS, OUT_C, NUM_CLASSES = 16, 32, 4, 64, 16
CPAD = 128          # lane-padded channel width used for every activation
BN_EPS = 1e-5


def _round_up(x, m):
    return (x + m - 1) // m * m


# ----------------------------- Pallas kernels -----------------------------

def _matmul_bias_kernel(x_ref, w_ref, b_ref, o_ref, *, relu):
    acc = jnp.dot(x_ref[...], w_ref[...], preferred_element_type=jnp.float32)
    acc = acc + b_ref[...]
    if relu:
        acc = jnp.maximum(acc, 0.0)
    o_ref[...] = acc.astype(o_ref.dtype)


def matmul_bias_act(x, w, b, *, relu, out_dtype=jnp.bfloat16, tm=256):
    """out = act(x @ w + b).  w is BN-folded, pre-padded bf16; b is f32 (1,N)."""
    M, K = x.shape
    Kw, N = w.shape
    assert K == Kw and K % 128 == 0 and N % 128 == 0, (K, Kw, N)
    Mp = _round_up(M, 8)
    tile_m = Mp if Mp <= tm else tm
    Mp = _round_up(Mp, tile_m)
    xb = x.astype(jnp.bfloat16)
    if Mp != M:
        xb = jnp.pad(xb, ((0, Mp - M), (0, 0)))
    out = pl.pallas_call(
        functools.partial(_matmul_bias_kernel, relu=relu),
        out_shape=jax.ShapeDtypeStruct((Mp, N), out_dtype),
        grid=(Mp // tile_m,),
        in_specs=[
            pl.BlockSpec((tile_m, K), lambda i: (i, 0)),
            pl.BlockSpec((K, N), lambda i: (0, 0)),
            pl.BlockSpec((1, N), lambda i: (0, 0)),
        ],
        out_specs=pl.BlockSpec((tile_m, N), lambda i: (i, 0)),
        compiler_params=pltpu.CompilerParams(
            dimension_semantics=("parallel",)),
    )(xb, w, b)
    return out[:M] if Mp != M else out


def _maxpool_kernel(ee_ref, eo_ref, oe_ref, oo_ref, o_ref):
    _, Ho, Wo, _ = o_ref.shape
    # 3x3/stride-2 window max expressed as 9 contiguous (unstrided) reads of
    # the four parity planes.
    m = ee_ref[:, 0:Ho, 0:Wo, :]
    m = jnp.maximum(m, ee_ref[:, 0:Ho, 1:Wo + 1, :])
    m = jnp.maximum(m, ee_ref[:, 1:Ho + 1, 0:Wo, :])
    m = jnp.maximum(m, ee_ref[:, 1:Ho + 1, 1:Wo + 1, :])
    m = jnp.maximum(m, eo_ref[:, 0:Ho, 0:Wo, :])
    m = jnp.maximum(m, eo_ref[:, 1:Ho + 1, 0:Wo, :])
    m = jnp.maximum(m, oe_ref[:, 0:Ho, 0:Wo, :])
    m = jnp.maximum(m, oe_ref[:, 0:Ho, 1:Wo + 1, :])
    m = jnp.maximum(m, oo_ref[:, 0:Ho, 0:Wo, :])
    o_ref[...] = m


def maxpool_3x3_s2(x):
    """3x3 / stride-2 / pad-1 max pool.  x: (N, H, W, C) -> (N, Ho, Wo, C)."""
    N, H, W, C = x.shape
    Ho = (H + 2 - 3) // 2 + 1
    Wo = (W + 2 - 3) // 2 + 1
    neg = jnp.asarray(-jnp.inf, x.dtype)
    xp = jnp.pad(x, ((0, 0), (1, 1), (1, 1), (0, 0)), constant_values=neg)
    # Parity split: one 1x copy of the activation (vs 9 shifted copies before),
    # so the kernel only needs static, unstrided window slices.
    ee = xp[:, 0::2, 0::2, :]
    eo = xp[:, 0::2, 1::2, :]
    oe = xp[:, 1::2, 0::2, :]
    oo = xp[:, 1::2, 1::2, :]
    return pl.pallas_call(
        _maxpool_kernel,
        out_shape=jax.ShapeDtypeStruct((N, Ho, Wo, C), x.dtype),
        in_specs=[pl.BlockSpec(memory_space=pltpu.MemorySpace.VMEM)] * 4,
        out_specs=pl.BlockSpec(memory_space=pltpu.MemorySpace.VMEM),
    )(ee, eo, oe, oo)


def _gap_fc_kernel(x_ref, w_ref, b_ref, o_ref, *, inv_hw):
    n = o_ref.shape[0]
    feat = jnp.sum(x_ref[...].astype(jnp.float32), axis=1) * inv_hw   # (n, C)
    if n % 8 != 0:  # pad rows so the MXU sees an 8-sublane-aligned LHS
        feat = jnp.concatenate(
            [feat, jnp.zeros((8 - n % 8, feat.shape[1]), jnp.float32)], axis=0)
    logits = jnp.dot(feat.astype(jnp.bfloat16), w_ref[...],
                     preferred_element_type=jnp.float32)
    o_ref[...] = logits[:n] + b_ref[...]


def gap_fc(x, w, b):
    """Fused global-average-pool + FC.  x: (N, HW, C) -> (N, Nout) logits."""
    N, HW, C = x.shape
    Nout = w.shape[1]
    return pl.pallas_call(
        functools.partial(_gap_fc_kernel, inv_hw=1.0 / HW),
        out_shape=jax.ShapeDtypeStruct((N, Nout), jnp.float32),
        in_specs=[pl.BlockSpec(memory_space=pltpu.MemorySpace.VMEM)] * 3,
        out_specs=pl.BlockSpec(memory_space=pltpu.MemorySpace.VMEM),
    )(x, w, b)


# --------------------------- im2col glue (plain JAX) ---------------------------
# TODO(synk): at real 224x224 resolutions, replace this im2col expansion with a
# per-tap accumulation grid inside the matmul kernel to avoid the HBM blow-up.

def im2col(x, kh, kw, stride, pad, k_pad=None):
    """NHWC -> (N*Ho*Wo, kh*kw*C) bf16 patch matrix (patch order: kh, kw, C)."""
    N, H, W, C = x.shape
    xp = jnp.pad(x, ((0, 0), (pad, pad), (pad, pad), (0, 0)))
    Ho = (H + 2 * pad - kh) // stride + 1
    Wo = (W + 2 * pad - kw) // stride + 1
    cols = [xp[:, i:i + (Ho - 1) * stride + 1:stride,
               j:j + (Wo - 1) * stride + 1:stride, :]
            for i in range(kh) for j in range(kw)]
    patches = jnp.concatenate(cols, axis=-1).reshape(N * Ho * Wo, kh * kw * C)
    if k_pad is not None and k_pad > patches.shape[1]:
        patches = jnp.pad(patches, ((0, 0), (0, k_pad - patches.shape[1])))
    return patches.astype(jnp.bfloat16), Ho, Wo


# ------------------------------ parameters ------------------------------

def _bn_fold(c):
    gamma = jnp.ones((c,), jnp.float32)
    beta = jnp.zeros((c,), jnp.float32)
    mean = jnp.zeros((c,), jnp.float32)
    var = jnp.ones((c,), jnp.float32)
    scale = gamma / jnp.sqrt(var + BN_EPS)
    bias = beta - mean * scale
    return scale, bias


def _pad_w(w, rows):
    k, n = w.shape
    return jnp.zeros((rows, CPAD), jnp.float32).at[:k, :n].set(w)


def _pad_b(b):
    return jnp.zeros((1, CPAD), jnp.float32).at[0, :b.shape[0]].set(b)


def init_params(key):
    """All weights BN-folded, padded to MXU-friendly shapes, and cast to bf16 ONCE here."""
    ks = jax.random.split(key, 6)
    cg = WIDTH // GROUPS
    p = {}

    # Stem 7x7/2 conv (+ folded BN).  im2col K = 49 -> padded to CPAD rows.
    stem_w = jax.random.normal(ks[0], (7 * 7 * 1, STEM_C), jnp.float32) * 0.05
    s, b = _bn_fold(STEM_C)
    p['stem_w'] = _pad_w(stem_w * s[None, :], CPAD).astype(jnp.bfloat16)
    p['stem_b'] = _pad_b(b)

    # Bottleneck 1x1 reduce.
    c1_w = jax.random.normal(ks[1], (STEM_C, WIDTH), jnp.float32) * 0.05
    s, b = _bn_fold(WIDTH)
    p['c1_w'] = _pad_w(c1_w * s[None, :], CPAD).astype(jnp.bfloat16)
    p['c1_b'] = _pad_b(b)

    # Grouped 3x3 conv (cardinality=GROUPS) as ONE block-diagonal weight acting
    # on (kh, kw, CPAD)-ordered im2col patches of the channel-padded activation.
    c2_w = jax.random.normal(ks[2], (GROUPS, 3 * 3 * cg, cg), jnp.float32) * 0.05
    s, b = _bn_fold(WIDTH)
    w2 = jnp.zeros((9 * CPAD, CPAD), jnp.float32)
    for g in range(GROUPS):
        for t in range(9):
            blk = c2_w[g, t * cg:(t + 1) * cg, :] * s[None, g * cg:(g + 1) * cg]
            w2 = w2.at[t * CPAD + g * cg:t * CPAD + (g + 1) * cg,
                       g * cg:(g + 1) * cg].set(blk)
    p['c2_w'] = w2.astype(jnp.bfloat16)
    p['c2_b'] = _pad_b(b)

    # 1x1 expand + projection shortcut fused into one (2*CPAD, CPAD) weight
    # acting on concat([grouped_conv_out, block_input]); residual add comes free.
    c3_w = jax.random.normal(ks[3], (WIDTH, OUT_C), jnp.float32) * 0.05
    s3, b3 = _bn_fold(OUT_C)
    ds_w = jax.random.normal(ks[4], (STEM_C, OUT_C), jnp.float32) * 0.05
    sd, bd = _bn_fold(OUT_C)
    w3ds = jnp.zeros((2 * CPAD, CPAD), jnp.float32)
    w3ds = w3ds.at[:WIDTH, :OUT_C].set(c3_w * s3[None, :])
    w3ds = w3ds.at[CPAD:CPAD + STEM_C, :OUT_C].set(ds_w * sd[None, :])
    p['c3ds_w'] = w3ds.astype(jnp.bfloat16)
    p['c3ds_b'] = _pad_b(b3 + bd)

    # FC head.
    fc_w = jax.random.normal(ks[5], (OUT_C, NUM_CLASSES), jnp.float32) * 0.05
    p['fc_w'] = _pad_w(fc_w, CPAD).astype(jnp.bfloat16)
    p['fc_b'] = _pad_b(jnp.zeros((NUM_CLASSES,), jnp.float32))
    return p


# ------------------------------- forward -------------------------------

@jax.jit
def resnext_forward(params, x_nchw):
    x = jnp.transpose(x_nchw, (0, 2, 3, 1)).astype(jnp.float32)  # NCHW -> NHWC
    N = x.shape[0]

    # Stem: 7x7/2 conv + BN + ReLU (BN scale folded into the weight).
    patches, Ho, Wo = im2col(x, 7, 7, 2, 3, k_pad=CPAD)
    y = matmul_bias_act(patches, params['stem_w'], params['stem_b'], relu=True)
    x = y.reshape(N, Ho, Wo, CPAD)

    # 3x3/2 max pool (single Pallas kernel, parity-split input).
    x = maxpool_3x3_s2(x)
    _, Ho, Wo, _ = x.shape
    M = N * Ho * Wo
    x_flat = x.reshape(M, CPAD)

    # Bottleneck 1x1 reduce + BN + ReLU.
    y1 = matmul_bias_act(x_flat, params['c1_w'], params['c1_b'], relu=True)

    # Grouped 3x3 conv (all groups in one block-diagonal matmul) + BN + ReLU.
    patches2, _, _ = im2col(y1.reshape(N, Ho, Wo, CPAD), 3, 3, 1, 1)
    y2 = matmul_bias_act(patches2, params['c2_w'], params['c2_b'], relu=True)

    # 1x1 expand + BN, projection shortcut + BN, residual add, ReLU: one matmul.
    lhs = jnp.concatenate([y2, x_flat], axis=1)
    y = matmul_bias_act(lhs, params['c3ds_w'], params['c3ds_b'], relu=True)

    # Global average pool + FC head, fused into one kernel.
    logits = gap_fc(y.reshape(N, Ho * Wo, CPAD), params['fc_w'], params['fc_b'])
    return logits[:, :NUM_CLASSES]


if __name__ == "__main__":
    key = jax.random.PRNGKey(0)
    pkey, xkey = jax.random.split(key)
    params = init_params(pkey)
    x = jax.random.normal(xkey, (2, 1, 32, 32), jnp.float32)  # NCHW, in_chans=1
    logits = resnext_forward(params, x)
    jax.block_until_ready(logits)
    assert logits.shape == (2, NUM_CLASSES), logits.shape
    print("KERNEL_OK")
</pallas_src>

<mosaic_0001>
module attributes {stable_mosaic.version = 11 : i64} {
  func.func @_matmul_bias_kernel(%arg0: i32, %arg1: memref<256x128xbf16, #tpu.memory_space<vmem>>, %arg2: memref<128x128xbf16, #tpu.memory_space<vmem>>, %arg3: memref<1x128xf32, #tpu.memory_space<vmem>>, %arg4: memref<256x128xbf16, #tpu.memory_space<vmem>>) attributes {dimension_semantics = [#tpu.dimension_semantics<parallel>], iteration_bounds = array<i64: 2>, scalar_prefetch = 0 : i64, scratch_operands = 0 : i64, tpu.core_type = #tpu.core_type<tc>, window_params = [{transform_indices = @transform_0, window_bounds = array<i64: 256, 128>}, {pipeline_mode = #tpu.pipeline_mode<synchronous>, transform_indices = @transform_1, window_bounds = array<i64: 128, 128>}, {pipeline_mode = #tpu.pipeline_mode<synchronous>, transform_indices = @transform_2, window_bounds = array<i64: 1, 128>}, {transform_indices = @transform_3, window_bounds = array<i64: 256, 128>}]} {
    %c0 = arith.constant 0 : index
    %c0_0 = arith.constant 0 : index
    %0 = vector.load %arg1[%c0, %c0_0] : memref<256x128xbf16, #tpu.memory_space<vmem>>, vector<256x128xbf16>
    %c0_1 = arith.constant 0 : index
    %c0_2 = arith.constant 0 : index
    %1 = vector.load %arg2[%c0_1, %c0_2] : memref<128x128xbf16, #tpu.memory_space<vmem>>, vector<128x128xbf16>
    %cst = arith.constant dense<0.000000e+00> : vector<256x128xf32>
    %2 = tpu.matmul %0, %1, %cst {dimension_numbers = #tpu.dot_dimension_numbers<[1], [0], [0], [1], [0, 0, 1, 1], [], []>} : vector<256x128xbf16>, vector<128x128xbf16>, vector<256x128xf32> -> vector<256x128xf32>
    %c0_3 = arith.constant 0 : index
    %c0_4 = arith.constant 0 : index
    %3 = vector.load %arg3[%c0_3, %c0_4] : memref<1x128xf32, #tpu.memory_space<vmem>>, vector<1x128xf32>
    %4 = vector.broadcast %3 : vector<1x128xf32> to vector<256x128xf32>
    %5 = arith.addf %2, %4 : vector<256x128xf32>
    %cst_5 = arith.constant 0.000000e+00 : f32
    %6 = vector.broadcast %cst_5 : f32 to vector<256x128xf32>
    %7 = arith.maximumf %5, %6 : vector<256x128xf32>
    %8 = arith.truncf %7 : vector<256x128xf32> to vector<256x128xbf16>
    %c0_6 = arith.constant 0 : index
    %c0_7 = arith.constant 0 : index
    %9 = vector.load %arg4[%c0_6, %c0_7] : memref<256x128xbf16, #tpu.memory_space<vmem>>, vector<256x128xbf16>
    tpu.vector_store %arg4[%c0_6, %c0_7], %8 {strides = array<i32>} : memref<256x128xbf16, #tpu.memory_space<vmem>>, vector<256x128xbf16>,
    return
  }
  func.func @transform_0(%arg0: i32) -> (i32, i32) {
    %c0_i32 = arith.constant 0 : i32
    %c0_i32_0 = arith.constant 0 : i32
    return %arg0, %c0_i32 : i32, i32
  }
  func.func @transform_1(%arg0: i32) -> (i32, i32) {
    %c0_i32 = arith.constant 0 : i32
    %c0_i32_0 = arith.constant 0 : i32
    %c0_i32_1 = arith.constant 0 : i32
    return %c0_i32, %c0_i32_0 : i32, i32
  }
  func.func @transform_2(%arg0: i32) -> (i32, i32) {
    %c0_i32 = arith.constant 0 : i32
    %c0_i32_0 = arith.constant 0 : i32
    %c0_i32_1 = arith.constant 0 : i32
    return %c0_i32, %c0_i32_0 : i32, i32
  }
  func.func @transform_3(%arg0: i32) -> (i32, i32) {
    %c0_i32 = arith.constant 0 : i32
    %c0_i32_0 = arith.constant 0 : i32
    return %arg0, %c0_i32 : i32, i32
  }
}

module attributes {stable_mosaic.version = 11 : i64} {
  func.func @_matmul_bias_kernel(%arg0: i32, %arg1: memref<128x128xbf16, #tpu.memory_space<vmem>>, %arg2: memref<128x128xbf16, #tpu.memory_space<vmem>>, %arg3: memref<1x128xf32, #tpu.memory_space<vmem>>, %arg4: memref<128x128xbf16, #tpu.memory_space<vmem>>) attributes {dimension_semantics = [#tpu.dimension_semantics<parallel>], iteration_bounds = array<i64: 1>, scalar_prefetch = 0 : i64, scratch_operands = 0 : i64, tpu.core_type = #tpu.core_type<tc>, window_params = [{transform_indices = @transform_0, window_bounds = array<i64: 128, 128>}, {pipeline_mode = #tpu.pipeline_mode<synchronous>, transform_indices = @transform_1, window_bounds = array<i64: 128, 128>}, {pipeline_mode = #tpu.pipeline_mode<synchronous>, transform_indices = @transform_2, window_bounds = array<i64: 1, 128>}, {transform_indices = @transform_3, window_bounds = array<i64: 128, 128>}]} {
    %c0 = arith.constant 0 : index
    %c0_0 = arith.constant 0 : index
    %0 = vector.load %arg1[%c0, %c0_0] : memref<128x128xbf16, #tpu.memory_space<vmem>>, vector<128x128xbf16>
    %c0_1 = arith.constant 0 : index
    %c0_2 = arith.constant 0 : index
    %1 = vector.load %arg2[%c0_1, %c0_2] : memref<128x128xbf16, #tpu.memory_space<vmem>>, vector<128x128xbf16>
    %cst = arith.constant dense<0.000000e+00> : vector<128x128xf32>
    %2 = tpu.matmul %0, %1, %cst {dimension_numbers = #tpu.dot_dimension_numbers<[1], [0], [0], [1], [0, 0, 1, 1], [], []>} : vector<128x128xbf16>, vector<128x128xbf16>, vector<128x128xf32> -> vector<128x128xf32>
    %c0_3 = arith.constant 0 : index
    %c0_4 = arith.constant 0 : index
    %3 = vector.load %arg3[%c0_3, %c0_4] : memref<1x128xf32, #tpu.memory_space<vmem>>, vector<1x128xf32>
    %4 = vector.broadcast %3 : vector<1x128xf32> to vector<128x128xf32>
    %5 = arith.addf %2, %4 : vector<128x128xf32>
    %cst_5 = arith.constant 0.000000e+00 : f32
    %6 = vector.broadcast %cst_5 : f32 to vector<128x128xf32>
    %7 = arith.maximumf %5, %6 : vector<128x128xf32>
    %8 = arith.truncf %7 : vector<128x128xf32> to vector<128x128xbf16>
    %c0_6 = arith.constant 0 : index
    %c0_7 = arith.constant 0 : index
    %9 = vector.load %arg4[%c0_6, %c0_7] : memref<128x128xbf16, #tpu.memory_space<vmem>>, vector<128x128xbf16>
    tpu.vector_store %arg4[%c0_6, %c0_7], %8 {strides = array<i32>} : memref<128x128xbf16, #tpu.memory_space<vmem>>, vector<128x128xbf16>,
    return
  }
  func.func @transform_0(%arg0: i32) -> (i32, i32) {
    %c0_i32 = arith.constant 0 : i32
    %c0_i32_0 = arith.constant 0 : i32
    return %arg0, %c0_i32 : i32, i32
  }
  func.func @transform_1(%arg0: i32) -> (i32, i32) {
    %c0_i32 = arith.constant 0 : i32
    %c0_i32_0 = arith.constant 0 : i32
    %c0_i32_1 = arith.constant 0 : i32
    return %c0_i32, %c0_i32_0 : i32, i32
  }
  func.func @transform_2(%arg0: i32) -> (i32, i32) {
    %c0_i32 = arith.constant 0 : i32
    %c0_i32_0 = arith.constant 0 : i32
    %c0_i32_1 = arith.constant 0 : i32
    return %c0_i32, %c0_i32_0 : i32, i32
  }
  func.func @transform_3(%arg0: i32) -> (i32, i32) {
    %c0_i32 = arith.constant 0 : i32
    %c0_i32_0 = arith.constant 0 : i32
    return %arg0, %c0_i32 : i32, i32
  }
}

module attributes {stable_mosaic.version = 11 : i64} {
  func.func @_maxpool_kernel(%arg0: memref<2x9x9x128xbf16, #tpu.memory_space<vmem>>, %arg1: memref<2x9x9x128xbf16, #tpu.memory_space<vmem>>, %arg2: memref<2x9x9x128xbf16, #tpu.memory_space<vmem>>, %arg3: memref<2x9x9x128xbf16, #tpu.memory_space<vmem>>, %arg4: memref<2x8x8x128xbf16, #tpu.memory_space<vmem>>) attributes {dimension_semantics = [], scalar_prefetch = 0 : i64, scratch_operands = 0 : i64, tpu.core_type = #tpu.core_type<tc>} {
    %c0 = arith.constant 0 : index
    %c0_0 = arith.constant 0 : index
    %c0_1 = arith.constant 0 : index
    %c0_2 = arith.constant 0 : index
    %0 = vector.load %arg0[%c0, %c0_0, %c0_1, %c0_2] : memref<2x9x9x128xbf16, #tpu.memory_space<vmem>>, vector<2x8x8x128xbf16>
    %c0_3 = arith.constant 0 : index
    %c0_4 = arith.constant 0 : index
    %c1 = arith.constant 1 : index
    %c0_5 = arith.constant 0 : index
    %1 = vector.load %arg0[%c0_3, %c0_4, %c1, %c0_5] : memref<2x9x9x128xbf16, #tpu.memory_space<vmem>>, vector<2x8x8x128xbf16>
    %2 = arith.maximumf %0, %1 : vector<2x8x8x128xbf16>
    %c0_6 = arith.constant 0 : index
    %c1_7 = arith.constant 1 : index
    %c0_8 = arith.constant 0 : index
    %c0_9 = arith.constant 0 : index
    %3 = vector.load %arg0[%c0_6, %c1_7, %c0_8, %c0_9] : memref<2x9x9x128xbf16, #tpu.memory_space<vmem>>, vector<2x8x8x128xbf16>
    %4 = arith.maximumf %2, %3 : vector<2x8x8x128xbf16>
    %c0_10 = arith.constant 0 : index
    %c1_11 = arith.constant 1 : index
    %c1_12 = arith.constant 1 : index
    %c0_13 = arith.constant 0 : index
    %5 = vector.load %arg0[%c0_10, %c1_11, %c1_12, %c0_13] : memref<2x9x9x128xbf16, #tpu.memory_space<vmem>>, vector<2x8x8x128xbf16>
    %6 = arith.maximumf %4, %5 : vector<2x8x8x128xbf16>
    %c0_14 = arith.constant 0 : index
    %c0_15 = arith.constant 0 : index
    %c0_16 = arith.constant 0 : index
    %c0_17 = arith.constant 0 : index
    %7 = vector.load %arg1[%c0_14, %c0_15, %c0_16, %c0_17] : memref<2x9x9x128xbf16, #tpu.memory_space<vmem>>, vector<2x8x8x128xbf16>
    %8 = arith.maximumf %6, %7 : vector<2x8x8x128xbf16>
    %c0_18 = arith.constant 0 : index
    %c1_19 = arith.constant 1 : index
    %c0_20 = arith.constant 0 : index
    %c0_21 = arith.constant 0 : index
    %9 = vector.load %arg1[%c0_18, %c1_19, %c0_20, %c0_21] : memref<2x9x9x128xbf16, #tpu.memory_space<vmem>>, vector<2x8x8x128xbf16>
    %10 = arith.maximumf %8, %9 : vector<2x8x8x128xbf16>
    %c0_22 = arith.constant 0 : index
    %c0_23 = arith.constant 0 : index
    %c0_24 = arith.constant 0 : index
    %c0_25 = arith.constant 0 : index
    %11 = vector.load %arg2[%c0_22, %c0_23, %c0_24, %c0_25] : memref<2x9x9x128xbf16, #tpu.memory_space<vmem>>, vector<2x8x8x128xbf16>
    %12 = arith.maximumf %10, %11 : vector<2x8x8x128xbf16>
    %c0_26 = arith.constant 0 : index
    %c0_27 = arith.constant 0 : index
    %c1_28 = arith.constant 1 : index
    %c0_29 = arith.constant 0 : index
    %13 = vector.load %arg2[%c0_26, %c0_27, %c1_28, %c0_29] : memref<2x9x9x128xbf16, #tpu.memory_space<vmem>>, vector<2x8x8x128xbf16>
    %14 = arith.maximumf %12, %13 : vector<2x8x8x128xbf16>
    %c0_30 = arith.constant 0 : index
    %c0_31 = arith.constant 0 : index
    %c0_32 = arith.constant 0 : index
    %c0_33 = arith.constant 0 : index
    %15 = vector.load %arg3[%c0_30, %c0_31, %c0_32, %c0_33] : memref<2x9x9x128xbf16, #tpu.memory_space<vmem>>, vector<2x8x8x128xbf16>
    %16 = arith.maximumf %14, %15 : vector<2x8x8x128xbf16>
    %c0_34 = arith.constant 0 : index
    %c0_35 = arith.constant 0 : index
    %c0_36 = arith.constant 0 : index
    %c0_37 = arith.constant 0 : index
    %17 = vector.load %arg4[%c0_34, %c0_35, %c0_36, %c0_37] : memref<2x8x8x128xbf16, #tpu.memory_space<vmem>>, vector<2x8x8x128xbf16>
    tpu.vector_store %arg4[%c0_34, %c0_35, %c0_36, %c0_37], %16 {strides = array<i32>} : memref<2x8x8x128xbf16, #tpu.memory_space<vmem>>, vector<2x8x8x128xbf16>,
    return
  }
}

module attributes {stable_mosaic.version = 11 : i64} {
  func.func @_matmul_bias_kernel(%arg0: i32, %arg1: memref<128x1152xbf16, #tpu.memory_space<vmem>>, %arg2: memref<1152x128xbf16, #tpu.memory_space<vmem>>, %arg3: memref<1x128xf32, #tpu.memory_space<vmem>>, %arg4: memref<128x128xbf16, #tpu.memory_space<vmem>>) attributes {dimension_semantics = [#tpu.dimension_semantics<parallel>], iteration_bounds = array<i64: 1>, scalar_prefetch = 0 : i64, scratch_operands = 0 : i64, tpu.core_type = #tpu.core_type<tc>, window_params = [{transform_indices = @transform_0, window_bounds = array<i64: 128, 1152>}, {pipeline_mode = #tpu.pipeline_mode<synchronous>, transform_indices = @transform_1, window_bounds = array<i64: 1152, 128>}, {pipeline_mode = #tpu.pipeline_mode<synchronous>, transform_indices = @transform_2, window_bounds = array<i64: 1, 128>}, {transform_indices = @transform_3, window_bounds = array<i64: 128, 128>}]} {
    %c0 = arith.constant 0 : index
    %c0_0 = arith.constant 0 : index
    %0 = vector.load %arg1[%c0, %c0_0] : memref<128x1152xbf16, #tpu.memory_space<vmem>>, vector<128x1152xbf16>
    %c0_1 = arith.constant 0 : index
    %c0_2 = arith.constant 0 : index
    %1 = vector.load %arg2[%c0_1, %c0_2] : memref<1152x128xbf16, #tpu.memory_space<vmem>>, vector<1152x128xbf16>
    %cst = arith.constant dense<0.000000e+00> : vector<128x128xf32>
    %2 = tpu.matmul %0, %1, %cst {dimension_numbers = #tpu.dot_dimension_numbers<[1], [0], [0], [1], [0, 0, 1, 1], [], []>} : vector<128x1152xbf16>, vector<1152x128xbf16>, vector<128x128xf32> -> vector<128x128xf32>
    %c0_3 = arith.constant 0 : index
    %c0_4 = arith.constant 0 : index
    %3 = vector.load %arg3[%c0_3, %c0_4] : memref<1x128xf32, #tpu.memory_space<vmem>>, vector<1x128xf32>
    %4 = vector.broadcast %3 : vector<1x128xf32> to vector<128x128xf32>
    %5 = arith.addf %2, %4 : vector<128x128xf32>
    %cst_5 = arith.constant 0.000000e+00 : f32
    %6 = vector.broadcast %cst_5 : f32 to vector<128x128xf32>
    %7 = arith.maximumf %5, %6 : vector<128x128xf32>
    %8 = arith.truncf %7 : vector<128x128xf32> to vector<128x128xbf16>
    %c0_6 = arith.constant 0 : index
    %c0_7 = arith.constant 0 : index
    %9 = vector.load %arg4[%c0_6, %c0_7] : memref<128x128xbf16, #tpu.memory_space<vmem>>, vector<128x128xbf16>
    tpu.vector_store %arg4[%c0_6, %c0_7], %8 {strides = array<i32>} : memref<128x128xbf16, #tpu.memory_space<vmem>>, vector<128x128xbf16>,
    return
  }
  func.func @transform_0(%arg0: i32) -> (i32, i32) {
    %c0_i32 = arith.constant 0 : i32
    %c0_i32_0 = arith.constant 0 : i32
    return %arg0, %c0_i32 : i32, i32
  }
  func.func @transform_1(%arg0: i32) -> (i32, i32) {
    %c0_i32 = arith.constant 0 : i32
    %c0_i32_0 = arith.constant 0 : i32
    %c0_i32_1 = arith.constant 0 : i32
    return %c0_i32, %c0_i32_0 : i32, i32
  }
  func.func @transform_2(%arg0: i32) -> (i32, i32) {
    %c0_i32 = arith.constant 0 : i32
    %c0_i32_0 = arith.constant 0 : i32
    %c0_i32_1 = arith.constant 0 : i32
    return %c0_i32, %c0_i32_0 : i32, i32
  }
  func.func @transform_3(%arg0: i32) -> (i32, i32) {
    %c0_i32 = arith.constant 0 : i32
    %c0_i32_0 = arith.constant 0 : i32
    return %arg0, %c0_i32 : i32, i32
  }
}

module attributes {stable_mosaic.version = 11 : i64} {
  func.func @_gap_fc_kernel(%arg0: memref<2x64x128xbf16, #tpu.memory_space<vmem>>, %arg1: memref<128x128xbf16, #tpu.memory_space<vmem>>, %arg2: memref<1x128xf32, #tpu.memory_space<vmem>>, %arg3: memref<2x128xf32, #tpu.memory_space<vmem>>) attributes {dimension_semantics = [], scalar_prefetch = 0 : i64, scratch_operands = 0 : i64, tpu.core_type = #tpu.core_type<tc>} {
    %c0 = arith.constant 0 : index
    %c0_0 = arith.constant 0 : index
    %c0_1 = arith.constant 0 : index
    %0 = vector.load %arg0[%c0, %c0_0, %c0_1] : memref<2x64x128xbf16, #tpu.memory_space<vmem>>, vector<2x64x128xbf16>
    %1 = arith.extf %0 : vector<2x64x128xbf16> to vector<2x64x128xf32>
    %cst = arith.constant dense<0.000000e+00> : vector<2x128xf32>
    %2 = vector.multi_reduction <add>, %1, %cst [1] : vector<2x64x128xf32> to vector<2x128xf32>
    %cst_2 = arith.constant 1.562500e-02 : f32
    %3 = vector.broadcast %cst_2 : f32 to vector<2x128xf32>
    %4 = arith.mulf %2, %3 : vector<2x128xf32>
    %cst_3 = arith.constant 0.000000e+00 : f32
    %5 = vector.broadcast %cst_3 : f32 to vector<6x128xf32>
    %6 = tpu.concatenate %4, %5 in 0 : vector<2x128xf32>, vector<6x128xf32> -> vector<8x128xf32>
    %7 = arith.truncf %6 : vector<8x128xf32> to vector<8x128xbf16>
    %c0_4 = arith.constant 0 : index
    %c0_5 = arith.constant 0 : index
    %8 = vector.load %arg1[%c0_4, %c0_5] : memref<128x128xbf16, #tpu.memory_space<vmem>>, vector<128x128xbf16>
    %cst_6 = arith.constant dense<0.000000e+00> : vector<8x128xf32>
    %9 = tpu.matmul %7, %8, %cst_6 {dimension_numbers = #tpu.dot_dimension_numbers<[1], [0], [0], [1], [0, 0, 1, 1], [], []>} : vector<8x128xbf16>, vector<128x128xbf16>, vector<8x128xf32> -> vector<8x128xf32>
    %10 = vector.extract_strided_slice %9 {offsets = [0, 0], sizes = [2, 128], strides = [1, 1]} : vector<8x128xf32> to vector<2x128xf32>
    %c0_7 = arith.constant 0 : index
    %c0_8 = arith.constant 0 : index
    %11 = vector.load %arg2[%c0_7, %c0_8] : memref<1x128xf32, #tpu.memory_space<vmem>>, vector<1x128xf32>
    %12 = vector.broadcast %11 : vector<1x128xf32> to vector<2x128xf32>
    %13 = arith.addf %10, %12 : vector<2x128xf32>
    %c0_9 = arith.constant 0 : index
    %c0_10 = arith.constant 0 : index
    %14 = vector.load %arg3[%c0_9, %c0_10] : memref<2x128xf32, #tpu.memory_space<vmem>>, vector<2x128xf32>
    tpu.vector_store %arg3[%c0_9, %c0_10], %13 {strides = array<i32>} : memref<2x128xf32, #tpu.memory_space<vmem>>, vector<2x128xf32>,
    return
  }
}

module attributes {stable_mosaic.version = 11 : i64} {
  func.func @_matmul_bias_kernel(%arg0: i32, %arg1: memref<128x256xbf16, #tpu.memory_space<vmem>>, %arg2: memref<256x128xbf16, #tpu.memory_space<vmem>>, %arg3: memref<1x128xf32, #tpu.memory_space<vmem>>, %arg4: memref<128x128xbf16, #tpu.memory_space<vmem>>) attributes {dimension_semantics = [#tpu.dimension_semantics<parallel>], iteration_bounds = array<i64: 1>, scalar_prefetch = 0 : i64, scratch_operands = 0 : i64, tpu.core_type = #tpu.core_type<tc>, window_params = [{transform_indices = @transform_0, window_bounds = array<i64: 128, 256>}, {pipeline_mode = #tpu.pipeline_mode<synchronous>, transform_indices = @transform_1, window_bounds = array<i64: 256, 128>}, {pipeline_mode = #tpu.pipeline_mode<synchronous>, transform_indices = @transform_2, window_bounds = array<i64: 1, 128>}, {transform_indices = @transform_3, window_bounds = array<i64: 128, 128>}]} {
    %c0 = arith.constant 0 : index
    %c0_0 = arith.constant 0 : index
    %0 = vector.load %arg1[%c0, %c0_0] : memref<128x256xbf16, #tpu.memory_space<vmem>>, vector<128x256xbf16>
    %c0_1 = arith.constant 0 : index
    %c0_2 = arith.constant 0 : index
    %1 = vector.load %arg2[%c0_1, %c0_2] : memref<256x128xbf16, #tpu.memory_space<vmem>>, vector<256x128xbf16>
    %cst = arith.constant dense<0.000000e+00> : vector<128x128xf32>
    %2 = tpu.matmul %0, %1, %cst {dimension_numbers = #tpu.dot_dimension_numbers<[1], [0], [0], [1], [0, 0, 1, 1], [], []>} : vector<128x256xbf16>, vector<256x128xbf16>, vector<128x128xf32> -> vector<128x128xf32>
    %c0_3 = arith.constant 0 : index
    %c0_4 = arith.constant 0 : index
    %3 = vector.load %arg3[%c0_3, %c0_4] : memref<1x128xf32, #tpu.memory_space<vmem>>, vector<1x128xf32>
    %4 = vector.broadcast %3 : vector<1x128xf32> to vector<128x128xf32>
    %5 = arith.addf %2, %4 : vector<128x128xf32>
    %cst_5 = arith.constant 0.000000e+00 : f32
    %6 = vector.broadcast %cst_5 : f32 to vector<128x128xf32>
    %7 = arith.maximumf %5, %6 : vector<128x128xf32>
    %8 = arith.truncf %7 : vector<128x128xf32> to vector<128x128xbf16>
    %c0_6 = arith.constant 0 : index
    %c0_7 = arith.constant 0 : index
    %9 = vector.load %arg4[%c0_6, %c0_7] : memref<128x128xbf16, #tpu.memory_space<vmem>>, vector<128x128xbf16>
    tpu.vector_store %arg4[%c0_6, %c0_7], %8 {strides = array<i32>} : memref<128x128xbf16, #tpu.memory_space<vmem>>, vector<128x128xbf16>,
    return
  }
  func.func @transform_0(%arg0: i32) -> (i32, i32) {
    %c0_i32 = arith.constant 0 : i32
    %c0_i32_0 = arith.constant 0 : i32
    return %arg0, %c0_i32 : i32, i32
  }
  func.func @transform_1(%arg0: i32) -> (i32, i32) {
    %c0_i32 = arith.constant 0 : i32
    %c0_i32_0 = arith.constant 0 : i32
    %c0_i32_1 = arith.constant 0 : i32
    return %c0_i32, %c0_i32_0 : i32, i32
  }
  func.func @transform_2(%arg0: i32) -> (i32, i32) {
    %c0_i32 = arith.constant 0 : i32
    %c0_i32_0 = arith.constant 0 : i32
    %c0_i32_1 = arith.constant 0 : i32
    return %c0_i32, %c0_i32_0 : i32, i32
  }
  func.func @transform_3(%arg0: i32) -> (i32, i32) {
    %c0_i32 = arith.constant 0 : i32
    %c0_i32_0 = arith.constant 0 : i32
    return %arg0, %c0_i32 : i32, i32
  }
}

</mosaic_0001>

<bundles_post_ra>
// kernel: resnext_forward.6
= control target key start
LH: loop header
LB: loop body
LE: loop exit
PB: predicated region body
PF: predicated region fallthrough
CT: control target
= control target key end

     0   :  { %s1126_s12 = smov 0   ;;  %s1247_s0 = inlined_call_operand.vmem [shape: bf16[512,128], index: 0, kind: input, shape index: {}]   ;;  %s1248_s1 = inlined_call_operand.vmem [shape: bf16[128,128], index: 1, kind: input, shape index: {}]   ;;  %s1249_s2 = inlined_call_operand.vmem [shape: f32[1,128], index: 2, kind: input, shape index: {}]   ;;  %s1250_s3 = inlined_call_operand.vmem [shape: bf16[512,128], index: 3, kind: output, shape index: {}]  }
   0x1 LB: > { %s783_s13 = sadd.s32 4294967295, %s1104_s12   ;;  %p787_p0 = scmp.ge.s32.totalorder %s1104_s12, 1  ;;  %s1104_s12 = sphi %s1126_s12, %s13_s12  }
   0x2   : > { %p138_p1 = scmp.lt.s32.totalorder %s1104_s12, 3 }
   0x4   : > { %p139_p2 = pnand %p787_p0, %p138_p1 }
   0x5   : > { %v1074_v0 = vld [vmem:[%s1248_s1] sm:$0xff] (!%p139_p2)   ;;  %s788_s16 = sshll.u32 (!%p139_p2), %s783_s13, 5  ;;  %v1075_v1 = vld [vmem:[%s1248_s1 + $0x8] sm:$0xff] (!%p139_p2)   ;;  %v1076_v2 = vld [vmem:[%s1248_s1 + $0x10] sm:$0xff] (!%p139_p2)  }
   0x6   : > { %142 = sbr.rel (%p139_p2) target bundleno = 284 (0x11c), region = 32  ;;  %p163_p3 = scmp.lt.s32.totalorder (!%p139_p2), %s788_s16, 63  ;;  %1002 = vmatprep.subr.bf16.mxu0 (!%p139_p2), %v1074_v0  ;;  %1050 = vmatprep.subr.bf16.mxu1 (!%p139_p2), %v1074_v0  ;;  %v1077_v3 = vld [vmem:[%s1248_s1 + $0x18] sm:$0xff] (!%p139_p2)   ;;  %v1078_v6 = vld [vmem:[%s1248_s1 + $0x20] sm:$0xff] (!%p139_p2)   ;;  %v1079_v7 = vld [vmem:[%s1248_s1 + $0x28] sm:$0xff] (!%p139_p2)  }
   0x7   : > { %1003 = vmatpush3.bf16.msra.mxu0 (!%p139_p2), %v1074_v0  ;;  %1058 = vmatpush3.bf16.msra.mxu1 (!%p139_p2), %v1074_v0  ;;  %v1080_v8 = vld [vmem:[%s1248_s1 + $0x30] sm:$0xff] (!%p139_p2)   ;;  %v1081_v9 = vld [vmem:[%s1248_s1 + $0x38] sm:$0xff] (!%p139_p2)   ;;  %v1187_v24 = vld [vmem:[%s1249_s2] ss:$0 sm:$0xff] (!%p139_p2) }
   0x8   : > { %1004 = vmatprep.subr.bf16.mxu0 (!%p139_p2), %v1075_v1  ;;  %1051 = vmatprep.subr.bf16.mxu1 (!%p139_p2), %v1075_v1 }
   0xb   : > { %1005 = vmatpush3.bf16.msra.mxu0 (!%p139_p2), %v1075_v1  ;;  %1059 = vmatpush3.bf16.msra.mxu1 (!%p139_p2), %v1075_v1 }
   0xc   : > { %1006 = vmatprep.subr.bf16.mxu0 (!%p139_p2), %v1076_v2  ;;  %1052 = vmatprep.subr.bf16.mxu1 (!%p139_p2), %v1076_v2 }
   0xd   : > { %s1252_s16 = smov (!%p163_p3, %s788_s16), 63 }
   0xe   : > { %s789_s21 = sshll.u32 %s1252_s16, 2 }
   0xf   : > { %s1151_s24 = scalar_lea.vmem %s1247_s0, %s789_s21  ;;  %1007 = vmatpush3.bf16.msra.mxu0 %v1076_v2  ;;  %1060 = vmatpush3.bf16.msra.mxu1 %v1076_v2  ;;  %s1202_s13 = scalar_lea.vmem %s1250_s3, %s789_s21 }
  0x10   : > { %v1082_v4 = vld [vmem:[%s1151_s24] sm:$0xff]   ;;  %1008 = vmatprep.subr.bf16.mxu0 %v1077_v3  ;;  %1053 = vmatprep.subr.bf16.mxu1 %v1077_v3  ;;  %v1084_v10 = vld [vmem:[%s1151_s24 + $0x8] sm:$0xff]   ;;  %v1086_v12 = vld [vmem:[%s1151_s24 + $0x10] sm:$0xff]  }
  0x11   : > { %v1083_v5 = vld [vmem:[%s1151_s24 + $0x40] sm:$0xff]   ;;  %1018 = vmatprep.mubr.bf16.mxu0 %v1082_v4  ;;  %v1085_v11 = vld [vmem:[%s1151_s24 + $0x48] sm:$0xff]   ;;  %v1087_v13 = vld [vmem:[%s1151_s24 + $0x50] sm:$0xff]  }
  0x12   : > { %1034 = vmatprep.mubr.bf16.mxu1 %v1083_v5  ;;  %v1088_v14 = vld [vmem:[%s1151_s24 + $0x18] sm:$0xff]   ;;  %v1090_v16 = vld [vmem:[%s1151_s24 + $0x20] sm:$0xff]   ;;  %v1092_v18 = vld [vmem:[%s1151_s24 + $0x28] sm:$0xff]  }
  0x13   : > { %1009 = vmatpush3.bf16.msra.mxu0 %v1077_v3  ;;  %1061 = vmatpush3.bf16.msra.mxu1 %v1077_v3  ;;  %v1089_v15 = vld [vmem:[%s1151_s24 + $0x58] sm:$0xff]   ;;  %v1091_v17 = vld [vmem:[%s1151_s24 + $0x60] sm:$0xff]   ;;  %v1093_v19 = vld [vmem:[%s1151_s24 + $0x68] sm:$0xff]  }
  0x14   : > { %1010 = vmatprep.subr.bf16.mxu0 %v1078_v6  ;;  %1054 = vmatprep.subr.bf16.mxu1 %v1078_v6  ;;  %v1094_v20 = vld [vmem:[%s1151_s24 + $0x30] sm:$0xff]   ;;  %v1096_v22 = vld [vmem:[%s1151_s24 + $0x38] sm:$0xff]  }
  0x15   : > { %v1095_v21 = vld [vmem:[%s1151_s24 + $0x70] sm:$0xff]   ;;  %v1097_v23 = vld [vmem:[%s1151_s24 + $0x78] sm:$0xff]  }
  0x17   : > { %1011 = vmatpush3.bf16.msra.mxu0 %v1078_v6  ;;  %1062 = vmatpush3.bf16.msra.mxu1 %v1078_v6 }
  0x18   : > { %1012 = vmatprep.subr.bf16.mxu0 %v1079_v7  ;;  %1055 = vmatprep.subr.bf16.mxu1 %v1079_v7 }
  0x1b   : > { %1013 = vmatpush3.bf16.msra.mxu0 %v1079_v7  ;;  %1063 = vmatpush3.bf16.msra.mxu1 %v1079_v7 }
  0x1c   : > { %1014 = vmatprep.subr.bf16.mxu0 %v1080_v8  ;;  %1056 = vmatprep.subr.bf16.mxu1 %v1080_v8 }
  0x1f   : > { %1015 = vmatpush3.bf16.msra.mxu0 %v1080_v8  ;;  %1064 = vmatpush3.bf16.msra.mxu1 %v1080_v8 }
  0x20   : > { %1016 = vmatprep.subr.bf16.mxu0 %v1081_v9  ;;  %1057 = vmatprep.subr.bf16.mxu1 %v1081_v9 }
  0x23   : > { %1017 = vmatpush3.bf16.msra.mxu0 %v1081_v9  ;;  %1065 = vmatpush3.bf16.msra.mxu1 %v1081_v9 }
  0x26   : > { %1019 = vmatmul.mubr.bf16.vlgmr.msra.gmra.mrb[0].mxu0 %v1084_v10  ;;  %1035 = vmatmul.mubr.bf16.vlgmr.msra.gmra.mrb[0].mxu1 %v1085_v11 }
  0x27   : > { %1022 = vmatprep.mubr.bf16.mxu0 %v1086_v12  ;;  %1038 = vmatprep.mubr.bf16.mxu1 %v1087_v13 }
  0x2e   : > { %1023 = vmatmul.mubr.bf16.gmra.mrb[4].mxu0 %v1088_v14  ;;  %1039 = vmatmul.mubr.bf16.gmra.mrb[4].mxu1 %v1089_v15 }
  0x2f   : > { %1026 = vmatprep.mubr.bf16.mxu0 %v1090_v16  ;;  %1042 = vmatprep.mubr.bf16.mxu1 %v1091_v17 }
  0x36   : > { %1027 = vmatmul.mubr.bf16.gmra.mrb[8].mxu0 %v1092_v18  ;;  %1043 = vmatmul.mubr.bf16.gmra.mrb[8].mxu1 %v1093_v19 }
  0x37   : > { %1030 = vmatprep.mubr.bf16.mxu0 %v1094_v20  ;;  %1046 = vmatprep.mubr.bf16.mxu1 %v1095_v21 }
  0x3e   : > { %1031 = vmatmul.mubr.bf16.gmra.mrb[12].mxu0 %v1096_v22  ;;  %1047 = vmatmul.mubr.bf16.gmra.mrb[12].mxu1 %v1097_v23 }
  0xf9   : > { %v1020_v25 = vpop.f32.mrb[0].mxu0  ;;  %v1036_v26 = vpop.f32.mrb[0].mxu1 }
  0xfa   : > { %v417_v27 = vadd.f32 %v1020_v25, %v1187_v24  ;;  %v481_v28 = vadd.f32 %v1036_v26, %v1187_v24  ;;  %v408_v29 = vpop.f32.mrb[1].mxu0  ;;  %v472_v30 = vpop.f32.mrb[1].mxu1 }
  0xfb   : > { %v409_v31 = vadd.f32 %v1187_v24, %v408_v29  ;;  %v473_v32 = vadd.f32 %v1187_v24, %v472_v30  ;;  %v1021_v33 = vpop.f32.mrb[2].mxu0  ;;  %v1037_v34 = vpop.f32.mrb[2].mxu1 }
  0xfc   : > { %v420_v35 = vadd.f32 %v1021_v33, %v1187_v24  ;;  %v484_v36 = vadd.f32 %v1037_v34, %v1187_v24  ;;  %v411_v37 = vpop.f32.mrb[3].mxu0  ;;  %v475_v38 = vpop.f32.mrb[3].mxu1  ;;  %v537_v41 = vmax.f32 %v417_v27, 0.0  ;;  %v553_v42 = vmax.f32 %v481_v28, 0.0 }
  0xfd   : > { %v412_v39 = vadd.f32 %v1187_v24, %v411_v37  ;;  %v476_v40 = vadd.f32 %v1187_v24, %v475_v38  ;;  %v535_v45 = vmax.f32 %v409_v31, 0.0  ;;  %v551_v46 = vmax.f32 %v473_v32, 0.0 }
  0xfe   : > { %v538_v43 = vmax.f32 %v420_v35, 0.0  ;;  %v554_v44 = vmax.f32 %v484_v36, 0.0 }
  0xff   : > { %v536_v47 = vmax.f32 %v412_v39, 0.0  ;;  %v552_v48 = vmax.f32 %v476_v40, 0.0 }
 0x100   : > { %v891_v49 = vpack.c.bf16 %v538_v43, %v537_v41  ;;  %v931_v50 = vpack.c.bf16 %v554_v44, %v553_v42 }
 0x101   : > { %v886_v51 = vpack.c.bf16 %v536_v47, %v535_v45  ;;  %v926_v52 = vpack.c.bf16 %v552_v48, %v551_v46  ;;  %v1024_v53 = vpop.f32.mrb[4].mxu0  ;;  %v1040_v54 = vpop.f32.mrb[4].mxu1 }
 0x102   : > { %963 = vst [vmem:[%s1202_s13 + $0x8] sm:$0xff] %v891_v49   ;;  %971 = vst [vmem:[%s1202_s13 + $0x48] sm:$0xff] %v931_v50   ;;  %v433_v55 = vadd.f32 %v1024_v53, %v1187_v24  ;;  %v497_v56 = vadd.f32 %v1040_v54, %v1187_v24  ;;  %v424_v57 = vpop.f32.mrb[5].mxu0  ;;  %v488_v58 = vpop.f32.mrb[5].mxu1 }
 0x103   : > { %887 = vst [vmem:[%s1202_s13] sm:$0xff] %v886_v51   ;;  %970 = vst [vmem:[%s1202_s13 + $0x40] sm:$0xff] %v926_v52   ;;  %v425_v59 = vadd.f32 %v1187_v24, %v424_v57  ;;  %v489_v60 = vadd.f32 %v1187_v24, %v488_v58  ;;  %v1025_v61 = vpop.f32.mrb[6].mxu0  ;;  %v1041_v62 = vpop.f32.mrb[6].mxu1 }
 0x104   : > { %v436_v63 = vadd.f32 %v1025_v61, %v1187_v24  ;;  %v500_v0 = vadd.f32 %v1041_v62, %v1187_v24  ;;  %v427_v1 = vpop.f32.mrb[7].mxu0  ;;  %v491_v2 = vpop.f32.mrb[7].mxu1  ;;  %v541_v5 = vmax.f32 %v433_v55, 0.0  ;;  %v557_v6 = vmax.f32 %v497_v56, 0.0 }
 0x105   : > { %v428_v3 = vadd.f32 %v1187_v24, %v427_v1  ;;  %v492_v4 = vadd.f32 %v1187_v24, %v491_v2  ;;  %v539_v9 = vmax.f32 %v425_v59, 0.0  ;;  %v555_v10 = vmax.f32 %v489_v60, 0.0 }
 0x106   : > { %v542_v7 = vmax.f32 %v436_v63, 0.0  ;;  %v558_v8 = vmax.f32 %v500_v0, 0.0 }
 0x107   : > { %v540_v11 = vmax.f32 %v428_v3, 0.0  ;;  %v556_v12 = vmax.f32 %v492_v4, 0.0 }
 0x108   : > { %v901_v13 = vpack.c.bf16 %v542_v7, %v541_v5  ;;  %v941_v14 = vpack.c.bf16 %v558_v8, %v557_v6 }
 0x109   : > { %v896_v15 = vpack.c.bf16 %v540_v11, %v539_v9  ;;  %v936_v16 = vpack.c.bf16 %v556_v12, %v555_v10  ;;  %v1028_v17 = vpop.f32.mrb[8].mxu0  ;;  %v1044_v18 = vpop.f32.mrb[8].mxu1 }
 0x10a   : > { %965 = vst [vmem:[%s1202_s13 + $0x18] sm:$0xff] %v901_v13   ;;  %973 = vst [vmem:[%s1202_s13 + $0x58] sm:$0xff] %v941_v14   ;;  %v449_v19 = vadd.f32 %v1028_v17, %v1187_v24  ;;  %v513_v20 = vadd.f32 %v1044_v18, %v1187_v24  ;;  %v440_v21 = vpop.f32.mrb[9].mxu0  ;;  %v504_v22 = vpop.f32.mrb[9].mxu1 }
 0x10b   : > { %964 = vst [vmem:[%s1202_s13 + $0x10] sm:$0xff] %v896_v15   ;;  %972 = vst [vmem:[%s1202_s13 + $0x50] sm:$0xff] %v936_v16   ;;  %v441_v23 = vadd.f32 %v1187_v24, %v440_v21  ;;  %v505_v25 = vadd.f32 %v1187_v24, %v504_v22  ;;  %v1029_v26 = vpop.f32.mrb[10].mxu0  ;;  %v1045_v27 = vpop.f32.mrb[10].mxu1 }
 0x10c   : > { %v452_v28 = vadd.f32 %v1029_v26, %v1187_v24  ;;  %v516_v29 = vadd.f32 %v1045_v27, %v1187_v24  ;;  %v443_v30 = vpop.f32.mrb[11].mxu0  ;;  %v507_v31 = vpop.f32.mrb[11].mxu1  ;;  %v545_v34 = vmax.f32 %v449_v19, 0.0  ;;  %v561_v35 = vmax.f32 %v513_v20, 0.0 }
 0x10d   : > { %v444_v32 = vadd.f32 %v1187_v24, %v443_v30  ;;  %v508_v33 = vadd.f32 %v1187_v24, %v507_v31  ;;  %v543_v38 = vmax.f32 %v441_v23, 0.0  ;;  %v559_v39 = vmax.f32 %v505_v25, 0.0 }
 0x10e   : > { %v546_v36 = vmax.f32 %v452_v28, 0.0  ;;  %v562_v37 = vmax.f32 %v516_v29, 0.0 }
 0x10f   : > { %v544_v40 = vmax.f32 %v444_v32, 0.0  ;;  %v560_v41 = vmax.f32 %v508_v33, 0.0 }
 0x110   : > { %v911_v42 = vpack.c.bf16 %v546_v36, %v545_v34  ;;  %v951_v43 = vpack.c.bf16 %v562_v37, %v561_v35 }
 0x111   : > { %v906_v44 = vpack.c.bf16 %v544_v40, %v543_v38  ;;  %v946_v45 = vpack.c.bf16 %v560_v41, %v559_v39  ;;  %v1032_v46 = vpop.f32.mrb[12].mxu0  ;;  %v1048_v47 = vpop.f32.mrb[12].mxu1 }
 0x112   : > { %967 = vst [vmem:[%s1202_s13 + $0x28] sm:$0xff] %v911_v42   ;;  %975 = vst [vmem:[%s1202_s13 + $0x68] sm:$0xff] %v951_v43   ;;  %v465_v48 = vadd.f32 %v1032_v46, %v1187_v24  ;;  %v529_v49 = vadd.f32 %v1048_v47, %v1187_v24  ;;  %v456_v50 = vpop.f32.mrb[13].mxu0  ;;  %v520_v51 = vpop.f32.mrb[13].mxu1 }
 0x113   : > { %966 = vst [vmem:[%s1202_s13 + $0x20] sm:$0xff] %v906_v44   ;;  %974 = vst [vmem:[%s1202_s13 + $0x60] sm:$0xff] %v946_v45   ;;  %v457_v52 = vadd.f32 %v1187_v24, %v456_v50  ;;  %v521_v53 = vadd.f32 %v1187_v24, %v520_v51  ;;  %v1033_v54 = vpop.f32.mrb[14].mxu0  ;;  %v1049_v55 = vpop.f32.mrb[14].mxu1 }
 0x114   : > { %v468_v56 = vadd.f32 %v1033_v54, %v1187_v24  ;;  %v532_v57 = vadd.f32 %v1049_v55, %v1187_v24  ;;  %v459_v58 = vpop.f32.mrb[15].mxu0  ;;  %v523_v59 = vpop.f32.mrb[15].mxu1  ;;  %v549_v62 = vmax.f32 %v465_v48, 0.0  ;;  %v565_v63 = vmax.f32 %v529_v49, 0.0 }
 0x115   : > { %v460_v60 = vadd.f32 %v1187_v24, %v459_v58  ;;  %v524_v61 = vadd.f32 %v1187_v24, %v523_v59  ;;  %v547_v2 = vmax.f32 %v457_v52, 0.0  ;;  %v563_v3 = vmax.f32 %v521_v53, 0.0 }
 0x116   : > { %v550_v0 = vmax.f32 %v468_v56, 0.0  ;;  %v566_v1 = vmax.f32 %v532_v57, 0.0 }
 0x117   : > { %v548_v4 = vmax.f32 %v460_v60, 0.0  ;;  %v564_v5 = vmax.f32 %v524_v61, 0.0 }
 0x118   : > { %v921_v6 = vpack.c.bf16 %v550_v0, %v549_v62  ;;  %v961_v7 = vpack.c.bf16 %v566_v1, %v565_v63 }
 0x119   : > { %v916_v8 = vpack.c.bf16 %v548_v4, %v547_v2  ;;  %v956_v9 = vpack.c.bf16 %v564_v5, %v563_v3 }
 0x11a   : > { %969 = vst [vmem:[%s1202_s13 + $0x38] sm:$0xff] %v921_v6   ;;  %977 = vst [vmem:[%s1202_s13 + $0x78] sm:$0xff] %v961_v7  }
 0x11b   : > { %968 = vst [vmem:[%s1202_s13 + $0x30] sm:$0xff] %v916_v8   ;;  %976 = vst [vmem:[%s1202_s13 + $0x70] sm:$0xff] %v956_v9  }
 0x11c PF: > { %s13_s12 = sadd.s32 1, %s1104_s12  }
 0x11d   : > { %p10_p4 = scmp.ge.s32.totalorder %s13_s12, 4  }
 0x11f   :  { %12 = sbr.rel (!%p10_p4) target bundleno = 1 (0x1), region = 62 }

// kernel: resnext_forward.8
= control target key start
LH: loop header
LB: loop body
LE: loop exit
PB: predicated region body
PF: predicated region fallthrough
CT: control target
= control target key end

     0   :  { %s618_s1 = inlined_call_operand.vmem [shape: bf16[128,128], index: 1, kind: input, shape index: {}]   ;;  %s619_s0 = inlined_call_operand.vmem [shape: bf16[128,128], index: 0, kind: input, shape index: {}]   ;;  %s620_s2 = inlined_call_operand.vmem [shape: f32[1,128], index: 2, kind: input, shape index: {}]   ;;  %s621_s3 = inlined_call_operand.vmem [shape: bf16[128,128], index: 3, kind: output, shape index: {}]  }
   0x1   :  { %v507_v0 = vld [vmem:[%s618_s1] sm:$0xff]   ;;  %v508_v1 = vld [vmem:[%s618_s1 + $0x8] sm:$0xff]   ;;  %v509_v2 = vld [vmem:[%s618_s1 + $0x10] sm:$0xff]  }
   0x2   :  { %459 = vmatprep.subr.bf16.mxu0 %v507_v0  ;;  %491 = vmatprep.subr.bf16.mxu1 %v507_v0  ;;  %v510_v3 = vld [vmem:[%s618_s1 + $0x18] sm:$0xff]   ;;  %v515_v4 = vld [vmem:[%s619_s0] sm:$0xff]   ;;  %v512_v7 = vld [vmem:[%s618_s1 + $0x28] sm:$0xff]  }
   0x3   :  { %460 = vmatpush3.bf16.msra.mxu0 %v507_v0  ;;  %499 = vmatpush3.bf16.msra.mxu1 %v507_v0  ;;  %v516_v5 = vld [vmem:[%s619_s0 + $0x20] sm:$0xff]   ;;  %v513_v8 = vld [vmem:[%s618_s1 + $0x30] sm:$0xff]   ;;  %v514_v9 = vld [vmem:[%s618_s1 + $0x38] sm:$0xff]  }
   0x4   :  { %461 = vmatprep.subr.bf16.mxu0 %v508_v1  ;;  %492 = vmatprep.subr.bf16.mxu1 %v508_v1  ;;  %v511_v6 = vld [vmem:[%s618_s1 + $0x20] sm:$0xff]   ;;  %v517_v10 = vld [vmem:[%s619_s0 + $0x8] sm:$0xff]   ;;  %v519_v12 = vld [vmem:[%s619_s0 + $0x10] sm:$0xff]  }
   0x5   :  { %475 = vmatprep.mubr.bf16.mxu0 %v515_v4  ;;  %483 = vmatprep.mubr.bf16.mxu1 %v516_v5  ;;  %v518_v11 = vld [vmem:[%s619_s0 + $0x28] sm:$0xff]   ;;  %v520_v13 = vld [vmem:[%s619_s0 + $0x30] sm:$0xff]   ;;  %v521_v14 = vld [vmem:[%s619_s0 + $0x18] sm:$0xff]  }
   0x6   :  { %v522_v15 = vld [vmem:[%s619_s0 + $0x38] sm:$0xff]   ;;  %v347_v16 = vld [vmem:[%s620_s2] ss:$0 sm:$0xff] }
   0x7   :  { %462 = vmatpush3.bf16.msra.mxu0 %v508_v1  ;;  %500 = vmatpush3.bf16.msra.mxu1 %v508_v1 }
   0x8   :  { %463 = vmatprep.subr.bf16.mxu0 %v509_v2  ;;  %493 = vmatprep.subr.bf16.mxu1 %v509_v2 }
   0xb   :  { %464 = vmatpush3.bf16.msra.mxu0 %v509_v2  ;;  %501 = vmatpush3.bf16.msra.mxu1 %v509_v2 }
   0xc   :  { %465 = vmatprep.subr.bf16.mxu0 %v510_v3  ;;  %494 = vmatprep.subr.bf16.mxu1 %v510_v3 }
   0xf   :  { %466 = vmatpush3.bf16.msra.mxu0 %v510_v3  ;;  %502 = vmatpush3.bf16.msra.mxu1 %v510_v3 }
  0x10   :  { %467 = vmatprep.subr.bf16.mxu0 %v511_v6  ;;  %495 = vmatprep.subr.bf16.mxu1 %v511_v6 }
  0x13   :  { %468 = vmatpush3.bf16.msra.mxu0 %v511_v6  ;;  %503 = vmatpush3.bf16.msra.mxu1 %v511_v6 }
  0x14   :  { %469 = vmatprep.subr.bf16.mxu0 %v512_v7  ;;  %496 = vmatprep.subr.bf16.mxu1 %v512_v7 }
  0x17   :  { %470 = vmatpush3.bf16.msra.mxu0 %v512_v7  ;;  %504 = vmatpush3.bf16.msra.mxu1 %v512_v7 }
  0x18   :  { %471 = vmatprep.subr.bf16.mxu0 %v513_v8  ;;  %497 = vmatprep.subr.bf16.mxu1 %v513_v8 }
  0x1b   :  { %472 = vmatpush3.bf16.msra.mxu0 %v513_v8  ;;  %505 = vmatpush3.bf16.msra.mxu1 %v513_v8 }
  0x1c   :  { %473 = vmatprep.subr.bf16.mxu0 %v514_v9  ;;  %498 = vmatprep.subr.bf16.mxu1 %v514_v9 }
  0x1f   :  { %474 = vmatpush3.bf16.msra.mxu0 %v514_v9  ;;  %506 = vmatpush3.bf16.msra.mxu1 %v514_v9 }
  0x22   :  { %476 = vmatmul.mubr.bf16.vlgmr.msra.gmra.mrb[0].mxu0 %v517_v10  ;;  %484 = vmatmul.mubr.bf16.vlgmr.msra.gmra.mrb[0].mxu1 %v518_v11 }
  0x23   :  { %479 = vmatprep.mubr.bf16.mxu0 %v519_v12  ;;  %487 = vmatprep.mubr.bf16.mxu1 %v520_v13 }
  0x2a   :  { %480 = vmatmul.mubr.bf16.gmra.mrb[4].mxu0 %v521_v14  ;;  %488 = vmatmul.mubr.bf16.gmra.mrb[4].mxu1 %v522_v15 }
  0xf5   :  { %v477_v17 = vpop.f32.mrb[0].mxu0  ;;  %v485_v18 = vpop.f32.mrb[0].mxu1 }
  0xf6   :  { %v193_v19 = vadd.f32 %v477_v17, %v347_v16  ;;  %v225_v20 = vadd.f32 %v485_v18, %v347_v16  ;;  %v184_v21 = vpop.f32.mrb[1].mxu0  ;;  %v216_v22 = vpop.f32.mrb[1].mxu1 }
  0xf7   :  { %v185_v23 = vadd.f32 %v347_v16, %v184_v21  ;;  %v217_v24 = vadd.f32 %v347_v16, %v216_v22  ;;  %v478_v25 = vpop.f32.mrb[2].mxu0  ;;  %v486_v26 = vpop.f32.mrb[2].mxu1 }
  0xf8   :  { %v196_v27 = vadd.f32 %v478_v25, %v347_v16  ;;  %v228_v28 = vadd.f32 %v486_v26, %v347_v16  ;;  %v187_v29 = vpop.f32.mrb[3].mxu0  ;;  %v219_v30 = vpop.f32.mrb[3].mxu1  ;;  %v249_v33 = vmax.f32 %v193_v19, 0.0  ;;  %v257_v34 = vmax.f32 %v225_v20, 0.0 }
  0xf9   :  { %v188_v31 = vadd.f32 %v347_v16, %v187_v29  ;;  %v220_v32 = vadd.f32 %v347_v16, %v219_v30  ;;  %v247_v37 = vmax.f32 %v185_v23, 0.0  ;;  %v255_v38 = vmax.f32 %v217_v24, 0.0 }
  0xfa   :  { %v250_v35 = vmax.f32 %v196_v27, 0.0  ;;  %v258_v36 = vmax.f32 %v228_v28, 0.0 }
  0xfb   :  { %v248_v39 = vmax.f32 %v188_v31, 0.0  ;;  %v256_v40 = vmax.f32 %v220_v32, 0.0 }
  0xfc   :  { %v404_v41 = vpack.c.bf16 %v250_v35, %v249_v33  ;;  %v424_v42 = vpack.c.bf16 %v258_v36, %v257_v34 }
  0xfd   :  { %v399_v43 = vpack.c.bf16 %v248_v39, %v247_v37  ;;  %v419_v44 = vpack.c.bf16 %v256_v40, %v255_v38  ;;  %v481_v45 = vpop.f32.mrb[4].mxu0  ;;  %v489_v46 = vpop.f32.mrb[4].mxu1 }
  0xfe   :  { %436 = vst [vmem:[%s621_s3 + $0x8] sm:$0xff] %v404_v41   ;;  %440 = vst [vmem:[%s621_s3 + $0x28] sm:$0xff] %v424_v42   ;;  %v209_v47 = vadd.f32 %v481_v45, %v347_v16  ;;  %v241_v48 = vadd.f32 %v489_v46, %v347_v16  ;;  %v200_v49 = vpop.f32.mrb[5].mxu0  ;;  %v232_v50 = vpop.f32.mrb[5].mxu1 }
  0xff   :  { %400 = vst [vmem:[%s621_s3] sm:$0xff] %v399_v43   ;;  %439 = vst [vmem:[%s621_s3 + $0x20] sm:$0xff] %v419_v44   ;;  %v201_v51 = vadd.f32 %v347_v16, %v200_v49  ;;  %v233_v52 = vadd.f32 %v347_v16, %v232_v50  ;;  %v482_v53 = vpop.f32.mrb[6].mxu0  ;;  %v490_v54 = vpop.f32.mrb[6].mxu1 }
 0x100   :  { %v212_v55 = vadd.f32 %v482_v53, %v347_v16  ;;  %v244_v56 = vadd.f32 %v490_v54, %v347_v16  ;;  %v203_v57 = vpop.f32.mrb[7].mxu0  ;;  %v235_v58 = vpop.f32.mrb[7].mxu1  ;;  %v253_v61 = vmax.f32 %v209_v47, 0.0  ;;  %v261_v62 = vmax.f32 %v241_v48, 0.0 }
 0x101   :  { %v204_v59 = vadd.f32 %v347_v16, %v203_v57  ;;  %v236_v60 = vadd.f32 %v347_v16, %v235_v58  ;;  %v251_v1 = vmax.f32 %v201_v51, 0.0  ;;  %v259_v2 = vmax.f32 %v233_v52, 0.0 }
 0x102   :  { %v254_v63 = vmax.f32 %v212_v55, 0.0  ;;  %v262_v0 = vmax.f32 %v244_v56, 0.0 }
 0x103   :  { %v252_v3 = vmax.f32 %v204_v59, 0.0  ;;  %v260_v4 = vmax.f32 %v236_v60, 0.0 }
 0x104   :  { %v414_v5 = vpack.c.bf16 %v254_v63, %v253_v61  ;;  %v434_v6 = vpack.c.bf16 %v262_v0, %v261_v62 }
 0x105   :  { %v409_v7 = vpack.c.bf16 %v252_v3, %v251_v1  ;;  %v429_v8 = vpack.c.bf16 %v260_v4, %v259_v2 }
 0x106   :  { %438 = vst [vmem:[%s621_s3 + $0x18] sm:$0xff] %v414_v5   ;;  %442 = vst [vmem:[%s621_s3 + $0x38] sm:$0xff] %v434_v6  }
 0x107   :  { %437 = vst [vmem:[%s621_s3 + $0x10] sm:$0xff] %v409_v7   ;;  %441 = vst [vmem:[%s621_s3 + $0x30] sm:$0xff] %v429_v8  }

// kernel: resnext_forward.7
= control target key start
LH: loop header
LB: loop body
LE: loop exit
PB: predicated region body
PF: predicated region fallthrough
CT: control target
= control target key end

     0   :  { %vm49_vm0 = vsmask.f32 3328  ;;  %vm50_vm1 = vsmask.f32 7440  ;;  %s2509_s0 = inlined_call_operand.vmem [shape: bf16[2,9,9,128], index: 0, kind: input, shape index: {}]   ;;  %s2510_s1 = inlined_call_operand.vmem [shape: bf16[2,9,9,128], index: 1, kind: input, shape index: {}]   ;;  %s2511_s2 = inlined_call_operand.vmem [shape: bf16[2,9,9,128], index: 2, kind: input, shape index: {}]   ;;  %s2512_s3 = inlined_call_operand.vmem [shape: bf16[2,9,9,128], index: 3, kind: input, shape index: {}]   ;;  %s2513_s4 = inlined_call_operand.vmem [shape: bf16[2,8,8,128], index: 4, kind: output, shape index: {}]  }
   0x1   :  { %v1165_v0 = vld [vmem:[%s2509_s0] sm:$0xf]  ;;  %v1170_v1 = vld [vmem:[%s2509_s0 + $0x8] sm:$0xf]  ;;  %v33_v2 = vld [vmem:[%s2509_s0 + $0x4] sm:$0x1] }
   0x2   :  { %v34_v3 = vld [vmem:[%s2509_s0 + $0xc] sm:$0x1]  ;;  %v1181_v4 = vld [vmem:[%s2509_s0 + $0x10] sm:$0xf]  ;;  %v1186_v5 = vld [vmem:[%s2509_s0 + $0x18] sm:$0xf] }
   0x3   :  { %v53_v6 = vshrl.u32 %v1165_v0, 16  ;;  %v56_v7 = vshll.u32 %v1165_v0, 16  ;;  %v35_v8 = vld [vmem:[%s2509_s0 + $0x14] sm:$0x1]  ;;  %v62_v9 = vshll.u32 %v33_v2, 16  ;;  %v67_v10 = vshrl.u32 %v1170_v1, 16  ;;  %vm1216_vm2 = vmor %vm49_vm0, %vm50_vm1 }
   0x4   :  { %v70_v11 = vshll.u32 %v1170_v1, 16  ;;  %v76_v12 = vshll.u32 %v34_v3, 16  ;;  %v36_v13 = vld [vmem:[%s2509_s0 + $0x1c] sm:$0x1]  ;;  %v81_v16 = vshrl.u32 %v1181_v4, 16  ;;  %v84_v17 = vshll.u32 %v1181_v4, 16 }
   0x5   :  { %v55_v14 = vrot.slane %v53_v6, 4  ;;  %v58_v15 = vrot.slane %v56_v7, 5  ;;  %v1203_v18 = vld [vmem:[%s2509_s0 + $0x20] sm:$0xf]  ;;  %v1205_v19 = vrot.slane %v62_v9, 5  ;;  %v69_v20 = vrot.slane %v67_v10, 4 }
   0x6   :  { %v72_v21 = vrot.slane %v70_v11, 5  ;;  %v1207_v22 = vrot.slane %v76_v12, 5  ;;  %v83_v24 = vrot.slane %v81_v16, 4  ;;  %v86_v25 = vrot.slane %v84_v17, 5  ;;  %v1212_v27 = vld [vmem:[%s2509_s0 + $0x28] sm:$0xf] }
   0x7   :  { %v59_v23 = vor.u32 %v58_v15, %v55_v14  ;;  %v90_v26 = vshll.u32 %v35_v8, 16  ;;  %v95_v30 = vshrl.u32 %v1186_v5, 16  ;;  %v98_v31 = vshll.u32 %v1186_v5, 16  ;;  %v37_v33 = vld [vmem:[%s2509_s0 + $0x24] sm:$0x1] }
   0x8   :  { %v73_v29 = vor.u32 %v72_v21, %v69_v20  ;;  %v104_v32 = vshll.u32 %v36_v13, 16  ;;  %v87_v35 = vor.u32 %v86_v25, %v83_v24  ;;  %v109_v37 = vshrl.u32 %v1203_v18, 16  ;;  %v38_v38 = vld [vmem:[%s2509_s0 + $0x2c] sm:$0x1]  ;;  %v1240_v43 = vld [vmem:[%s2509_s0 + $0x30] sm:$0xf] }
   0x9   :  { %v1225_v34 = vrot.slane %v59_v23, 4  ;;  %v1227_v36 = vrot.slane %v90_v26, 5  ;;  %v97_v40 = vrot.slane %v95_v30, 4  ;;  %v100_v41 = vrot.slane %v98_v31, 5  ;;  %v1252_v48 = vld [vmem:[%s2509_s0 + $0x38] sm:$0xf] }
   0xa   :  { %v1233_v39 = vrot.slane %v73_v29, 4  ;;  %v1235_v42 = vrot.slane %v104_v32, 5  ;;  %v1246_v45 = vrot.slane %v87_v35, 4  ;;  %v111_v46 = vrot.slane %v109_v37, 4  ;;  %v39_v53 = vld [vmem:[%s2509_s0 + $0x34] sm:$0x1] }
   0xb   :  { %v65_v44 = vsel %vm1216_vm2, %v1225_v34, %v1205_v19  ;;  %v112_v47 = vshll.u32 %v1203_v18, 16  ;;  %v101_v50 = vor.u32 %v100_v41, %v97_v40  ;;  %v118_v51 = vshll.u32 %v37_v33, 16  ;;  %v1270_v58 = vld [vmem:[%s2509_s0 + $0x48] sm:$0xf]  ;;  %v40_v63 = vld [vmem:[%s2509_s0 + $0x3c] sm:$0x1] }
   0xc   :  { %v79_v49 = vsel %vm1216_vm2, %v1233_v39, %v1207_v22  ;;  %v123_v52 = vshrl.u32 %v1212_v27, 16  ;;  %v126_v56 = vshll.u32 %v1212_v27, 16  ;;  %v132_v57 = vshll.u32 %v38_v38, 16  ;;  %v41_v12 = vld [vmem:[%s2509_s0 + $0x4c] sm:$0x1] }
   0xd   :  { %v114_v55 = vrot.slane %v112_v47, 5  ;;  %v1272_v59 = vrot.slane %v101_v50, 4  ;;  %v1274_v60 = vrot.slane %v118_v51, 5  ;;  %v137_v62 = vshrl.u32 %v1240_v43, 16  ;;  %v1297_v17 = vld [vmem:[%s2509_s0 + $0x50] sm:$0xf] }
   0xe   :  { %v125_v61 = vrot.slane %v123_v52, 4  ;;  %v128_v3 = vrot.slane %v126_v56, 5  ;;  %v1280_v6 = vrot.slane %v132_v57, 5  ;;  %v140_v7 = vshll.u32 %v1240_v43, 16  ;;  %v42_v25 = vld [vmem:[%s2509_s0 + $0x54] sm:$0x1] }
   0xf   :  { %v115_v2 = vor.u32 %v114_v55, %v111_v46  ;;  %v139_v9 = vrot.slane %v137_v62, 4  ;;  %v146_v10 = vshll.u32 %v39_v53, 16  ;;  %v151_v11 = vshrl.u32 %v1252_v48, 16  ;;  %v1314_v32 = vld [vmem:[%s2509_s0 + $0x58] sm:$0xf] }
  0x10   :  { %v129_v14 = vor.u32 %v128_v3, %v125_v61  ;;  %v142_v15 = vrot.slane %v140_v7, 5  ;;  %v154_v16 = vshll.u32 %v1252_v48, 16  ;;  %v160_v23 = vshll.u32 %v40_v63, 16  ;;  %v1322_v40 = vld [vmem:[%s2509_s0 + $0x60] sm:$0xf] }
  0x11   :  { %v1291_v13 = vrot.slane %v115_v2, 4  ;;  %v1299_v20 = vrot.slane %v146_v10, 5  ;;  %v153_v21 = vrot.slane %v151_v11, 4  ;;  %v165_v24 = vshrl.u32 %v1270_v58, 16  ;;  %v43_v51 = vld [vmem:[%s2509_s0 + $0x5c] sm:$0x1] }
  0x12   :  { %v1309_v29 = vrot.slane %v129_v14, 4  ;;  %v143_v30 = vor.u32 %v142_v15, %v139_v9  ;;  %v156_v31 = vrot.slane %v154_v16, 5  ;;  %v1316_v33 = vrot.slane %v160_v23, 5  ;;  %v1340_v57 = vld [vmem:[%s2509_s0 + $0x68] sm:$0xf] }
  0x13   :  { %v167_v35 = vrot.slane %v165_v24, 4  ;;  %v168_v37 = vshll.u32 %v1270_v58, 16  ;;  %v174_v38 = vshll.u32 %v41_v12, 16  ;;  %v179_v50 = vshrl.u32 %v1297_v17, 16  ;;  %v44_v3 = vld [vmem:[%s2509_s0 + $0x64] sm:$0x1] }
  0x14   :  { %v1328_v46 = vrot.slane %v143_v30, 4  ;;  %v157_v47 = vor.u32 %v156_v31, %v153_v21  ;;  %v182_v55 = vshll.u32 %v1297_v17, 16  ;;  %v188_v56 = vshll.u32 %v42_v25, 16  ;;  %v45_v21 = vld [vmem:[%s2509_s0 + $0x6c] sm:$0x1] }
  0x15   :  { %v170_v52 = vrot.slane %v168_v37, 5  ;;  %v1334_v53 = vrot.slane %v174_v38, 5  ;;  %v181_v63 = vrot.slane %v179_v50, 4  ;;  %v193_v2 = vshrl.u32 %v1314_v32, 16  ;;  %v1369_v31 = vld [vmem:[%s2509_s0 + $0x70] sm:$0xf] }
  0x16   :  { %v1346_v62 = vrot.slane %v157_v47, 4  ;;  %v184_v9 = vrot.slane %v182_v55, 5  ;;  %v1352_v10 = vrot.slane %v188_v56, 5  ;;  %v196_v11 = vshll.u32 %v1314_v32, 16  ;;  %v46_v50 = vld [vmem:[%s2509_s0 + $0x74] sm:$0x1] }
  0x17   :  { %v171_v7 = vor.u32 %v170_v52, %v167_v35  ;;  %v195_v14 = vrot.slane %v193_v2, 4  ;;  %v202_v15 = vshll.u32 %v43_v51, 16  ;;  %v207_v16 = vshrl.u32 %v1322_v40, 16 }
  0x18   :  { %v185_v24 = vor.u32 %v184_v9, %v181_v63  ;;  %v198_v25 = vrot.slane %v196_v11, 5  ;;  %v210_v30 = vshll.u32 %v1322_v40, 16  ;;  %v216_v38 = vshll.u32 %v44_v3, 16  ;;  %v1384_v63 = vld [vmem:[%s2509_s0 + $0x78] sm:$0xf] }
  0x19   :  { %v1363_v23 = vrot.slane %v171_v7, 4  ;;  %v1371_v35 = vrot.slane %v202_v15, 5  ;;  %v209_v37 = vrot.slane %v207_v16, 4  ;;  %v221_v47 = vshrl.u32 %v1340_v57, 16  ;;  %v1390_v11 = vld [vmem:[%s2509_s0 + $0x80] sm:$0xf] }
  0x1a   :  { %v186_v52 = vrot.slane %v185_v24, 4  ;;  %v199_v55 = vor.u32 %v198_v25, %v195_v14  ;;  %v212_v56 = vrot.slane %v210_v30, 5  ;;  %v218_v2 = vrot.slane %v216_v38, 5 }
  0x1b   :  { %v177_v51 = vsel %vm1216_vm2, %v1363_v23, %v1334_v53  ;;  %v223_v3 = vrot.slane %v221_v47, 4  ;;  %v224_v7 = vshll.u32 %v1340_v57, 16  ;;  %v230_v9 = vshll.u32 %v45_v21, 16  ;;  %v47_v23 = vld [vmem:[%s2509_s0 + $0x7c] sm:$0x1] }
  0x1c   :  { %v191_v53 = vsel %vm1216_vm2, %v186_v52, %v1352_v10  ;;  %v200_v14 = vrot.slane %v199_v55, 4  ;;  %v213_v15 = vor.u32 %v212_v56, %v209_v37  ;;  %v235_v16 = vshrl.u32 %v1369_v31, 16  ;;  %v48_v37 = vld [vmem:[%s2509_s0 + $0x84] sm:$0x1] }
  0x1d   :  { %v226_v24 = vrot.slane %v224_v7, 5  ;;  %v232_v25 = vrot.slane %v230_v9, 5  ;;  %v238_v21 = vshll.u32 %v1369_v31, 16  ;;  %v244_v30 = vshll.u32 %v46_v50, 16 }
  0x1e   :  { %v205_v38 = vsel %vm1216_vm2, %v200_v14, %v1371_v35  ;;  %v214_v47 = vrot.slane %v213_v15, 4  ;;  %v237_v12 = vrot.slane %v235_v16, 4  ;;  %v249_v10 = vshrl.u32 %v1384_v63, 16 }
  0x1f   :  { %v227_v52 = vor.u32 %v226_v24, %v223_v3  ;;  %v240_v55 = vrot.slane %v238_v21, 5  ;;  %v246_v56 = vrot.slane %v244_v30, 5  ;;  %v252_v7 = vshll.u32 %v1384_v63, 16  ;;  %v1572_v30 = vld [vmem:[%s2509_s0 + $0x68] sm:$0xf] }
  0x20   :  { %v219_v50 = vsel %vm1216_vm2, %v214_v47, %v218_v2  ;;  %v251_v9 = vrot.slane %v249_v10, 4  ;;  %v258_v61 = vshll.u32 %v47_v23, 16  ;;  %v263_v35 = vshrl.u32 %v1390_v11, 16  ;;  %2558 = vst [vmem:[#allocation12_spill] sm:$0xff] %v1572_v30 }
  0x21   :  { %v228_v14 = vrot.slane %v227_v52, 4  ;;  %v241_v15 = vor.u32 %v240_v55, %v237_v12  ;;  %v254_v16 = vrot.slane %v252_v7, 5  ;;  %v266_v41 = vshll.u32 %v1390_v11, 16 }
  0x22   :  { %v260_v26 = vrot.slane %v258_v61, 5  ;;  %v265_v8 = vrot.slane %v263_v35, 4  ;;  %v272_v54 = vshll.u32 %v48_v37, 16  ;;  %v1418_v3 = vmax.bf16 %v65_v44, %v1165_v0  ;;  %v1588_v37 = vld [vmem:[%s2509_s0 + $0x78] sm:$0xf] }
  0x23   :  { %v233_v2 = vsel %vm1216_vm2, %v228_v14, %v232_v25  ;;  %v242_v23 = vrot.slane %v241_v15, 4  ;;  %v255_v24 = vor.u32 %v254_v16, %v251_v9  ;;  %v268_v12 = vrot.slane %v266_v41, 5  ;;  %v1567_v25 = vld [vmem:[%s2509_s0 + $0x60] sm:$0xf]  ;;  %2560 = vst [vmem:[#allocation14_spill] sm:$0xff] %v1588_v37 }
  0x24   :  { %v274_v21 = vrot.slane %v272_v54, 5  ;;  %v1428_v61 = vmax.bf16 %v79_v49, %v1170_v1  ;;  %v2542_v0 = vsel %vm1216_vm2, %v1246_v45, %v1227_v36  ;;  %v2543_v34 = vsel %vm1216_vm2, %v1272_v59, %v1235_v42  ;;  %2557 = vst [vmem:[#allocation11_spill] sm:$0xff] %v1567_v25  ;;  %v1051_v9 = vld [vmem:[%s2509_s0 + $0x14] sm:$0x1]  ;;  %v1607_v35 = vld [vmem:[%s2509_s0 + $0x80] sm:$0xf] }
  0x25   :  { %v1436_v19 = vmax.bf16 %v2542_v0, %v1181_v4  ;;  %v1444_v44 = vmax.bf16 %v2543_v34, %v1186_v5  ;;  %v247_v1 = vsel %vm1216_vm2, %v242_v23, %v246_v56  ;;  %v256_v22 = vrot.slane %v255_v24, 4  ;;  %v1612_v14 = vld [vmem:[%s2509_s0 + $0x88] sm:$0xf]  ;;  %v1052_v34 = vld [vmem:[%s2509_s0 + $0x1c] sm:$0x1] }
  0x26   :  { %v269_v39 = vor.u32 %v268_v12, %v265_v8  ;;  %v2544_v4 = vsel %vm1216_vm2, %v1291_v13, %v1274_v60  ;;  %v2545_v5 = vsel %vm1216_vm2, %v1309_v29, %v1280_v6  ;;  %v2546_v45 = vsel %vm1216_vm2, %v1328_v46, %v1299_v20  ;;  %v1504_v8 = vld [vmem:[%s2509_s0 + $0x18] sm:$0xf]  ;;  %v1509_v13 = vld [vmem:[%s2509_s0 + $0x20] sm:$0xf]  ;;  %v1054_v56 = vld [vmem:[%s2509_s0 + $0x2c] sm:$0x1] }
  0x27   :  { %v1454_v36 = vmax.bf16 %v2544_v4, %v1203_v18  ;;  %v1462_v42 = vmax.bf16 %v2545_v5, %v1212_v27  ;;  %v1470_v49 = vmax.bf16 %v2546_v45, %v1240_v43  ;;  %v2547_v18 = vsel %vm1216_vm2, %v1346_v62, %v1316_v33  ;;  %v1486_v27 = vld [vmem:[%s2509_s0 + $0x8] sm:$0xf]  ;;  %v1491_v43 = vld [vmem:[%s2509_s0 + $0x10] sm:$0xf]  ;;  %v1543_v46 = vld [vmem:[%s2509_s0 + $0x40] sm:$0xf] }
  0x28   :  { %v1478_v54 = vmax.bf16 %v2547_v18, %v1252_v48  ;;  %v1481_v59 = vmax.bf16 %v177_v51, %v1270_v58  ;;  %v261_v60 = vsel %vm1216_vm2, %v256_v22, %v260_v26  ;;  %v270_v6 = vrot.slane %v269_v39, 4  ;;  %v1531_v33 = vld [vmem:[%s2509_s0 + $0x30] sm:$0xf]  ;;  %v1553_v62 = vld [vmem:[%s2509_s0 + $0x58] sm:$0xf] }
  0x29   :  { %v1496_v48 = vmax.bf16 %v191_v53, %v1297_v17  ;;  %v1499_v58 = vmax.bf16 %v205_v38, %v1314_v32  ;;  %v1512_v20 = vmax.bf16 %v219_v50, %v1322_v40  ;;  %v1515_v26 = vmax.bf16 %v233_v2, %v1340_v57  ;;  %v1526_v32 = vld [vmem:[%s2509_s0 + $0x28] sm:$0xf]  ;;  %v1536_v40 = vld [vmem:[%s2509_s0 + $0x38] sm:$0xf]  ;;  %v1548_v57 = vld [vmem:[%s2509_s0 + $0x50] sm:$0xf] }
  0x2a   :  { %2548 = vst [vmem:[#allocation2_spill] sm:$0xff] %v1481_v59  ;;  %v1518_v17 = vmax.bf16 %v247_v1, %v1369_v31  ;;  %v1521_v29 = vmax.bf16 %v261_v60, %v1384_v63  ;;  %v275_v41 = vsel %vm1216_vm2, %v270_v6, %v274_v21  ;;  %2555 = vst [vmem:[#allocation9_spill] sm:$0xff] %v1553_v62  ;;  %v1577_v38 = vld [vmem:[%s2509_s0 + $0x70] sm:$0xf]  ;;  %v1050_v50 = vld [vmem:[%s2509_s0 + $0xc] sm:$0x1] }
  0x2b   :  { %2549 = vst [vmem:[#allocation3_spill] sm:$0xff] %v1496_v48  ;;  %2550 = vst [vmem:[#allocation4_spill] sm:$0xff] %v1499_v58  ;;  %v1562_v53 = vmax.bf16 %v275_v41, %v1390_v11  ;;  %v358_v21 = vshrl.u32 %v1486_v27, 16  ;;  %v361_v0 = vshll.u32 %v1486_v27, 16  ;;  %v367_v1 = vshll.u32 %v1050_v50, 16 }
  0x2c   :  { %2551 = vst [vmem:[#allocation5_spill] sm:$0xff] %v1512_v20  ;;  %2552 = vst [vmem:[#allocation6_spill] sm:$0xff] %v1515_v26  ;;  %v372_v22 = vshrl.u32 %v1491_v43, 16  ;;  %v375_v39 = vshll.u32 %v1491_v43, 16  ;;  %v381_v4 = vshll.u32 %v1051_v9, 16  ;;  %v386_v60 = vshrl.u32 %v1504_v8, 16 }
  0x2d   :  { %2553 = vst [vmem:[#allocation7_spill] sm:$0xff] %v1518_v17  ;;  %2554 = vst [vmem:[#allocation8_spill] sm:$0xff] %v1521_v29  ;;  %v1053_v5 = vld [vmem:[%s2509_s0 + $0x24] sm:$0x1]  ;;  %v360_v45 = vrot.slane %v358_v21, 4  ;;  %v363_v18 = vrot.slane %v361_v0, 5 }
  0x2e   :  { %2556 = vst [vmem:[#allocation10_spill] sm:$0xff] %v1562_v53  ;;  %2559 = vst [vmem:[#allocation13_spill] sm:$0xff] %v1577_v38  ;;  %v389_v6 = vshll.u32 %v1504_v8, 16  ;;  %v1638_v41 = vrot.slane %v367_v1, 5  ;;  %v374_v12 = vrot.slane %v372_v22, 4  ;;  %v377_v24 = vrot.slane %v375_v39, 5 }
  0x2f   :  { %v1640_v50 = vrot.slane %v381_v4, 5  ;;  %v364_v23 = vor.u32 %v363_v18, %v360_v45  ;;  %v388_v2 = vrot.slane %v386_v60, 4  ;;  %v395_v9 = vshll.u32 %v1052_v34, 16  ;;  %v1062_v17 = vld [vmem:[%s2509_s0 + $0x74] sm:$0x1] }
  0x30   :  { %v391_v16 = vrot.slane %v389_v6, 5  ;;  %v378_v15 = vor.u32 %v377_v24, %v374_v12  ;;  %v400_v7 = vshrl.u32 %v1509_v13, 16  ;;  %v403_v21 = vshll.u32 %v1509_v13, 16  ;;  %v1055_v24 = vld [vmem:[%s2509_s0 + $0x34] sm:$0x1] }
  0x31   :  { %v409_v0 = vshll.u32 %v1053_v5, 16  ;;  %v1647_v1 = vrot.slane %v364_v23, 4  ;;  %v1649_v39 = vrot.slane %v395_v9, 5  ;;  %v414_v4 = vshrl.u32 %v1526_v32, 16  ;;  %v1056_v9 = vld [vmem:[%s2509_s0 + $0x3c] sm:$0x1] }
  0x32   :  { %v392_v22 = vor.u32 %v391_v16, %v388_v2  ;;  %v1655_v12 = vrot.slane %v378_v15, 4  ;;  %v402_v34 = vrot.slane %v400_v7, 4  ;;  %v405_v45 = vrot.slane %v403_v21, 5  ;;  %v1058_v21 = vld [vmem:[%s2509_s0 + $0x54] sm:$0x1] }
  0x33   :  { %v1657_v5 = vrot.slane %v409_v0, 5  ;;  %v416_v2 = vrot.slane %v414_v4, 4  ;;  %v417_v18 = vshll.u32 %v1526_v32, 16  ;;  %v423_v7 = vshll.u32 %v1054_v56, 16 }
  0x34   :  { %v1663_v16 = vrot.slane %v392_v22, 4  ;;  %v406_v60 = vor.u32 %v405_v45, %v402_v34  ;;  %v428_v6 = vshrl.u32 %v1531_v33, 16  ;;  %v431_v22 = vshll.u32 %v1531_v33, 16  ;;  %v1057_v45 = vld [vmem:[%s2509_s0 + $0x44] sm:$0x1] }
  0x35   :  { %v419_v0 = vrot.slane %v417_v18, 5  ;;  %v437_v4 = vshll.u32 %v1055_v24, 16  ;;  %v1681_v52 = vrot.slane %v423_v7, 5  ;;  %v442_v34 = vshrl.u32 %v1536_v40, 16 }
  0x36   :  { %v1679_v55 = vrot.slane %v406_v60, 4  ;;  %v430_v56 = vrot.slane %v428_v6, 4  ;;  %v433_v11 = vrot.slane %v431_v22, 5  ;;  %v445_v18 = vshll.u32 %v1536_v40, 16 }
  0x37   :  { %v420_v10 = vor.u32 %v419_v0, %v416_v2  ;;  %v1687_v47 = vrot.slane %v437_v4, 5  ;;  %v444_v60 = vrot.slane %v442_v34, 4  ;;  %v451_v7 = vshll.u32 %v1056_v9, 16  ;;  %v1059_v9 = vld [vmem:[%s2509_s0 + $0x5c] sm:$0x1] }
  0x38   :  { %v456_v6 = vshrl.u32 %v1543_v46, 16  ;;  %v434_v2 = vor.u32 %v433_v11, %v430_v56  ;;  %v447_v0 = vrot.slane %v445_v18, 5  ;;  %v459_v22 = vshll.u32 %v1543_v46, 16 }
  0x39   :  { %v1698_v63 = vrot.slane %v420_v10, 4  ;;  %v1701_v4 = vrot.slane %v451_v7, 5  ;;  %v465_v51 = vshll.u32 %v1057_v45, 16  ;;  %v470_v24 = vshrl.u32 %v1548_v57, 16 }
  0x3a   :  { %v458_v15 = vrot.slane %v456_v6, 4  ;;  %v1711_v34 = vrot.slane %v434_v2, 4  ;;  %v448_v11 = vor.u32 %v447_v0, %v444_v60  ;;  %v461_v56 = vrot.slane %v459_v22, 5  ;;  %v1060_v60 = vld [vmem:[%s2509_s0 + $0x64] sm:$0x1] }
  0x3b   :  { %v1713_v18 = vrot.slane %v465_v51, 5  ;;  %v472_v7 = vrot.slane %v470_v24, 4  ;;  %v473_v45 = vshll.u32 %v1548_v57, 16  ;;  %v479_v6 = vshll.u32 %v1058_v21, 16 }
  0x3c   :  { %v1720_v31 = vrot.slane %v448_v11, 4  ;;  %v462_v53 = vor.u32 %v461_v56, %v458_v15  ;;  %v484_v10 = vshrl.u32 %v1553_v62, 16  ;;  %v487_v24 = vshll.u32 %v1553_v62, 16  ;;  %v1061_v56 = vld [vmem:[%s2509_s0 + $0x6c] sm:$0x1] }
  0x3d   :  { %v475_v51 = vrot.slane %v473_v45, 5  ;;  %v1726_v2 = vrot.slane %v479_v6, 5  ;;  %v493_v21 = vshll.u32 %v1059_v9, 16  ;;  %v498_v11 = vshrl.u32 %v1567_v25, 16 }
  0x3e   :  { %v1733_v22 = vrot.slane %v462_v53, 4  ;;  %v486_v15 = vrot.slane %v484_v10, 4  ;;  %v489_v6 = vrot.slane %v487_v24, 5  ;;  %v501_v9 = vshll.u32 %v1567_v25, 16 }
  0x3f   :  { %v476_v45 = vor.u32 %v475_v51, %v472_v7  ;;  %v1739_v23 = vrot.slane %v493_v21, 5  ;;  %v500_v53 = vrot.slane %v498_v11, 4  ;;  %v507_v29 = vshll.u32 %v1060_v60, 16  ;;  %v1063_v60 = vld [vmem:[%s2509_s0 + $0x7c] sm:$0x1] }
  0x40   :  { %v512_v10 = vshrl.u32 %v1572_v30, 16  ;;  %v490_v7 = vor.u32 %v489_v6, %v486_v15  ;;  %v503_v51 = vrot.slane %v501_v9, 5  ;;  %v515_v24 = vshll.u32 %v1572_v30, 16 }
  0x41   :  { %v1750_v26 = vrot.slane %v476_v45, 4  ;;  %v1753_v21 = vrot.slane %v507_v29, 5  ;;  %v521_v58 = vshll.u32 %v1061_v56, 16  ;;  %v526_v0 = vshrl.u32 %v1577_v38, 16 }
  0x42   :  { %v514_v20 = vrot.slane %v512_v10, 4  ;;  %v1763_v45 = vrot.slane %v490_v7, 4  ;;  %v504_v15 = vor.u32 %v503_v51, %v500_v53  ;;  %v517_v6 = vrot.slane %v515_v24, 5 }
  0x43   :  { %v482_v11 = vsel %vm1216_vm2, %v1750_v26, %v1726_v2  ;;  %v1765_v9 = vrot.slane %v521_v58, 5  ;;  %v528_v29 = vrot.slane %v526_v0, 4  ;;  %v529_v56 = vshll.u32 %v1577_v38, 16  ;;  %v1064_v26 = vld [vmem:[%s2509_s0 + $0x84] sm:$0x1] }
  0x44   :  { %v535_v10 = vshll.u32 %v1062_v17, 16  ;;  %v496_v30 = vsel %vm1216_vm2, %v1763_v45, %v1739_v23  ;;  %v505_v25 = vrot.slane %v504_v15, 4  ;;  %v518_v48 = vor.u32 %v517_v6, %v514_v20  ;;  %v1065_v20 = vld [vmem:[%s2509_s0 + $0x8c] sm:$0x1] }
  0x45   :  { %v540_v62 = vshrl.u32 %v1588_v37, 16  ;;  %v531_v2 = vrot.slane %v529_v56, 5  ;;  %v543_v0 = vshll.u32 %v1588_v37, 16  ;;  %v549_v53 = vshll.u32 %v1063_v60, 16 }
  0x46   :  { %v537_v58 = vrot.slane %v535_v10, 5  ;;  %v510_v17 = vsel %vm1216_vm2, %v505_v25, %v1753_v21  ;;  %v519_v7 = vrot.slane %v518_v48, 4  ;;  %v554_v23 = vshrl.u32 %v1607_v35, 16 }
  0x47   :  { %v542_v51 = vrot.slane %v540_v62, 4  ;;  %v532_v24 = vor.u32 %v531_v2, %v528_v29  ;;  %v545_v45 = vrot.slane %v543_v0, 5  ;;  %v551_v15 = vrot.slane %v549_v53, 5 }
  0x48   :  { %v557_v6 = vshll.u32 %v1607_v35, 16  ;;  %v524_v60 = vsel %vm1216_vm2, %v519_v7, %v1765_v9  ;;  %v556_v56 = vrot.slane %v554_v23, 4  ;;  %v563_v10 = vshll.u32 %v1064_v26, 16 }
  0x49   :  { %v568_v48 = vshrl.u32 %v1612_v14, 16  ;;  %v533_v62 = vrot.slane %v532_v24, 4  ;;  %v546_v25 = vor.u32 %v545_v45, %v542_v51  ;;  %v571_v37 = vshll.u32 %v1612_v14, 16  ;;  %v1867_v24 = vld [vmem:[%s2510_s1 + $0x20] sm:$0xf] }
  0x4a   :  { %v559_v21 = vrot.slane %v557_v6, 5  ;;  %v565_v38 = vrot.slane %v563_v10, 5  ;;  %v577_v29 = vshll.u32 %v1065_v20, 16  ;;  %v2561_v2 = vmax.bf16 %v1486_v27, %v1418_v3  ;;  %v2582_v10 = vld [vmem:[#allocation11_spill] sm:$0xff] }
  0x4b   :  { %v570_v59 = vrot.slane %v568_v48, 4  ;;  %v2562_v9 = vsel %vm1216_vm2, %v1647_v1, %v1638_v41  ;;  %v538_v26 = vsel %vm1216_vm2, %v533_v62, %v537_v58  ;;  %v547_v53 = vrot.slane %v546_v25, 4  ;;  %v1862_v58 = vld [vmem:[%s2510_s1 + $0x18] sm:$0xf]  ;;  %v2583_v48 = vld [vmem:[#allocation4_spill] sm:$0xff] }
  0x4c   :  { %v1798_v0 = vmax.bf16 %v2562_v9, %v2561_v2  ;;  %v560_v7 = vor.u32 %v559_v21, %v556_v56  ;;  %v573_v51 = vrot.slane %v571_v37, 5  ;;  %v579_v23 = vrot.slane %v577_v29, 5  ;;  %v623_v21 = vld [vmem:[%s2510_s1 + $0x58] sm:$0xf]  ;;  %v624_v29 = vld [vmem:[%s2510_s1 + $0x60] sm:$0xf] }
  0x4d   :  { %v2563_v20 = vmax.bf16 %v1491_v43, %v1428_v61  ;;  %v2564_v3 = vsel %vm1216_vm2, %v1655_v12, %v1640_v50  ;;  %v2565_v41 = vmax.bf16 %v1504_v8, %v1436_v19  ;;  %v2566_v1 = vsel %vm1216_vm2, %v1663_v16, %v1649_v39  ;;  %v1835_v19 = vld [vmem:[%s2510_s1] sm:$0xf]  ;;  %v1840_v8 = vld [vmem:[%s2510_s1 + $0x8] sm:$0xf]  ;;  %v2585_v2 = vld [vmem:[#allocation12_spill] sm:$0xff] }
  0x4e   :  { %v2567_v61 = vmax.bf16 %v1509_v13, %v1444_v44  ;;  %v2568_v43 = vsel %vm1216_vm2, %v1679_v55, %v1657_v5  ;;  %v1845_v44 = vld [vmem:[%s2510_s1 + $0x10] sm:$0xf]  ;;  %v552_v13 = vsel %vm1216_vm2, %v547_v53, %v551_v15  ;;  %v561_v55 = vrot.slane %v560_v7, 4  ;;  %v2586_v9 = vld [vmem:[#allocation5_spill] sm:$0xff] }
  0x4f   :  { %v1810_v27 = vmax.bf16 %v2564_v3, %v2563_v20  ;;  %v1820_v37 = vmax.bf16 %v2566_v1, %v2565_v41  ;;  %v574_v39 = vor.u32 %v573_v51, %v570_v59  ;;  %v2569_v12 = vmax.bf16 %v1526_v32, %v1454_v36  ;;  %v1872_v36 = vld [vmem:[%s2510_s1 + $0x28] sm:$0xf]  ;;  %v2588_v7 = vld [vmem:[#allocation13_spill] sm:$0xff]  ;;  %v2589_v51 = vld [vmem:[#allocation6_spill] sm:$0xff] }
  0x50   :  { %v1830_v50 = vmax.bf16 %v2568_v43, %v2567_v61  ;;  %v2570_v5 = vsel %vm1216_vm2, %v1698_v63, %v1681_v52  ;;  %v2571_v59 = vmax.bf16 %v1531_v33, %v1462_v42  ;;  %v2572_v32 = vsel %vm1216_vm2, %v1711_v34, %v1687_v47  ;;  %v2577_v34 = vld [vmem:[#allocation2_spill] sm:$0xff]  ;;  %v2592_v41 = vld [vmem:[#allocation7_spill] sm:$0xff]  ;;  %v2594_v61 = vld [vmem:[#allocation8_spill] sm:$0xff] }
  0x51   :  { %v1857_v16 = vmax.bf16 %v2570_v5, %v2569_v12  ;;  %v2573_v52 = vmax.bf16 %v1536_v40, %v1470_v49  ;;  %v2574_v45 = vsel %vm1216_vm2, %v1720_v31, %v1701_v4  ;;  %v2575_v42 = vmax.bf16 %v1543_v46, %v1478_v54  ;;  %v619_v31 = vld [vmem:[%s2510_s1 + $0x30] sm:$0xf]  ;;  %v620_v54 = vld [vmem:[%s2510_s1 + $0x38] sm:$0xf]  ;;  %v621_v46 = vld [vmem:[%s2510_s1 + $0x48] sm:$0xf] }
  0x52   :  { %v1882_v63 = vmax.bf16 %v2572_v32, %v2571_v59  ;;  %v2576_v33 = vsel %vm1216_vm2, %v1733_v22, %v1713_v18  ;;  %v2578_v49 = vmax.bf16 %v1548_v57, %v2577_v34  ;;  %v622_v4 = vld [vmem:[%s2510_s1 + $0x50] sm:$0xf]  ;;  %v566_v57 = vsel %vm1216_vm2, %v561_v55, %v565_v38  ;;  %v2579_v22 = vld [vmem:[#allocation9_spill] sm:$0xff]  ;;  %v2591_v3 = vld [vmem:[#allocation14_spill] sm:$0xff] }
  0x53   :  { %v1892_v15 = vmax.bf16 %v2574_v45, %v2573_v52  ;;  %v1902_v47 = vmax.bf16 %v2576_v33, %v2575_v42  ;;  %v575_v18 = vrot.slane %v574_v39, 4  ;;  %v2584_v62 = vmax.bf16 %v2582_v10, %v2583_v48  ;;  %v625_v39 = vld [vmem:[%s2510_s1 + $0x68] sm:$0xf]  ;;  %v2596_v52 = vld [vmem:[#allocation10_spill] sm:$0xff] }
  0x54   :  { %v1907_v40 = vmax.bf16 %v482_v11, %v2578_v49  ;;  %v2580_v11 = vld [vmem:[#allocation3_spill] sm:$0xff]  ;;  %v2587_v38 = vmax.bf16 %v2585_v2, %v2586_v9  ;;  %v2590_v20 = vmax.bf16 %v2588_v7, %v2589_v51  ;;  %v2593_v1 = vmax.bf16 %v2591_v3, %v2592_v41  ;;  %v2060_v7 = vld [vmem:[%s2511_s2 + $0x10] sm:$0xf]  ;;  %v2065_v51 = vld [vmem:[%s2511_s2 + $0x18] sm:$0xf] }
  0x55   :  { %v2581_v6 = vmax.bf16 %v2579_v22, %v2580_v11  ;;  %v607_v25 = vmax.bf16 %v510_v17, %v2584_v62  ;;  %v2595_v43 = vmax.bf16 %v1607_v35, %v2594_v61  ;;  %v580_v12 = vsel %vm1216_vm2, %v575_v18, %v579_v23  ;;  %v628_v35 = vld [vmem:[%s2510_s1 + $0x80] sm:$0xf]  ;;  %v1066_v32 = vld [vmem:[%s2510_s1 + $0x8] sm:$0xf]  ;;  %v1067_v23 = vld [vmem:[%s2510_s1 + $0x10] sm:$0xf] }
  0x56   :  { %v608_v53 = vmax.bf16 %v524_v60, %v2587_v38  ;;  %v610_v17 = vmax.bf16 %v552_v13, %v2593_v1  ;;  %v626_v60 = vld [vmem:[%s2510_s1 + $0x70] sm:$0xf]  ;;  %v629_v13 = vmax.bf16 %v1835_v19, %v1798_v0  ;;  %v630_v5 = vmax.bf16 %v1840_v8, %v1810_v27  ;;  %v1068_v19 = vld [vmem:[%s2510_s1 + $0x18] sm:$0xf]  ;;  %v1069_v8 = vld [vmem:[%s2510_s1 + $0x20] sm:$0xf] }
  0x57   :  { %v606_v56 = vmax.bf16 %v496_v30, %v2581_v6  ;;  %v609_v30 = vmax.bf16 %v538_v26, %v2590_v20  ;;  %v611_v55 = vmax.bf16 %v566_v57, %v2595_v43  ;;  %v627_v26 = vld [vmem:[%s2510_s1 + $0x78] sm:$0xf]  ;;  %v631_v59 = vmax.bf16 %v1845_v44, %v1820_v37  ;;  %v1078_v57 = vld [vmem:[%s2510_s1 + $0x70] sm:$0xf]  ;;  %v1080_v6 = vld [vmem:[%s2510_s1 + $0x80] sm:$0xf] }
  0x58   :  { %v2597_v45 = vmax.bf16 %v1612_v14, %v2596_v52  ;;  %v632_v0 = vmax.bf16 %v1862_v58, %v1830_v50  ;;  %v633_v27 = vmax.bf16 %v1867_v24, %v1857_v16  ;;  %v634_v37 = vmax.bf16 %v1872_v36, %v1882_v63  ;;  %v1070_v14 = vld [vmem:[%s2510_s1 + $0x28] sm:$0xf]  ;;  %v1071_v24 = vld [vmem:[%s2510_s1 + $0x30] sm:$0xf]  ;;  %v1072_v36 = vld [vmem:[%s2510_s1 + $0x38] sm:$0xf] }
  0x59   :  { %v635_v50 = vmax.bf16 %v619_v31, %v1892_v15  ;;  %v636_v44 = vmax.bf16 %v620_v54, %v1902_v47  ;;  %v637_v16 = vmax.bf16 %v621_v46, %v1907_v40  ;;  %v638_v58 = vmax.bf16 %v622_v4, %v606_v56  ;;  %v1073_v63 = vld [vmem:[%s2510_s1 + $0x40] sm:$0xf]  ;;  %v1074_v47 = vld [vmem:[%s2510_s1 + $0x50] sm:$0xf]  ;;  %v1075_v40 = vld [vmem:[%s2510_s1 + $0x58] sm:$0xf] }
  0x5a   :  { %v612_v42 = vmax.bf16 %v580_v12, %v2597_v45  ;;  %v639_v33 = vmax.bf16 %v623_v21, %v607_v25  ;;  %v640_v34 = vmax.bf16 %v624_v29, %v608_v53  ;;  %v641_v15 = vmax.bf16 %v625_v39, %v609_v30  ;;  %v1076_v31 = vld [vmem:[%s2510_s1 + $0x60] sm:$0xf]  ;;  %v1077_v4 = vld [vmem:[%s2510_s1 + $0x68] sm:$0xf]  ;;  %v1079_v18 = vld [vmem:[%s2510_s1 + $0x78] sm:$0xf] }
  0x5b   :  { %v642_v49 = vmax.bf16 %v626_v60, %v610_v17  ;;  %v643_v54 = vmax.bf16 %v627_v26, %v611_v55  ;;  %v2021_v22 = vmax.bf16 %v1066_v32, %v629_v13  ;;  %v2023_v11 = vmax.bf16 %v1067_v23, %v630_v5  ;;  %v1081_v56 = vld [vmem:[%s2510_s1 + $0x88] sm:$0xf]  ;;  %v2042_v21 = vld [vmem:[%s2511_s2] sm:$0xf]  ;;  %v2088_v61 = vld [vmem:[%s2511_s2 + $0x30] sm:$0xf] }
  0x5c   :  { %v644_v46 = vmax.bf16 %v628_v35, %v612_v42  ;;  %v2031_v10 = vmax.bf16 %v1068_v19, %v631_v59  ;;  %v2033_v48 = vmax.bf16 %v1069_v8, %v632_v0  ;;  %v2035_v62 = vmax.bf16 %v1070_v14, %v633_v27  ;;  %v2055_v53 = vld [vmem:[%s2511_s2 + $0x8] sm:$0xf]  ;;  %v2078_v1 = vld [vmem:[%s2511_s2 + $0x20] sm:$0xf]  ;;  %v2097_v39 = vld [vmem:[%s2511_s2 + $0x38] sm:$0xf] }
  0x5d   :  { %v2037_v25 = vmax.bf16 %v1071_v24, %v634_v37  ;;  %v2044_v29 = vmax.bf16 %v1072_v36, %v635_v50  ;;  %v2046_v2 = vmax.bf16 %v1073_v63, %v636_v44  ;;  %v2048_v9 = vmax.bf16 %v1074_v47, %v637_v16  ;;  %v2083_v17 = vld [vmem:[%s2511_s2 + $0x28] sm:$0xf]  ;;  %v2107_v26 = vld [vmem:[%s2511_s2 + $0x50] sm:$0xf]  ;;  %v2116_v13 = vld [vmem:[%s2511_s2 + $0x58] sm:$0xf] }
  0x5e   :  { %v2050_v38 = vmax.bf16 %v1075_v40, %v638_v58  ;;  %v2067_v20 = vmax.bf16 %v1076_v31, %v639_v33  ;;  %v2069_v30 = vmax.bf16 %v1077_v4, %v640_v34  ;;  %v2071_v3 = vmax.bf16 %v1078_v57, %v641_v15  ;;  %v2102_v60 = vld [vmem:[%s2511_s2 + $0x48] sm:$0xf]  ;;  %2606 = vst [vmem:[#allocation6_spill] sm:$0xff] %v2107_v26  ;;  %v2121_v5 = vld [vmem:[%s2511_s2 + $0x60] sm:$0xf] }
  0x5f   :  { %2598 = vst [vmem:[#allocation2_spill] sm:$0xff] %v2048_v9  ;;  %v2073_v41 = vmax.bf16 %v1079_v18, %v642_v49  ;;  %v2090_v43 = vmax.bf16 %v1080_v6, %v643_v54  ;;  %v2092_v55 = vmax.bf16 %v1081_v56, %v644_v46  ;;  %2607 = vst [vmem:[#allocation14_spill] sm:$0xff] %v2116_v13  ;;  %v2126_v59 = vld [vmem:[%s2511_s2 + $0x68] sm:$0xf]  ;;  %v2139_v42 = vld [vmem:[%s2511_s2 + $0x70] sm:$0xf] }
  0x60   :  { %2599 = vst [vmem:[#allocation9_spill] sm:$0xff] %v2050_v38  ;;  %2600 = vst [vmem:[#allocation3_spill] sm:$0xff] %v2067_v20  ;;  %v710_v8 = vld [vmem:[%s2511_s2 + $0x4] sm:$0x1]  ;;  %v711_v14 = vld [vmem:[%s2511_s2 + $0xc] sm:$0x1] }
  0x61   :  { %2601 = vst [vmem:[#allocation11_spill] sm:$0xff] %v2069_v30  ;;  %2602 = vst [vmem:[#allocation4_spill] sm:$0xff] %v2071_v3  ;;  %v2158_v50 = vld [vmem:[%s2511_s2 + $0x78] sm:$0xf]  ;;  %v2163_v44 = vld [vmem:[%s2511_s2 + $0x80] sm:$0xf] }
  0x62   :  { %2603 = vst [vmem:[#allocation12_spill] sm:$0xff] %v2073_v41  ;;  %2604 = vst [vmem:[#allocation5_spill] sm:$0xff] %v2090_v43  ;;  %v727_v34 = vshrl.u32 %v2042_v21, 16  ;;  %v730_v15 = vshll.u32 %v2042_v21, 16  ;;  %v712_v49 = vld [vmem:[%s2511_s2 + $0x14] sm:$0x1] }
  0x63   :  { %2605 = vst [vmem:[#allocation13_spill] sm:$0xff] %v2092_v55  ;;  %2608 = vst [vmem:[#allocation7_spill] sm:$0xff] %v2121_v5  ;;  %v736_v47 = vshll.u32 %v710_v8, 16  ;;  %v741_v40 = vshrl.u32 %v2055_v53, 16  ;;  %v744_v31 = vshll.u32 %v2055_v53, 16  ;;  %v750_v54 = vshll.u32 %v711_v14, 16 }
  0x64   :  { %2609 = vst [vmem:[#allocation8_spill] sm:$0xff] %v2126_v59  ;;  %2610 = vst [vmem:[#allocation10_spill] sm:$0xff] %v2139_v42  ;;  %v713_v46 = vld [vmem:[%s2511_s2 + $0x1c] sm:$0x1]  ;;  %v729_v4 = vrot.slane %v727_v34, 4  ;;  %v732_v57 = vrot.slane %v730_v15, 5 }
  0x65   :  { %v755_v18 = vshrl.u32 %v2060_v7, 16  ;;  %v758_v6 = vshll.u32 %v2060_v7, 16  ;;  %v2189_v56 = vrot.slane %v736_v47, 5  ;;  %v743_v33 = vrot.slane %v741_v40, 4  ;;  %v714_v37 = vld [vmem:[%s2511_s2 + $0x24] sm:$0x1] }
  0x66   :  { %v746_v63 = vrot.slane %v744_v31, 5  ;;  %v2191_v8 = vrot.slane %v750_v54, 5  ;;  %v733_v36 = vor.u32 %v732_v57, %v729_v4  ;;  %v764_v14 = vshll.u32 %v712_v49, 16  ;;  %v722_v41 = vld [vmem:[%s2511_s2 + $0x6c] sm:$0x1] }
  0x67   :  { %v757_v24 = vrot.slane %v755_v18, 4  ;;  %v760_v58 = vrot.slane %v758_v6, 5  ;;  %v769_v19 = vshrl.u32 %v2065_v51, 16  ;;  %v772_v34 = vshll.u32 %v2065_v51, 16 }
  0x68   :  { %v747_v16 = vor.u32 %v746_v63, %v743_v33  ;;  %v778_v15 = vshll.u32 %v713_v46, 16  ;;  %v2198_v47 = vrot.slane %v733_v36, 4  ;;  %v2200_v31 = vrot.slane %v764_v14, 5  ;;  %v715_v63 = vld [vmem:[%s2511_s2 + $0x2c] sm:$0x1] }
  0x69   :  { %v761_v40 = vor.u32 %v760_v58, %v757_v24  ;;  %v783_v54 = vshrl.u32 %v2078_v1, 16  ;;  %v771_v49 = vrot.slane %v769_v19, 4  ;;  %v774_v4 = vrot.slane %v772_v34, 5  ;;  %v716_v14 = vld [vmem:[%s2511_s2 + $0x34] sm:$0x1] }
  0x6a   :  { %v2206_v33 = vrot.slane %v747_v16, 4  ;;  %v2208_v46 = vrot.slane %v778_v15, 5  ;;  %v786_v57 = vshll.u32 %v2078_v1, 16  ;;  %v792_v19 = vshll.u32 %v714_v37, 16  ;;  %v718_v34 = vld [vmem:[%s2511_s2 + $0x4c] sm:$0x1] }
  0x6b   :  { %v2214_v58 = vrot.slane %v761_v40, 4  ;;  %v785_v24 = vrot.slane %v783_v54, 4  ;;  %v775_v18 = vor.u32 %v774_v4, %v771_v49  ;;  %v797_v6 = vshrl.u32 %v2083_v17, 16  ;;  %v717_v4 = vld [vmem:[%s2511_s2 + $0x3c] sm:$0x1] }
  0x6c   :  { %v788_v15 = vrot.slane %v786_v57, 5  ;;  %v800_v40 = vshll.u32 %v2083_v17, 16  ;;  %v806_v54 = vshll.u32 %v715_v63, 16  ;;  %v2232_v0 = vrot.slane %v792_v19, 5 }
  0x6d   :  { %v2230_v27 = vrot.slane %v775_v18, 4  ;;  %v799_v37 = vrot.slane %v797_v6, 4  ;;  %v811_v49 = vshrl.u32 %v2088_v61, 16  ;;  %v814_v57 = vshll.u32 %v2088_v61, 16 }
  0x6e   :  { %v789_v45 = vor.u32 %v788_v15, %v785_v24  ;;  %v802_v52 = vrot.slane %v800_v40, 5  ;;  %v2238_v23 = vrot.slane %v806_v54, 5  ;;  %v820_v19 = vshll.u32 %v716_v14, 16  ;;  %v719_v14 = vld [vmem:[%s2511_s2 + $0x54] sm:$0x1] }
  0x6f   :  { %v813_v18 = vrot.slane %v811_v49, 4  ;;  %v825_v6 = vshrl.u32 %v2097_v39, 16  ;;  %v816_v15 = vrot.slane %v814_v57, 5  ;;  %v828_v40 = vshll.u32 %v2097_v39, 16 }
  0x70   :  { %v2249_v32 = vrot.slane %v789_v45, 4  ;;  %v803_v24 = vor.u32 %v802_v52, %v799_v37  ;;  %v2252_v54 = vrot.slane %v820_v19, 5  ;;  %v834_v35 = vshll.u32 %v717_v4, 16 }
  0x71   :  { %v827_v16 = vrot.slane %v825_v6, 4  ;;  %v839_v63 = vshrl.u32 %v2102_v60, 16  ;;  %v817_v52 = vor.u32 %v816_v15, %v813_v18  ;;  %v830_v37 = vrot.slane %v828_v40, 5  ;;  %v720_v18 = vld [vmem:[%s2511_s2 + $0x5c] sm:$0x1] }
  0x72   :  { %v2262_v49 = vrot.slane %v803_v24, 4  ;;  %v2264_v57 = vrot.slane %v834_v35, 5  ;;  %v842_v4 = vshll.u32 %v2102_v60, 16  ;;  %v848_v6 = vshll.u32 %v718_v34, 16 }
  0x73   :  { %v841_v19 = vrot.slane %v839_v63, 4  ;;  %v2271_v12 = vrot.slane %v817_v52, 4  ;;  %v831_v55 = vor.u32 %v830_v37, %v827_v16  ;;  %v853_v45 = vshrl.u32 %v2107_v26, 16  ;;  %v721_v37 = vld [vmem:[%s2511_s2 + $0x64] sm:$0x1] }
  0x74   :  { %v844_v35 = vrot.slane %v842_v4, 5  ;;  %v2277_v24 = vrot.slane %v848_v6, 5  ;;  %v856_v63 = vshll.u32 %v2107_v26, 16  ;;  %v862_v34 = vshll.u32 %v719_v14, 16 }
  0x75   :  { %v2284_v40 = vrot.slane %v831_v55, 4  ;;  %v855_v16 = vrot.slane %v853_v45, 4  ;;  %v867_v52 = vshrl.u32 %v2116_v13, 16  ;;  %v870_v14 = vshll.u32 %v2116_v13, 16 }
  0x76   :  { %v845_v4 = vor.u32 %v844_v35, %v841_v19  ;;  %v858_v6 = vrot.slane %v856_v63, 5  ;;  %v2290_v36 = vrot.slane %v862_v34, 5  ;;  %v876_v43 = vshll.u32 %v720_v18, 16  ;;  %v723_v18 = vld [vmem:[%s2511_s2 + $0x74] sm:$0x1] }
  0x77   :  { %v869_v55 = vrot.slane %v867_v52, 4  ;;  %v881_v45 = vshrl.u32 %v2121_v5, 16  ;;  %v872_v35 = vrot.slane %v870_v14, 5  ;;  %v884_v63 = vshll.u32 %v2121_v5, 16 }
  0x78   :  { %v2301_v3 = vrot.slane %v845_v4, 4  ;;  %v859_v19 = vor.u32 %v858_v6, %v855_v16  ;;  %v2304_v34 = vrot.slane %v876_v43, 5  ;;  %v890_v20 = vshll.u32 %v721_v37, 16 }
  0x79   :  { %v883_v30 = vrot.slane %v881_v45, 4  ;;  %v895_v15 = vshrl.u32 %v2126_v59, 16  ;;  %v873_v16 = vor.u32 %v872_v35, %v869_v55  ;;  %v886_v6 = vrot.slane %v884_v63, 5 }
  0x7a   :  { %v851_v52 = vsel %vm1216_vm2, %v2301_v3, %v2277_v24  ;;  %v2314_v4 = vrot.slane %v859_v19, 4  ;;  %v2316_v14 = vrot.slane %v890_v20, 5  ;;  %v898_v37 = vshll.u32 %v2126_v59, 16  ;;  %v724_v3 = vld [vmem:[%s2511_s2 + $0x7c] sm:$0x1] }
  0x7b   :  { %v897_v43 = vrot.slane %v895_v15, 4  ;;  %v904_v45 = vshll.u32 %v722_v41, 16  ;;  %v874_v13 = vrot.slane %v873_v16, 4  ;;  %v887_v38 = vor.u32 %v886_v6, %v883_v30  ;;  %v725_v30 = vld [vmem:[%s2511_s2 + $0x84] sm:$0x1] }
  0x7c   :  { %v865_v5 = vsel %vm1216_vm2, %v2314_v4, %v2290_v36  ;;  %v909_v26 = vshrl.u32 %v2139_v42, 16  ;;  %v900_v24 = vrot.slane %v898_v37, 5  ;;  %v912_v15 = vshll.u32 %v2139_v42, 16 }
  0x7d   :  { %v906_v20 = vrot.slane %v904_v45, 5  ;;  %v918_v55 = vshll.u32 %v723_v18, 16  ;;  %v879_v41 = vsel %vm1216_vm2, %v874_v13, %v2304_v34  ;;  %v888_v19 = vrot.slane %v887_v38, 4 }
  0x7e   :  { %v911_v35 = vrot.slane %v909_v26, 4  ;;  %v923_v36 = vshrl.u32 %v2158_v50, 16  ;;  %v901_v63 = vor.u32 %v900_v24, %v897_v43  ;;  %v914_v4 = vrot.slane %v912_v15, 5 }
  0x7f   :  { %v920_v16 = vrot.slane %v918_v55, 5  ;;  %v926_v6 = vshll.u32 %v2158_v50, 16  ;;  %v893_v18 = vsel %vm1216_vm2, %v888_v19, %v2316_v14  ;;  %v932_v45 = vshll.u32 %v724_v3, 16 }
  0x80   :  { %v925_v37 = vrot.slane %v923_v36, 4  ;;  %v937_v38 = vshrl.u32 %v2163_v44, 16  ;;  %v902_v26 = vrot.slane %v901_v63, 4  ;;  %v915_v13 = vor.u32 %v914_v4, %v911_v35 }
  0x81   :  { %v928_v34 = vrot.slane %v926_v6, 5  ;;  %v940_v42 = vshll.u32 %v2163_v44, 16  ;;  %v934_v59 = vrot.slane %v932_v45, 5  ;;  %v946_v43 = vshll.u32 %v725_v30, 16  ;;  %v988_v45 = vld [vmem:[%s2512_s3 + $0x30] sm:$0xf] }
  0x82   :  { %v939_v9 = vrot.slane %v937_v38, 4  ;;  %v2611_v24 = vmax.bf16 %v2042_v21, %v2021_v22  ;;  %v2612_v14 = vsel %vm1216_vm2, %v2198_v47, %v2189_v56  ;;  %v907_v3 = vsel %vm1216_vm2, %v902_v26, %v906_v20  ;;  %v989_v38 = vld [vmem:[%s2512_s3 + $0x38] sm:$0xf]  ;;  %v2635_v26 = vld [vmem:[#allocation7_spill] sm:$0xff] }
  0x83   :  { %v916_v55 = vrot.slane %v915_v13, 4  ;;  %v929_v19 = vor.u32 %v928_v34, %v925_v37  ;;  %v942_v35 = vrot.slane %v940_v42, 5  ;;  %v948_v36 = vrot.slane %v946_v43, 5  ;;  %v2636_v13 = vld [vmem:[#allocation11_spill] sm:$0xff]  ;;  %v2638_v43 = vld [vmem:[#allocation8_spill] sm:$0xff] }
  0x84   :  { %v966_v15 = vmax.bf16 %v2612_v14, %v2611_v24  ;;  %v2613_v63 = vmax.bf16 %v2055_v53, %v2023_v11  ;;  %v2614_v22 = vsel %vm1216_vm2, %v2206_v33, %v2191_v8  ;;  %v2615_v56 = vmax.bf16 %v2060_v7, %v2031_v10  ;;  %v982_v8 = vld [vmem:[%s2512_s3] sm:$0xf]  ;;  %v2639_v24 = vld [vmem:[#allocation4_spill] sm:$0xff] }
  0x85   :  { %v2616_v47 = vsel %vm1216_vm2, %v2214_v58, %v2200_v31  ;;  %v2617_v42 = vmax.bf16 %v2065_v51, %v2033_v48  ;;  %v2618_v11 = vsel %vm1216_vm2, %v2230_v27, %v2208_v46  ;;  %v921_v10 = vsel %vm1216_vm2, %v916_v55, %v920_v16  ;;  %v983_v27 = vld [vmem:[%s2512_s3 + $0x8] sm:$0xf]  ;;  %v984_v46 = vld [vmem:[%s2512_s3 + $0x10] sm:$0xf]  ;;  %v2641_v55 = vld [vmem:[#allocation10_spill] sm:$0xff] }
  0x86   :  { %v967_v21 = vmax.bf16 %v2614_v22, %v2613_v63  ;;  %v968_v20 = vmax.bf16 %v2616_v47, %v2615_v56  ;;  %v930_v7 = vrot.slane %v929_v19, 4  ;;  %v943_v33 = vor.u32 %v942_v35, %v939_v9  ;;  %v2633_v16 = vld [vmem:[#allocation3_spill] sm:$0xff]  ;;  %v2642_v19 = vld [vmem:[#allocation12_spill] sm:$0xff]  ;;  %v2644_v63 = vld [vmem:[#allocation5_spill] sm:$0xff] }
  0x87   :  { %v969_v53 = vmax.bf16 %v2618_v11, %v2617_v42  ;;  %v2619_v31 = vmax.bf16 %v2078_v1, %v2035_v62  ;;  %v2620_v48 = vsel %vm1216_vm2, %v2249_v32, %v2232_v0  ;;  %v2621_v9 = vmax.bf16 %v2083_v17, %v2037_v25  ;;  %v990_v47 = vld [vmem:[%s2512_s3 + $0x48] sm:$0xf] }
  0x88   :  { %v2622_v62 = vsel %vm1216_vm2, %v2262_v49, %v2238_v23  ;;  %v2623_v32 = vmax.bf16 %v2088_v61, %v2044_v29  ;;  %v2624_v0 = vsel %vm1216_vm2, %v2271_v12, %v2252_v54  ;;  %v2625_v30 = vmax.bf16 %v2097_v39, %v2046_v2  ;;  %v2627_v23 = vld [vmem:[#allocation2_spill] sm:$0xff]  ;;  %v985_v29 = vld [vmem:[%s2512_s3 + $0x18] sm:$0xf]  ;;  %v987_v2 = vld [vmem:[%s2512_s3 + $0x28] sm:$0xf] }
  0x89   :  { %v970_v51 = vmax.bf16 %v2620_v48, %v2619_v31  ;;  %v971_v1 = vmax.bf16 %v2622_v62, %v2621_v9  ;;  %v2626_v25 = vsel %vm1216_vm2, %v2284_v40, %v2264_v57  ;;  %v2628_v49 = vmax.bf16 %v2102_v60, %v2627_v23  ;;  %v986_v61 = vld [vmem:[%s2512_s3 + $0x20] sm:$0xf]  ;;  %v2630_v57 = vld [vmem:[#allocation9_spill] sm:$0xff]  ;;  %v994_v11 = vld [vmem:[%s2512_s3 + $0x68] sm:$0xf] }
  0x8a   :  { %v972_v58 = vmax.bf16 %v2624_v0, %v2623_v32  ;;  %v973_v17 = vmax.bf16 %v2626_v25, %v2625_v30  ;;  %v935_v39 = vsel %vm1216_vm2, %v930_v7, %v934_v59  ;;  %v944_v12 = vrot.slane %v943_v33, 4  ;;  %v2629_v54 = vld [vmem:[#allocation6_spill] sm:$0xff]  ;;  %v2646_v48 = vld [vmem:[#allocation13_spill] sm:$0xff] }
  0x8b   :  { %v974_v4 = vmax.bf16 %v851_v52, %v2628_v49  ;;  %v2631_v60 = vmax.bf16 %v2629_v54, %v2630_v57  ;;  %v2632_v52 = vld [vmem:[#allocation14_spill] sm:$0xff]  ;;  %v2637_v59 = vmax.bf16 %v2635_v26, %v2636_v13  ;;  %v2640_v14 = vmax.bf16 %v2638_v43, %v2639_v24 }
  0x8c   :  { %v2634_v6 = vmax.bf16 %v2632_v52, %v2633_v16  ;;  %v2643_v35 = vmax.bf16 %v2641_v55, %v2642_v19  ;;  %v2645_v22 = vmax.bf16 %v2158_v50, %v2644_v63  ;;  %v949_v42 = vsel %vm1216_vm2, %v944_v12, %v948_v36  ;;  %v993_v50 = vld [vmem:[%s2512_s3 + $0x60] sm:$0xf]  ;;  %v996_v36 = vld [vmem:[%s2512_s3 + $0x78] sm:$0xf] }
  0x8d   :  { %v975_v40 = vmax.bf16 %v865_v5, %v2631_v60  ;;  %v977_v34 = vmax.bf16 %v893_v18, %v2637_v59  ;;  %v978_v5 = vmax.bf16 %v907_v3, %v2640_v14  ;;  %v991_v18 = vld [vmem:[%s2512_s3 + $0x50] sm:$0xf]  ;;  %v992_v3 = vld [vmem:[%s2512_s3 + $0x58] sm:$0xf]  ;;  %v998_v7 = vmax.bf16 %v982_v8, %v966_v15  ;;  %v997_v62 = vld [vmem:[%s2512_s3 + $0x80] sm:$0xf] }
  0x8e   :  { %v976_v37 = vmax.bf16 %v879_v41, %v2634_v6  ;;  %v979_v41 = vmax.bf16 %v921_v10, %v2643_v35  ;;  %v980_v56 = vmax.bf16 %v935_v39, %v2645_v22  ;;  %v995_v10 = vld [vmem:[%s2512_s3 + $0x70] sm:$0xf]  ;;  %v999_v33 = vmax.bf16 %v983_v27, %v967_v21 }
  0x8f   :  { %v1000_v31 = vmax.bf16 %v984_v46, %v968_v20  ;;  %v2647_v9 = vmax.bf16 %v2163_v44, %v2646_v48  ;;  %v1001_v32 = vmax.bf16 %v985_v29, %v969_v53  ;;  %v1002_v0 = vmax.bf16 %v986_v61, %v970_v51 }
  0x90   :  { %v1003_v30 = vmax.bf16 %v987_v2, %v971_v1  ;;  %v1004_v25 = vmax.bf16 %v988_v45, %v972_v58  ;;  %v1005_v23 = vmax.bf16 %v989_v38, %v973_v17  ;;  %v1006_v15 = vmax.bf16 %v990_v47, %v974_v4 }
  0x91   :  { %v981_v28 = vmax.bf16 %v949_v42, %v2647_v9  ;;  %v1007_v21 = vmax.bf16 %v991_v18, %v975_v40  ;;  %v1008_v20 = vmax.bf16 %v992_v3, %v976_v37  ;;  %v1009_v8 = vmax.bf16 %v993_v50, %v977_v34 }
  0x92   :  { %v1010_v27 = vmax.bf16 %v994_v11, %v978_v5  ;;  %v1011_v44 = vmax.bf16 %v995_v10, %v979_v41  ;;  %v1012_v46 = vmax.bf16 %v996_v36, %v980_v56  ;;  %v1122_v39 = vcombine.low %v998_v7, %v999_v33 }
  0x93   :  { %v1013_v49 = vmax.bf16 %v997_v62, %v981_v28  ;;  %v1123_v12 = vcombine.low %v1000_v31, %v1001_v32  ;;  %v1125_v54 = vcombine.low %v1002_v0, %v1003_v30  ;;  %v1127_v57 = vcombine.low %v1004_v25, %v1005_v23 }
  0x94   :  { %v1129_v60 = vcombine.low %v1006_v15, %v1007_v21  ;;  %v1131_v52 = vcombine.low %v1008_v20, %v1009_v8  ;;  %1086 = vst [vmem:[%s2513_s4] sm:$0xff] %v1122_v39   ;;  %v1133_v53 = vcombine.low %v1010_v27, %v1011_v44 }
  0x95   :  { %1124 = vst [vmem:[%s2513_s4 + $0x8] sm:$0xff] %v1123_v12   ;;  %v1135_v51 = vcombine.low %v1012_v46, %v1013_v49  ;;  %1126 = vst [vmem:[%s2513_s4 + $0x10] sm:$0xff] %v1125_v54  }
  0x96   :  { %1128 = vst [vmem:[%s2513_s4 + $0x18] sm:$0xff] %v1127_v57   ;;  %1130 = vst [vmem:[%s2513_s4 + $0x20] sm:$0xff] %v1129_v60  }
  0x97   :  { %1132 = vst [vmem:[%s2513_s4 + $0x28] sm:$0xff] %v1131_v52   ;;  %1134 = vst [vmem:[%s2513_s4 + $0x30] sm:$0xff] %v1133_v53  }
  0x98   :  { %1136 = vst [vmem:[%s2513_s4 + $0x38] sm:$0xff] %v1135_v51  }

// kernel: resnext_forward.11
= control target key start
LH: loop header
LB: loop body
LE: loop exit
PB: predicated region body
PF: predicated region fallthrough
CT: control target
= control target key end

     0   :  { %v326_v1 = vmov 0.0   ;;  %vm327_vm0 = vmmov 0   ;;  %s412_s0 = inlined_call_operand.vmem [shape: bf16[2,64,128], index: 0, kind: input, shape index: {}]   ;;  %s413_s1 = inlined_call_operand.vmem [shape: bf16[128,128], index: 1, kind: input, shape index: {}]   ;;  %s414_s2 = inlined_call_operand.vmem [shape: f32[1,128], index: 2, kind: input, shape index: {}]   ;;  %s415_s3 = inlined_call_operand.hbm [shape: f32[2,128], index: 3, kind: output, shape index: {}]  }
   0x1   :  { %v294_v0 = vld [vmem:[%s413_s1] sm:$0xff]   ;;  %271 = vmatprep.subr.bf16.mxu0 %v326_v1  ;;  %v295_v2 = vld [vmem:[%s413_s1 + $0x8] sm:$0xff]   ;;  %287 = vmatprep.mubr.msk.bf16.mxu0 %vm327_vm0, %v326_v1  ;;  %v296_v3 = vld [vmem:[%s413_s1 + $0x10] sm:$0xff]  }
   0x2   :  { %272 = vmatpush3.bf16.msra.mxu0 %v294_v0  ;;  %v224_v4 = vld [vmem:[%s412_s0] sm:$0xff]   ;;  %v255_v5 = vld [vmem:[%s412_s0 + $0x8] sm:$0xff]   ;;  %v297_v10 = vld [vmem:[%s413_s1 + $0x18] sm:$0xff]  }
   0x3   :  { %273 = vmatprep.subr.bf16.mxu0 %v326_v1  ;;  %v225_v6 = vunpack.c.l.bf16 %v224_v4  ;;  %v226_v7 = vunpack.c.h.bf16 %v224_v4  ;;  %v258_v8 = vld [vmem:[%s412_s0 + $0x20] sm:$0xff]   ;;  %v259_v9 = vld [vmem:[%s412_s0 + $0x28] sm:$0xff]   ;;  %v229_v11 = vunpack.c.l.bf16 %v255_v5 }
   0x4   :  { %v241_v12 = vunpack.c.l.bf16 %v258_v8  ;;  %v242_v13 = vunpack.c.h.bf16 %v258_v8  ;;  %v245_v14 = vunpack.c.l.bf16 %v259_v9 }
   0x6   :  { %274 = vmatpush3.bf16.msra.mxu0 %v295_v2 }
   0x7   :  { %275 = vmatprep.subr.bf16.mxu0 %v326_v1 }
   0xa   :  { %276 = vmatpush3.bf16.msra.mxu0 %v296_v3 }
   0xb   :  { %277 = vmatprep.subr.bf16.mxu0 %v326_v1 }
   0xc   :  { %8 = vsyncpa [#allocation3], 0  ;;  %v256_v15 = vld [vmem:[%s412_s0 + $0x10] sm:$0xff]   ;;  %v230_v17 = vunpack.c.h.bf16 %v255_v5  ;;  %v246_v18 = vunpack.c.h.bf16 %v259_v9  ;;  %v48_v19 = vadd.f32 %v226_v7, %v225_v6  ;;  %v61_v20 = vadd.f32 %v242_v13, %v241_v12  ;;  %v298_v21 = vld [vmem:[%s413_s1 + $0x20] sm:$0xff]   ;;  %s328_s17 = smov [#allocation2]  }
   0xd   :  { %v260_v16 = vld [vmem:[%s412_s0 + $0x30] sm:$0xff]   ;;  %v233_v22 = vunpack.c.l.bf16 %v256_v15  ;;  %v257_v26 = vld [vmem:[%s412_s0 + $0x18] sm:$0xff]   ;;  %v234_v28 = vunpack.c.h.bf16 %v256_v15  ;;  %v299_v32 = vld [vmem:[%s413_s1 + $0x28] sm:$0xff]   ;;  %vm78_vm1 = vcmask 1041409   ;;  %vm81_vm2 = vcmask 1041408   ;;  %s203_s18 = sshll.u32 %s328_s17, 4  ;;  %s204_s18 = int_to_ptr.vmem [resolvable:$true] %s203_s18 }
   0xe   :  { %278 = vmatpush3.bf16.msra.mxu0 %v297_v10  ;;  %v249_v23 = vunpack.c.l.bf16 %v260_v16  ;;  %v49_v24 = vadd.f32 %v229_v11, %v48_v19  ;;  %v62_v25 = vadd.f32 %v245_v14, %v61_v20  ;;  %v261_v27 = vld [vmem:[%s412_s0 + $0x38] sm:$0xff]   ;;  %v250_v29 = vunpack.c.h.bf16 %v260_v16  ;;  %v300_v41 = vld [vmem:[%s413_s1 + $0x30] sm:$0xff]   ;;  %vm219_vm3 = vmpackc.low %vm81_vm2, %vm81_vm2  ;;  %s302_s19 = scalar_lea.vmem %s204_s18, 32  ;;  %p307_p1 = scmp.lt.s32.totalorder %s204_s18, %s204_s18 }
   0xf   :  { %279 = vmatprep.subr.bf16.mxu0 %v326_v1  ;;  %v237_v33 = vunpack.c.l.bf16 %v257_v26  ;;  %v253_v34 = vunpack.c.l.bf16 %v261_v27  ;;  %v238_v37 = vunpack.c.h.bf16 %v257_v26  ;;  %v254_v38 = vunpack.c.h.bf16 %v261_v27  ;;  %v301_v46 = vld [vmem:[%s413_s1 + $0x38] sm:$0xff]   ;;  %v222_v63 = vld [vmem:[%s414_s2] ss:$0 sm:$0xff]  ;;  %p303_p0 = scmp.ne.s32.totalorder %s204_s18, %s302_s19  ;;  %p308_p2 = scmp.lt.s32.totalorder %s302_s19, %s302_s19 }
  0x10   :  { %v50_v30 = vadd.f32 %v230_v17, %v49_v24  ;;  %v63_v31 = vadd.f32 %v246_v18, %v62_v25 }
  0x11   :  { %p309_p3 = por %p308_p2, %p307_p1 }
  0x12   :  { %280 = vmatpush3.bf16.msra.mxu0 %v298_v21  ;;  %v51_v35 = vadd.f32 %v233_v22, %v50_v30  ;;  %v64_v36 = vadd.f32 %v249_v23, %v63_v31 }
  0x13   :  { %281 = vmatprep.subr.bf16.mxu0 %v326_v1  ;;  %p310_p4 = pnand %p309_p3, %p303_p0 }
  0x14   :  { %v52_v39 = vadd.f32 %v234_v28, %v51_v35  ;;  %v65_v40 = vadd.f32 %v250_v29, %v64_v36 }
  0x16   :  { %282 = vmatpush3.bf16.msra.mxu0 %v299_v32  ;;  %v53_v42 = vadd.f32 %v237_v33, %v52_v39  ;;  %v66_v43 = vadd.f32 %v253_v34, %v65_v40 }
  0x17   :  { %283 = vmatprep.subr.bf16.mxu0 %v326_v1 }
  0x18   :  { %v54_v44 = vadd.f32 %v238_v37, %v53_v42  ;;  %v67_v45 = vadd.f32 %v254_v38, %v66_v43 }
  0x1a   :  { %284 = vmatpush3.bf16.msra.mxu0 %v300_v41  ;;  %v55_v47 = vrot.slane %v54_v44, 4  ;;  %v68_v48 = vrot.slane %v67_v45, 4 }
  0x1b   :  { %285 = vmatprep.subr.bf16.mxu0 %v326_v1 }
  0x1c   :  { %v56_v49 = vadd.f32 %v55_v47, %v54_v44  ;;  %v69_v50 = vadd.f32 %v68_v48, %v67_v45 }
  0x1e   :  { %286 = vmatpush3.bf16.msra.mxu0 %v301_v46  ;;  %v57_v51 = vrot.slane %v56_v49, 2  ;;  %v70_v52 = vrot.slane %v69_v50, 2 }
  0x20   :  { %v58_v53 = vadd.f32 %v57_v51, %v56_v49  ;;  %v71_v54 = vadd.f32 %v70_v52, %v69_v50 }
  0x22   :  { %v59_v55 = vrot.slane %v58_v53, 1  ;;  %v72_v56 = vrot.slane %v71_v54, 1 }
  0x24   :  { %v60_v57 = vadd.f32 %v59_v55, %v58_v53  ;;  %v73_v58 = vadd.f32 %v72_v56, %v71_v54 }
  0x26   :  { %v74_v59 = vmul.f32 0.015625, %v60_v57  ;;  %v75_v60 = vmul.f32 0.015625, %v73_v58 }
  0x28   :  { %v79_v61 = vsel %vm78_vm1, %v75_v60, %v74_v59 }
  0x29   :  { %v220_v62 = vpack.c.bf16 %v79_v61, %v79_v61 }
  0x2b   :  { %288 = vmatmul.mubr.msk.bf16.vlgmr.msra.gmra.mrb[0].mxu0 %vm219_vm3, %v220_v62 }
  0xfe   :  { %v182_v0 = vpop.f32.mrb[0].mxu0 }
  0xff   :  { %v195_v1 = vadd.f32 %v222_v63, %v182_v0  ;;  %v289_v2 = vpop.f32.mrb[1].mxu0 }
 0x100   :  { %v185_v3 = vpop.f32.mrb[2].mxu0 }
 0x101   :  { %196 = vst [vmem:[#allocation2] sm:$0x3] %v195_v1  ;;  %v290_v4 = vpop.f32.mrb[3].mxu0 }
 0x102   :  { %313 = shalt.err (!%p310_p4)
}
 0x103   :  { %s314_s2 = scalar_lea.hbm %s415_s3, 32 }
 0x104   :  { %p315_p5 = scmp.ne.s32.totalorder %s415_s3, %s314_s2  ;;  %p318_p6 = scmp.lt.u32.totalorder %s314_s2, %s415_s3 }
 0x106   :  { %p320_p7 = pnand %p318_p6, %p315_p5 }
 0x108   :  { %323 = shalt.err (!%p320_p7)
}
 0x109   :  { %206 = dma.vmem_to_hbm [thread:$0]  %s204_s18, 32, %s415_s3, [#allocation3]  }
 0x10a   :  { %324 = dma.done.wait [#allocation3], 32  }
 0x10b   :  { %325 = vsyncadd [#allocation3], 4294967264 }
 0x10c   :  { %210 = vsyncpa [#allocation3], 1 }

// kernel: resnext_forward.10
= control target key start
LH: loop header
LB: loop body
LE: loop exit
PB: predicated region body
PF: predicated region fallthrough
CT: control target
= control target key end

     0   :  { %s836_s1 = inlined_call_operand.vmem [shape: bf16[256,128], index: 1, kind: input, shape index: {}]   ;;  %s837_s0 = inlined_call_operand.vmem [shape: bf16[128,256], index: 0, kind: input, shape index: {}]   ;;  %s838_s2 = inlined_call_operand.vmem [shape: f32[1,128], index: 2, kind: input, shape index: {}]   ;;  %s839_s3 = inlined_call_operand.vmem [shape: bf16[128,128], index: 3, kind: output, shape index: {}]  }
   0x1   :  { %v635_v0 = vld [vmem:[%s836_s1 + $0x40] sm:$0xff]   ;;  %v637_v2 = vld [vmem:[%s836_s1 + $0x48] sm:$0xff]   ;;  %v639_v4 = vld [vmem:[%s836_s1 + $0x50] sm:$0xff]  }
   0x2   :  { %v636_v1 = vld [vmem:[%s836_s1] sm:$0xff]   ;;  %555 = vmatprep.subr.bf16.mxu0 %v635_v0  ;;  %619 = vmatprep.subr.bf16.mxu1 %v635_v0  ;;  %v638_v3 = vld [vmem:[%s836_s1 + $0x8] sm:$0xff]   ;;  %v640_v5 = vld [vmem:[%s836_s1 + $0x10] sm:$0xff]  }
   0x3   :  { %556 = vmatpush3.bf16.msra.mxu0 %v636_v1  ;;  %627 = vmatpush3.bf16.msra.mxu1 %v636_v1  ;;  %v641_v6 = vld [vmem:[%s836_s1 + $0x58] sm:$0xff]   ;;  %v643_v8 = vld [vmem:[%s836_s1 + $0x60] sm:$0xff]   ;;  %v645_v10 = vld [vmem:[%s836_s1 + $0x68] sm:$0xff]  }
   0x4   :  { %557 = vmatprep.subr.bf16.mxu0 %v637_v2  ;;  %620 = vmatprep.subr.bf16.mxu1 %v637_v2  ;;  %v642_v7 = vld [vmem:[%s836_s1 + $0x18] sm:$0xff]   ;;  %v644_v9 = vld [vmem:[%s836_s1 + $0x20] sm:$0xff]   ;;  %v646_v13 = vld [vmem:[%s836_s1 + $0x28] sm:$0xff]  }
   0x5   :  { %v653_v11 = vld [vmem:[%s837_s0 + $0x4] ss:$8 sps:$4 sm:$0xff]   ;;  %v647_v14 = vld [vmem:[%s836_s1 + $0x70] sm:$0xff]   ;;  %v649_v16 = vld [vmem:[%s836_s1 + $0x78] sm:$0xff]  }
   0x6   :  { %v656_v12 = vld [vmem:[%s837_s0 + $0x44] ss:$8 sps:$4 sm:$0xff]   ;;  %278 = vmatprep.mubr.bf16.mxu0 %v653_v11  ;;  %v648_v15 = vld [vmem:[%s836_s1 + $0x30] sm:$0xff]   ;;  %v650_v17 = vld [vmem:[%s836_s1 + $0x38] sm:$0xff]  }
   0x7   :  { %558 = vmatpush3.bf16.msra.mxu0 %v638_v3  ;;  %628 = vmatpush3.bf16.msra.mxu1 %v638_v3  ;;  %v651_v18 = vld [vmem:[%s837_s0] ss:$8 sps:$4 sm:$0xff]   ;;  %v657_v20 = vld [vmem:[%s837_s0 + $0x14] ss:$8 sps:$4 sm:$0xff]   ;;  %v661_v22 = vld [vmem:[%s837_s0 + $0x10] ss:$8 sps:$4 sm:$0xff]  }
   0x8   :  { %559 = vmatprep.subr.bf16.mxu0 %v639_v4  ;;  %621 = vmatprep.subr.bf16.mxu1 %v639_v4  ;;  %v654_v19 = vld [vmem:[%s837_s0 + $0x40] ss:$8 sps:$4 sm:$0xff]   ;;  %v659_v21 = vld [vmem:[%s837_s0 + $0x54] ss:$8 sps:$4 sm:$0xff]   ;;  %v662_v23 = vld [vmem:[%s837_s0 + $0x50] ss:$8 sps:$4 sm:$0xff]  }
   0x9   :  { %310 = vmatprep.mubr.bf16.mxu1 %v656_v12  ;;  %v663_v24 = vld [vmem:[%s837_s0 + $0x24] ss:$8 sps:$4 sm:$0xff]   ;;  %v667_v26 = vld [vmem:[%s837_s0 + $0x20] ss:$8 sps:$4 sm:$0xff]   ;;  %v669_v28 = vld [vmem:[%s837_s0 + $0x34] ss:$8 sps:$4 sm:$0xff]  }
   0xa   :  { %v665_v25 = vld [vmem:[%s837_s0 + $0x64] ss:$8 sps:$4 sm:$0xff]   ;;  %v668_v27 = vld [vmem:[%s837_s0 + $0x60] ss:$8 sps:$4 sm:$0xff]   ;;  %v671_v29 = vld [vmem:[%s837_s0 + $0x74] ss:$8 sps:$4 sm:$0xff]  }
   0xb   :  { %560 = vmatpush3.bf16.msra.mxu0 %v640_v5  ;;  %629 = vmatpush3.bf16.msra.mxu1 %v640_v5  ;;  %v673_v30 = vld [vmem:[%s837_s0 + $0x30] ss:$8 sps:$4 sm:$0xff]   ;;  %v794_v34 = vld [vmem:[%s838_s2] ss:$0 sm:$0xff] }
   0xc   :  { %561 = vmatprep.subr.bf16.mxu0 %v641_v6  ;;  %622 = vmatprep.subr.bf16.mxu1 %v641_v6  ;;  %v674_v31 = vld [vmem:[%s837_s0 + $0x70] ss:$8 sps:$4 sm:$0xff]  }
   0xf   :  { %562 = vmatpush3.bf16.msra.mxu0 %v642_v7  ;;  %630 = vmatpush3.bf16.msra.mxu1 %v642_v7 }
  0x10   :  { %563 = vmatprep.subr.bf16.mxu0 %v643_v8  ;;  %623 = vmatprep.subr.bf16.mxu1 %v643_v8 }
  0x13   :  { %564 = vmatpush3.bf16.msra.mxu0 %v644_v9  ;;  %631 = vmatpush3.bf16.msra.mxu1 %v644_v9 }
  0x14   :  { %565 = vmatprep.subr.bf16.mxu0 %v645_v10  ;;  %624 = vmatprep.subr.bf16.mxu1 %v645_v10 }
  0x17   :  { %566 = vmatpush3.bf16.msra.mxu0 %v646_v13  ;;  %632 = vmatpush3.bf16.msra.mxu1 %v646_v13 }
  0x18   :  { %567 = vmatprep.subr.bf16.mxu0 %v647_v14  ;;  %625 = vmatprep.subr.bf16.mxu1 %v647_v14 }
  0x1b   :  { %568 = vmatpush3.bf16.msra.mxu0 %v648_v15  ;;  %633 = vmatpush3.bf16.msra.mxu1 %v648_v15 }
  0x1c   :  { %569 = vmatprep.subr.bf16.mxu0 %v649_v16  ;;  %626 = vmatprep.subr.bf16.mxu1 %v649_v16 }
  0x1f   :  { %570 = vmatpush3.bf16.msra.mxu0 %v650_v17  ;;  %634 = vmatpush3.bf16.msra.mxu1 %v650_v17 }
  0x22   :  { %279 = vmatmul.mubr.bf16.vlgmr.msra.gmra.mrb[0].mxu0 %v651_v18  ;;  %311 = vmatmul.mubr.bf16.vlgmr.msra.gmra.mrb[0].mxu1 %v654_v19 }
  0x23   :  { %286 = vmatprep.mubr.bf16.mxu0 %v657_v20  ;;  %318 = vmatprep.mubr.bf16.mxu1 %v659_v21 }
  0x2a   :  { %287 = vmatmul.mubr.bf16.gmra.mrb[4].mxu0 %v661_v22  ;;  %319 = vmatmul.mubr.bf16.gmra.mrb[4].mxu1 %v662_v23 }
  0x2b   :  { %294 = vmatprep.mubr.bf16.mxu0 %v663_v24  ;;  %326 = vmatprep.mubr.bf16.mxu1 %v665_v25 }
  0x32   :  { %295 = vmatmul.mubr.bf16.gmra.mrb[8].mxu0 %v667_v26  ;;  %327 = vmatmul.mubr.bf16.gmra.mrb[8].mxu1 %v668_v27 }
  0x33   :  { %302 = vmatprep.mubr.bf16.mxu0 %v669_v28  ;;  %334 = vmatprep.mubr.bf16.mxu1 %v671_v29 }
  0x3a   :  { %303 = vmatmul.mubr.bf16.gmra.mrb[12].mxu0 %v673_v30  ;;  %335 = vmatmul.mubr.bf16.gmra.mrb[12].mxu1 %v674_v31 }
  0xf5   :  { %v571_v32 = vpop.f32.mrb[0].mxu0  ;;  %v595_v33 = vpop.f32.mrb[0].mxu1 }
  0xf6   :  { %v572_v35 = vpop.f32.mrb[1].mxu0  ;;  %v596_v36 = vpop.f32.mrb[1].mxu1 }
  0xf7   :  { %v573_v37 = vadd.f32 %v572_v35, %v571_v32  ;;  %v597_v38 = vadd.f32 %v596_v36, %v595_v33  ;;  %v574_v39 = vpop.f32.mrb[2].mxu0  ;;  %v598_v40 = vpop.f32.mrb[2].mxu1 }
  0xf8   :  { %v575_v41 = vpop.f32.mrb[3].mxu0  ;;  %v599_v42 = vpop.f32.mrb[3].mxu1 }
  0xf9   :  { %v281_v43 = vadd.f32 %v573_v37, %v794_v34  ;;  %v313_v44 = vadd.f32 %v597_v38, %v794_v34  ;;  %v576_v45 = vadd.f32 %v575_v41, %v574_v39  ;;  %v600_v46 = vadd.f32 %v599_v42, %v598_v40 }
  0xfb   :  { %v284_v47 = vadd.f32 %v576_v45, %v794_v34  ;;  %v316_v48 = vadd.f32 %v600_v46, %v794_v34  ;;  %v343_v49 = vmax.f32 %v281_v43, 0.0  ;;  %v351_v50 = vmax.f32 %v313_v44, 0.0 }
  0xfd   :  { %v344_v51 = vmax.f32 %v284_v47, 0.0  ;;  %v352_v52 = vmax.f32 %v316_v48, 0.0  ;;  %v577_v53 = vpop.f32.mrb[4].mxu0  ;;  %v601_v54 = vpop.f32.mrb[4].mxu1 }
  0xfe   :  { %v578_v55 = vpop.f32.mrb[5].mxu0  ;;  %v602_v56 = vpop.f32.mrb[5].mxu1 }
  0xff   :  { %v511_v57 = vpack.c.bf16 %v344_v51, %v343_v49  ;;  %v531_v58 = vpack.c.bf16 %v352_v52, %v351_v50  ;;  %v579_v59 = vadd.f32 %v578_v55, %v577_v53  ;;  %v603_v60 = vadd.f32 %v602_v56, %v601_v54  ;;  %v580_v61 = vpop.f32.mrb[6].mxu0  ;;  %v604_v62 = vpop.f32.mrb[6].mxu1 }
 0x100   :  { %v581_v63 = vpop.f32.mrb[7].mxu0  ;;  %v605_v0 = vpop.f32.mrb[7].mxu1 }
 0x101   :  { %512 = vst [vmem:[%s839_s3] sm:$0xff] %v511_v57   ;;  %551 = vst [vmem:[%s839_s3 + $0x20] sm:$0xff] %v531_v58   ;;  %v289_v1 = vadd.f32 %v579_v59, %v794_v34  ;;  %v321_v2 = vadd.f32 %v603_v60, %v794_v34  ;;  %v582_v3 = vadd.f32 %v581_v63, %v580_v61 }
 0x102   :  { %v606_v4 = vadd.f32 %v605_v0, %v604_v62 }
 0x103   :  { %v292_v5 = vadd.f32 %v582_v3, %v794_v34  ;;  %v345_v7 = vmax.f32 %v289_v1, 0.0  ;;  %v353_v8 = vmax.f32 %v321_v2, 0.0 }
 0x104   :  { %v324_v6 = vadd.f32 %v606_v4, %v794_v34 }
 0x105   :  { %v346_v9 = vmax.f32 %v292_v5, 0.0  ;;  %v583_v11 = vpop.f32.mrb[8].mxu0  ;;  %v607_v12 = vpop.f32.mrb[8].mxu1 }
 0x106   :  { %v354_v10 = vmax.f32 %v324_v6, 0.0  ;;  %v584_v13 = vpop.f32.mrb[9].mxu0  ;;  %v608_v14 = vpop.f32.mrb[9].mxu1 }
 0x107   :  { %v516_v15 = vpack.c.bf16 %v346_v9, %v345_v7  ;;  %v585_v17 = vadd.f32 %v584_v13, %v583_v11  ;;  %v609_v18 = vadd.f32 %v608_v14, %v607_v12  ;;  %v586_v19 = vpop.f32.mrb[10].mxu0  ;;  %v610_v20 = vpop.f32.mrb[10].mxu1 }
 0x108   :  { %v536_v16 = vpack.c.bf16 %v354_v10, %v353_v8  ;;  %v587_v21 = vpop.f32.mrb[11].mxu0  ;;  %v611_v22 = vpop.f32.mrb[11].mxu1 }
 0x109   :  { %548 = vst [vmem:[%s839_s3 + $0x8] sm:$0xff] %v516_v15   ;;  %v297_v23 = vadd.f32 %v585_v17, %v794_v34  ;;  %v329_v24 = vadd.f32 %v609_v18, %v794_v34  ;;  %v588_v25 = vadd.f32 %v587_v21, %v586_v19  ;;  %v612_v26 = vadd.f32 %v611_v22, %v610_v20 }
 0x10a   :  { %552 = vst [vmem:[%s839_s3 + $0x28] sm:$0xff] %v536_v16  }
 0x10b   :  { %v300_v27 = vadd.f32 %v588_v25, %v794_v34  ;;  %v332_v28 = vadd.f32 %v612_v26, %v794_v34  ;;  %v347_v29 = vmax.f32 %v297_v23, 0.0  ;;  %v355_v30 = vmax.f32 %v329_v24, 0.0 }
 0x10d   :  { %v348_v31 = vmax.f32 %v300_v27, 0.0  ;;  %v356_v32 = vmax.f32 %v332_v28, 0.0  ;;  %v589_v33 = vpop.f32.mrb[12].mxu0  ;;  %v613_v35 = vpop.f32.mrb[12].mxu1 }
 0x10e   :  { %v590_v36 = vpop.f32.mrb[13].mxu0  ;;  %v614_v37 = vpop.f32.mrb[13].mxu1 }
 0x10f   :  { %v521_v38 = vpack.c.bf16 %v348_v31, %v347_v29  ;;  %v541_v39 = vpack.c.bf16 %v356_v32, %v355_v30  ;;  %v591_v40 = vadd.f32 %v590_v36, %v589_v33  ;;  %v615_v41 = vadd.f32 %v614_v37, %v613_v35  ;;  %v592_v42 = vpop.f32.mrb[14].mxu0  ;;  %v616_v43 = vpop.f32.mrb[14].mxu1 }
 0x110   :  { %v593_v44 = vpop.f32.mrb[15].mxu0  ;;  %v617_v45 = vpop.f32.mrb[15].mxu1 }
 0x111   :  { %549 = vst [vmem:[%s839_s3 + $0x10] sm:$0xff] %v521_v38   ;;  %553 = vst [vmem:[%s839_s3 + $0x30] sm:$0xff] %v541_v39   ;;  %v305_v46 = vadd.f32 %v591_v40, %v794_v34  ;;  %v337_v47 = vadd.f32 %v615_v41, %v794_v34  ;;  %v594_v48 = vadd.f32 %v593_v44, %v592_v42 }
 0x112   :  { %v618_v49 = vadd.f32 %v617_v45, %v616_v43 }
 0x113   :  { %v308_v50 = vadd.f32 %v594_v48, %v794_v34  ;;  %v349_v52 = vmax.f32 %v305_v46, 0.0  ;;  %v357_v53 = vmax.f32 %v337_v47, 0.0 }
 0x114   :  { %v340_v51 = vadd.f32 %v618_v49, %v794_v34 }
 0x115   :  { %v350_v54 = vmax.f32 %v308_v50, 0.0 }
 0x116   :  { %v358_v55 = vmax.f32 %v340_v51, 0.0 }
 0x117   :  { %v526_v56 = vpack.c.bf16 %v350_v54, %v349_v52 }
 0x118   :  { %v546_v57 = vpack.c.bf16 %v358_v55, %v357_v53 }
 0x119   :  { %550 = vst [vmem:[%s839_s3 + $0x18] sm:$0xff] %v526_v56  }
 0x11a   :  { %554 = vst [vmem:[%s839_s3 + $0x38] sm:$0xff] %v546_v57  }

// kernel: resnext_forward.9
= control target key start
LH: loop header
LB: loop body
LE: loop exit
PB: predicated region body
PF: predicated region fallthrough
CT: control target
= control target key end

     0   :  { %s2926_s1 = inlined_call_operand.vmem [shape: bf16[1152,128], index: 1, kind: input, shape index: {}]   ;;  %s2927_s0 = inlined_call_operand.vmem [shape: bf16[128,1152], index: 0, kind: input, shape index: {}]   ;;  %s2928_s2 = inlined_call_operand.vmem [shape: f32[1,128], index: 2, kind: input, shape index: {}]   ;;  %s2929_s3 = inlined_call_operand.vmem [shape: bf16[128,128], index: 3, kind: output, shape index: {}]  }
   0x1   :  { %v2175_v0 = vld [vmem:[%s2926_s1 + $0x40] sm:$0xff]   ;;  %v2179_v4 = vld [vmem:[%s2926_s1 + $0x48] sm:$0xff]   ;;  %v2183_v8 = vld [vmem:[%s2926_s1 + $0x50] sm:$0xff]  }
   0x2   :  { %v2176_v1 = vld [vmem:[%s2926_s1 + $0xc0] sm:$0xff]   ;;  %1855 = vmatprep.subr.bf16.mxu0 %v2175_v0  ;;  %v2180_v5 = vld [vmem:[%s2926_s1 + $0xc8] sm:$0xff]   ;;  %v2184_v9 = vld [vmem:[%s2926_s1 + $0xd0] sm:$0xff]  }
   0x3   :  { %v2177_v2 = vld [vmem:[%s2926_s1] sm:$0xff]   ;;  %1919 = vmatprep.subr.bf16.mxu1 %v2176_v1  ;;  %v2181_v6 = vld [vmem:[%s2926_s1 + $0x8] sm:$0xff]   ;;  %v2185_v10 = vld [vmem:[%s2926_s1 + $0x10] sm:$0xff]  }
   0x4   :  { %v2178_v3 = vld [vmem:[%s2926_s1 + $0x80] sm:$0xff]   ;;  %1856 = vmatpush3.bf16.msra.mxu0 %v2177_v2  ;;  %v2182_v7 = vld [vmem:[%s2926_s1 + $0x88] sm:$0xff]   ;;  %v2186_v11 = vld [vmem:[%s2926_s1 + $0x90] sm:$0xff]  }
   0x5   :  { %1920 = vmatpush3.bf16.msra.mxu1 %v2178_v3  ;;  %1857 = vmatprep.subr.bf16.mxu0 %v2179_v4  ;;  %v2187_v12 = vld [vmem:[%s2926_s1 + $0x58] sm:$0xff]   ;;  %v2191_v16 = vld [vmem:[%s2926_s1 + $0x60] sm:$0xff]   ;;  %v2195_v20 = vld [vmem:[%s2926_s1 + $0x68] sm:$0xff]  }
   0x6   :  { %1921 = vmatprep.subr.bf16.mxu1 %v2180_v5  ;;  %v2188_v13 = vld [vmem:[%s2926_s1 + $0xd8] sm:$0xff]   ;;  %v2192_v17 = vld [vmem:[%s2926_s1 + $0xe0] sm:$0xff]   ;;  %v2196_v21 = vld [vmem:[%s2926_s1 + $0xe8] sm:$0xff]  }
   0x7   :  { %v2189_v14 = vld [vmem:[%s2926_s1 + $0x18] sm:$0xff]   ;;  %v2193_v18 = vld [vmem:[%s2926_s1 + $0x20] sm:$0xff]   ;;  %v2197_v22 = vld [vmem:[%s2926_s1 + $0x28] sm:$0xff]  }
   0x8   :  { %1858 = vmatpush3.bf16.msra.mxu0 %v2181_v6  ;;  %v2190_v15 = vld [vmem:[%s2926_s1 + $0x98] sm:$0xff]   ;;  %v2194_v19 = vld [vmem:[%s2926_s1 + $0xa0] sm:$0xff]   ;;  %v2198_v23 = vld [vmem:[%s2926_s1 + $0xa8] sm:$0xff]  }
   0x9   :  { %1922 = vmatpush3.bf16.msra.mxu1 %v2182_v7  ;;  %1859 = vmatprep.subr.bf16.mxu0 %v2183_v8  ;;  %v2199_v24 = vld [vmem:[%s2926_s1 + $0x70] sm:$0xff]   ;;  %v2203_v28 = vld [vmem:[%s2926_s1 + $0x78] sm:$0xff]   ;;  %v2207_v32 = vld [vmem:[%s2927_s0] ss:$36 sps:$4 sm:$0xff]  }
   0xa   :  { %1923 = vmatprep.subr.bf16.mxu1 %v2184_v9  ;;  %v2200_v25 = vld [vmem:[%s2926_s1 + $0xf0] sm:$0xff]   ;;  %v2204_v29 = vld [vmem:[%s2926_s1 + $0xf8] sm:$0xff]   ;;  %v2209_v33 = vld [vmem:[%s2927_s0 + $0x4] ss:$36 sps:$4 sm:$0xff]  }
   0xb   :  { %v2201_v26 = vld [vmem:[%s2926_s1 + $0x30] sm:$0xff]   ;;  %v2205_v30 = vld [vmem:[%s2926_s1 + $0x38] sm:$0xff]   ;;  %v2210_v34 = vld [vmem:[%s2927_s0 + $0x8] ss:$36 sps:$4 sm:$0xff]   ;;  %1078 = vmatprep.mubr.bf16.mxu0 %v2209_v33 }
   0xc   :  { %1860 = vmatpush3.bf16.msra.mxu0 %v2185_v10  ;;  %v2202_v27 = vld [vmem:[%s2926_s1 + $0xb0] sm:$0xff]   ;;  %v2206_v31 = vld [vmem:[%s2926_s1 + $0xb8] sm:$0xff]   ;;  %v2213_v36 = vld [vmem:[%s2926_s1 + $0x140] sm:$0xff]  }
   0xd   :  { %1924 = vmatpush3.bf16.msra.mxu1 %v2186_v11  ;;  %1861 = vmatprep.subr.bf16.mxu0 %v2187_v12  ;;  %v2212_v35 = vld [vmem:[%s2927_s0 + $0xc] ss:$36 sps:$4 sm:$0xff]   ;;  %v2214_v37 = vld [vmem:[%s2926_s1 + $0x1c0] sm:$0xff]   ;;  %v2219_v41 = vld [vmem:[%s2927_s0 + $0x54] ss:$36 sps:$4 sm:$0xff]  }
   0xe   :  { %1925 = vmatprep.subr.bf16.mxu1 %v2188_v13  ;;  %1175 = vmatprep.mubr.bf16.mxu1 %v2212_v35  ;;  %v2215_v38 = vld [vmem:[%s2926_s1 + $0x100] sm:$0xff]   ;;  %v2217_v40 = vld [vmem:[%s2927_s0 + $0x4c] ss:$36 sps:$4 sm:$0xff]   ;;  %v2227_v48 = vld [vmem:[%s2927_s0 + $0x94] ss:$36 sps:$4 sm:$0xff]  }
   0xf   :  { %v2216_v39 = vld [vmem:[%s2926_s1 + $0x180] sm:$0xff]   ;;  %v2221_v42 = vld [vmem:[%s2927_s0 + $0x48] ss:$36 sps:$4 sm:$0xff]   ;;  %v2222_v43 = vld [vmem:[%s2927_s0 + $0x50] ss:$36 sps:$4 sm:$0xff]  }
  0x10   :  { %1862 = vmatpush3.bf16.msra.mxu0 %v2189_v14  ;;  %v2223_v44 = vld [vmem:[%s2926_s1 + $0x148] sm:$0xff]   ;;  %v2229_v49 = vld [vmem:[%s2927_s0 + $0x9c] ss:$36 sps:$4 sm:$0xff]   ;;  %v2231_v50 = vld [vmem:[%s2927_s0 + $0x90] ss:$36 sps:$4 sm:$0xff]  }
  0x11   :  { %1926 = vmatpush3.bf16.msra.mxu1 %v2190_v15  ;;  %1863 = vmatprep.subr.bf16.mxu0 %v2191_v16  ;;  %v2224_v45 = vld [vmem:[%s2926_s1 + $0x1c8] sm:$0xff]   ;;  %v2232_v51 = vld [vmem:[%s2927_s0 + $0x98] ss:$36 sps:$4 sm:$0xff]   ;;  %v2233_v52 = vld [vmem:[%s2926_s1 + $0x150] sm:$0xff]  }
  0x12   :  { %1927 = vmatprep.subr.bf16.mxu1 %v2192_v17  ;;  %v2225_v46 = vld [vmem:[%s2926_s1 + $0x108] sm:$0xff]   ;;  %v2234_v53 = vld [vmem:[%s2926_s1 + $0x1d0] sm:$0xff]   ;;  %v2237_v56 = vld [vmem:[%s2927_s0 + $0xdc] ss:$36 sps:$4 sm:$0xff]  }
  0x13   :  { %v2226_v47 = vld [vmem:[%s2926_s1 + $0x188] sm:$0xff]   ;;  %v2235_v54 = vld [vmem:[%s2926_s1 + $0x110] sm:$0xff]   ;;  %v2241_v58 = vld [vmem:[%s2927_s0 + $0xd8] ss:$36 sps:$4 sm:$0xff]  }
  0x14   :  { %1864 = vmatpush3.bf16.msra.mxu0 %v2193_v18  ;;  %v2236_v55 = vld [vmem:[%s2926_s1 + $0x190] sm:$0xff]   ;;  %v2239_v57 = vld [vmem:[%s2927_s0 + $0xe4] ss:$36 sps:$4 sm:$0xff]   ;;  %v2243_v60 = vld [vmem:[%s2926_s1 + $0x158] sm:$0xff]  }
  0x15   :  { %1928 = vmatpush3.bf16.msra.mxu1 %v2194_v19  ;;  %1865 = vmatprep.subr.bf16.mxu0 %v2195_v20  ;;  %v2242_v59 = vld [vmem:[%s2927_s0 + $0xe0] ss:$36 sps:$4 sm:$0xff]   ;;  %v2244_v61 = vld [vmem:[%s2926_s1 + $0x1d8] sm:$0xff]   ;;  %v2249_v1 = vld [vmem:[%s2927_s0 + $0x12c] ss:$36 sps:$4 sm:$0xff]  }
  0x16   :  { %1929 = vmatprep.subr.bf16.mxu1 %v2196_v21  ;;  %v2245_v62 = vld [vmem:[%s2926_s1 + $0x118] sm:$0xff]   ;;  %v2247_v0 = vld [vmem:[%s2927_s0 + $0x124] ss:$36 sps:$4 sm:$0xff]   ;;  %v2257_v8 = vld [vmem:[%s2927_s0 + $0x16c] ss:$36 sps:$4 sm:$0xff]  }
  0x17   :  { %v2246_v63 = vld [vmem:[%s2926_s1 + $0x198] sm:$0xff]   ;;  %v2251_v2 = vld [vmem:[%s2927_s0 + $0x120] ss:$36 sps:$4 sm:$0xff]   ;;  %v2252_v4 = vld [vmem:[%s2927_s0 + $0x128] ss:$36 sps:$4 sm:$0xff]  }
  0x18   :  { %1866 = vmatpush3.bf16.msra.mxu0 %v2197_v22  ;;  %v2253_v3 = vld [vmem:[%s2926_s1 + $0x160] sm:$0xff]   ;;  %v2259_v9 = vld [vmem:[%s2927_s0 + $0x174] ss:$36 sps:$4 sm:$0xff]   ;;  %v2263_v10 = vld [vmem:[%s2926_s1 + $0x168] sm:$0xff]  }
  0x19   :  { %1930 = vmatpush3.bf16.msra.mxu1 %v2198_v23  ;;  %1867 = vmatprep.subr.bf16.mxu0 %v2199_v24  ;;  %v2254_v5 = vld [vmem:[%s2926_s1 + $0x1e0] sm:$0xff]   ;;  %v2264_v11 = vld [vmem:[%s2926_s1 + $0x1e8] sm:$0xff]   ;;  %v2262_v15 = vld [vmem:[%s2927_s0 + $0x170] ss:$36 sps:$4 sm:$0xff]  }
  0x1a   :  { %1931 = vmatprep.subr.bf16.mxu1 %v2200_v25  ;;  %v2255_v6 = vld [vmem:[%s2926_s1 + $0x120] sm:$0xff]   ;;  %v2261_v12 = vld [vmem:[%s2927_s0 + $0x168] ss:$36 sps:$4 sm:$0xff]   ;;  %v2267_v16 = vld [vmem:[%s2927_s0 + $0x1b4] ss:$36 sps:$4 sm:$0xff]  }
  0x1b   :  { %v2256_v7 = vld [vmem:[%s2926_s1 + $0x1a0] sm:$0xff]   ;;  %v2265_v13 = vld [vmem:[%s2926_s1 + $0x128] sm:$0xff]   ;;  %v2273_v18 = vld [vmem:[%s2926_s1 + $0x170] sm:$0xff]  }
  0x1c   :  { %1868 = vmatpush3.bf16.msra.mxu0 %v2201_v26  ;;  %v2266_v14 = vld [vmem:[%s2926_s1 + $0x1a8] sm:$0xff]   ;;  %v2269_v17 = vld [vmem:[%s2927_s0 + $0x1bc] ss:$36 sps:$4 sm:$0xff]   ;;  %v2274_v19 = vld [vmem:[%s2926_s1 + $0x1f0] sm:$0xff]  }
  0x1d   :  { %1932 = vmatpush3.bf16.msra.mxu1 %v2202_v27  ;;  %1869 = vmatprep.subr.bf16.mxu0 %v2203_v28  ;;  %v2275_v20 = vld [vmem:[%s2926_s1 + $0x130] sm:$0xff]   ;;  %v2272_v23 = vld [vmem:[%s2927_s0 + $0x1b8] ss:$36 sps:$4 sm:$0xff]   ;;  %v2279_v25 = vld [vmem:[%s2927_s0 + $0x204] ss:$36 sps:$4 sm:$0xff]  }
  0x1e   :  { %1933 = vmatprep.subr.bf16.mxu1 %v2204_v29  ;;  %v2276_v21 = vld [vmem:[%s2926_s1 + $0x1b0] sm:$0xff]   ;;  %v2277_v24 = vld [vmem:[%s2927_s0 + $0x1fc] ss:$36 sps:$4 sm:$0xff]  }
  0x1f   :  { %v2271_v22 = vld [vmem:[%s2927_s0 + $0x1b0] ss:$36 sps:$4 sm:$0xff]   ;;  %v2283_v26 = vld [vmem:[%s2926_s1 + $0x178] sm:$0xff]  }
  0x20   :  { %1870 = vmatpush3.bf16.msra.mxu0 %v2205_v30  ;;  %v2284_v27 = vld [vmem:[%s2926_s1 + $0x1f8] sm:$0xff]   ;;  %v2287_v35 = vld [vmem:[%s2927_s0 + $0x10] ss:$36 sps:$4 sm:$0xff]  }
  0x21   :  { %1934 = vmatpush3.bf16.msra.mxu1 %v2206_v31  ;;  %1983 = vmatprep.subr.bf16.mxu0 %v2213_v36  ;;  %v2285_v28 = vld [vmem:[%s2926_s1 + $0x138] sm:$0xff]   ;;  %v2282_v31 = vld [vmem:[%s2927_s0 + $0x200] ss:$36 sps:$4 sm:$0xff]  }
  0x22   :  { %2047 = vmatprep.subr.bf16.mxu1 %v2214_v37  ;;  %v2286_v29 = vld [vmem:[%s2926_s1 + $0x1b8] sm:$0xff]  }
  0x23   :  { %1079 = vmatmul.mubr.bf16.vlgmr.msra.gmra.mrb[0].mxu0 %v2207_v32  ;;  %v2281_v30 = vld [vmem:[%s2927_s0 + $0x1f8] ss:$36 sps:$4 sm:$0xff]   ;;  %v2293_v32 = vld [vmem:[%s2926_s1 + $0x200] sm:$0xff]  }
  0x24   :  { %1176 = vmatmul.mubr.bf16.vlgmr.msra.gmra.mrb[0].mxu1 %v2210_v34  ;;  %1984 = vmatpush3.bf16.msra.mxu0 %v2215_v38  ;;  %v2289_v33 = vld [vmem:[%s2927_s0 + $0x14] ss:$36 sps:$4 sm:$0xff]   ;;  %v2292_v34 = vld [vmem:[%s2927_s0 + $0x1c] ss:$36 sps:$4 sm:$0xff]   ;;  %v2296_v38 = vld [vmem:[%s2927_s0 + $0x64] ss:$36 sps:$4 sm:$0xff]  }
  0x25   :  { %2048 = vmatpush3.bf16.msra.mxu1 %v2216_v39  ;;  %1086 = vmatprep.mubr.bf16.mxu0 %v2217_v40  ;;  %v2290_v36 = vld [vmem:[%s2927_s0 + $0x18] ss:$36 sps:$4 sm:$0xff]   ;;  %v2300_v39 = vld [vmem:[%s2926_s1 + $0x208] sm:$0xff]   ;;  %v2307_v40 = vld [vmem:[%s2926_s1 + $0x210] sm:$0xff]  }
  0x26   :  { %1183 = vmatprep.mubr.bf16.mxu1 %v2219_v41  ;;  %1985 = vmatprep.subr.bf16.mxu0 %v2223_v44  ;;  %v2294_v37 = vld [vmem:[%s2927_s0 + $0x5c] ss:$36 sps:$4 sm:$0xff]   ;;  %v2303_v44 = vld [vmem:[%s2927_s0 + $0xac] ss:$36 sps:$4 sm:$0xff]  }
  0x27   :  { %2049 = vmatprep.subr.bf16.mxu1 %v2224_v45  ;;  %v2298_v41 = vld [vmem:[%s2927_s0 + $0x58] ss:$36 sps:$4 sm:$0xff]  }
  0x28   :  { %1986 = vmatpush3.bf16.msra.mxu0 %v2225_v46  ;;  %v2314_v45 = vld [vmem:[%s2926_s1 + $0x218] sm:$0xff]   ;;  %v2321_v46 = vld [vmem:[%s2926_s1 + $0x220] sm:$0xff]  }
  0x29   :  { %2050 = vmatpush3.bf16.msra.mxu1 %v2226_v47  ;;  %1987 = vmatprep.subr.bf16.mxu0 %v2233_v52  ;;  %v2305_v47 = vld [vmem:[%s2927_s0 + $0xa0] ss:$36 sps:$4 sm:$0xff]   ;;  %v2312_v52 = vld [vmem:[%s2927_s0 + $0xe8] ss:$36 sps:$4 sm:$0xff]  }
  0x2a   :  { %2051 = vmatprep.subr.bf16.mxu1 %v2234_v53  ;;  %v2335_v53 = vld [vmem:[%s2926_s1 + $0x230] sm:$0xff]  }
  0x2b   :  { %1087 = vmatmul.mubr.bf16.gmra.mrb[4].mxu0 %v2221_v42  ;;  %v2299_v42 = vld [vmem:[%s2927_s0 + $0x60] ss:$36 sps:$4 sm:$0xff]  }
  0x2c   :  { %1184 = vmatmul.mubr.bf16.gmra.mrb[4].mxu1 %v2222_v43  ;;  %1094 = vmatprep.mubr.bf16.mxu0 %v2227_v48  ;;  %v2301_v43 = vld [vmem:[%s2927_s0 + $0xa4] ss:$36 sps:$4 sm:$0xff]  }
  0x2d   :  { %1191 = vmatprep.mubr.bf16.mxu1 %v2229_v49  ;;  %1988 = vmatpush3.bf16.msra.mxu0 %v2235_v54  ;;  %v2306_v48 = vld [vmem:[%s2927_s0 + $0xa8] ss:$36 sps:$4 sm:$0xff]   ;;  %v2313_v54 = vld [vmem:[%s2927_s0 + $0xf0] ss:$36 sps:$4 sm:$0xff]  }
  0x2e   :  { %2052 = vmatpush3.bf16.msra.mxu1 %v2236_v55  ;;  %1989 = vmatprep.subr.bf16.mxu0 %v2243_v60  ;;  %v2308_v49 = vld [vmem:[%s2927_s0 + $0xec] ss:$36 sps:$4 sm:$0xff]   ;;  %v2315_v55 = vld [vmem:[%s2927_s0 + $0x134] ss:$36 sps:$4 sm:$0xff]   ;;  %v2322_v60 = vld [vmem:[%s2927_s0 + $0x17c] ss:$36 sps:$4 sm:$0xff]  }
  0x2f   :  { %2053 = vmatprep.subr.bf16.mxu1 %v2244_v61  ;;  %v2324_v61 = vld [vmem:[%s2927_s0 + $0x184] ss:$36 sps:$4 sm:$0xff]  }
  0x31   :  { %1990 = vmatpush3.bf16.msra.mxu0 %v2245_v62  ;;  %v2326_v62 = vld [vmem:[%s2927_s0 + $0x178] ss:$36 sps:$4 sm:$0xff]  }
  0x32   :  { %2054 = vmatpush3.bf16.msra.mxu1 %v2246_v63  ;;  %1991 = vmatprep.subr.bf16.mxu0 %v2253_v3  ;;  %v2327_v63 = vld [vmem:[%s2927_s0 + $0x180] ss:$36 sps:$4 sm:$0xff]   ;;  %v2334_v3 = vld [vmem:[%s2927_s0 + $0x1c8] ss:$36 sps:$4 sm:$0xff]  }
  0x33   :  { %1095 = vmatmul.mubr.bf16.gmra.mrb[8].mxu0 %v2231_v50  ;;  %2055 = vmatprep.subr.bf16.mxu1 %v2254_v5  ;;  %v2310_v50 = vld [vmem:[%s2927_s0 + $0xf4] ss:$36 sps:$4 sm:$0xff]  }
  0x34   :  { %1192 = vmatmul.mubr.bf16.gmra.mrb[8].mxu1 %v2232_v51  ;;  %1102 = vmatprep.mubr.bf16.mxu0 %v2237_v56  ;;  %v2328_v51 = vld [vmem:[%s2926_s1 + $0x228] sm:$0xff]   ;;  %v2317_v56 = vld [vmem:[%s2927_s0 + $0x13c] ss:$36 sps:$4 sm:$0xff]   ;;  %v2338_v5 = vld [vmem:[%s2927_s0 + $0x214] ss:$36 sps:$4 sm:$0xff]  }
  0x35   :  { %1199 = vmatprep.mubr.bf16.mxu1 %v2239_v57  ;;  %1992 = vmatpush3.bf16.msra.mxu0 %v2255_v6  ;;  %v2342_v57 = vld [vmem:[%s2926_s1 + $0x238] sm:$0xff]   ;;  %v2340_v6 = vld [vmem:[%s2927_s0 + $0x208] ss:$36 sps:$4 sm:$0xff]  }
  0x36   :  { %2056 = vmatpush3.bf16.msra.mxu1 %v2256_v7  ;;  %1993 = vmatprep.subr.bf16.mxu0 %v2263_v10  ;;  %v2341_v7 = vld [vmem:[%s2927_s0 + $0x210] ss:$36 sps:$4 sm:$0xff]   ;;  %v2345_v10 = vld [vmem:[%s2927_s0 + $0x68] ss:$36 sps:$4 sm:$0xff]  }
  0x37   :  { %2057 = vmatprep.subr.bf16.mxu1 %v2264_v11  ;;  %v2346_v11 = vld [vmem:[%s2927_s0 + $0x188] ss:$36 sps:$4 sm:$0xff]  }
  0x39   :  { %1994 = vmatpush3.bf16.msra.mxu0 %v2265_v13  ;;  %v2348_v13 = vld [vmem:[%s2927_s0 + $0x1d0] ss:$36 sps:$4 sm:$0xff]  }
  0x3a   :  { %2058 = vmatpush3.bf16.msra.mxu1 %v2266_v14  ;;  %1995 = vmatprep.subr.bf16.mxu0 %v2273_v18  ;;  %v2349_v14 = vld [vmem:[%s2927_s0 + $0xf8] ss:$36 sps:$4 sm:$0xff]   ;;  %v2806_v18 = vld [vmem:[%s2928_s2] ss:$0 sm:$0xff] }
  0x3b   :  { %1103 = vmatmul.mubr.bf16.gmra.mrb[12].mxu0 %v2241_v58  ;;  %2059 = vmatprep.subr.bf16.mxu1 %v2274_v19  ;;  %v2319_v58 = vld [vmem:[%s2927_s0 + $0x130] ss:$36 sps:$4 sm:$0xff]  }
  0x3c   :  { %1200 = vmatmul.mubr.bf16.gmra.mrb[12].mxu1 %v2242_v59  ;;  %1110 = vmatprep.mubr.bf16.mxu0 %v2247_v0  ;;  %v2320_v59 = vld [vmem:[%s2927_s0 + $0x138] ss:$36 sps:$4 sm:$0xff]   ;;  %v2329_v0 = vld [vmem:[%s2927_s0 + $0x1c4] ss:$36 sps:$4 sm:$0xff]  }
  0x3d   :  { %1207 = vmatprep.mubr.bf16.mxu1 %v2249_v1  ;;  %1996 = vmatpush3.bf16.msra.mxu0 %v2275_v20  ;;  %v2331_v1 = vld [vmem:[%s2927_s0 + $0x1cc] ss:$36 sps:$4 sm:$0xff]  }
  0x3e   :  { %2060 = vmatpush3.bf16.msra.mxu1 %v2276_v21  ;;  %1997 = vmatprep.subr.bf16.mxu0 %v2283_v26 }
  0x3f   :  { %2061 = vmatprep.subr.bf16.mxu1 %v2284_v27 }
  0x41   :  { %1998 = vmatpush3.bf16.msra.mxu0 %v2285_v28 }
  0x42   :  { %2062 = vmatpush3.bf16.msra.mxu1 %v2286_v29  ;;  %2127 = vmatprep.subr.bf16.mxu0 %v2293_v32 }
  0x43   :  { %1111 = vmatmul.mubr.bf16.gmra.mrb[16].mxu0 %v2251_v2  ;;  %2159 = vmatprep.subr.bf16.mxu1 %v2293_v32  ;;  %v2333_v2 = vld [vmem:[%s2927_s0 + $0x1c0] ss:$36 sps:$4 sm:$0xff]  }
  0x44   :  { %1208 = vmatmul.mubr.bf16.gmra.mrb[16].mxu1 %v2252_v4  ;;  %1118 = vmatprep.mubr.bf16.mxu0 %v2257_v8  ;;  %v2336_v4 = vld [vmem:[%s2927_s0 + $0x20c] ss:$36 sps:$4 sm:$0xff]   ;;  %v2343_v8 = vld [vmem:[%s2927_s0 + $0x20] ss:$36 sps:$4 sm:$0xff]  }
  0x45   :  { %1215 = vmatprep.mubr.bf16.mxu1 %v2259_v9  ;;  %v2344_v9 = vld [vmem:[%s2927_s0 + $0x140] ss:$36 sps:$4 sm:$0xff]  }
  0x4b   :  { %1119 = vmatmul.mubr.bf16.gmra.mrb[20].mxu0 %v2261_v12  ;;  %v2347_v12 = vld [vmem:[%s2927_s0 + $0xb0] ss:$36 sps:$4 sm:$0xff]  }
  0x4c   :  { %1216 = vmatmul.mubr.bf16.gmra.mrb[20].mxu1 %v2262_v15  ;;  %1126 = vmatprep.mubr.bf16.mxu0 %v2267_v16  ;;  %v2350_v15 = vld [vmem:[%s2927_s0 + $0x218] ss:$36 sps:$4 sm:$0xff]  }
  0x4d   :  { %1223 = vmatprep.mubr.bf16.mxu1 %v2269_v17 }
  0x53   :  { %1127 = vmatmul.mubr.bf16.gmra.mrb[24].mxu0 %v2271_v22 }
  0x54   :  { %1224 = vmatmul.mubr.bf16.gmra.mrb[24].mxu1 %v2272_v23  ;;  %1134 = vmatprep.mubr.bf16.mxu0 %v2277_v24 }
  0x55   :  { %1231 = vmatprep.mubr.bf16.mxu1 %v2279_v25 }
  0x5b   :  { %1135 = vmatmul.mubr.bf16.gmra.mrb[28].mxu0 %v2281_v30 }
  0x5c   :  { %1232 = vmatmul.mubr.bf16.gmra.mrb[28].mxu1 %v2282_v31  ;;  %1272 = vmatprep.mubr.bf16.mxu0 %v2289_v33 }
  0x5d   :  { %1369 = vmatprep.mubr.bf16.mxu1 %v2292_v34 }
  0x63   :  { %1273 = vmatmul.mubr.bf16.vlgmr.msra.gmra.mrb[32].mxu0 %v2287_v35 }
  0x64   :  { %1370 = vmatmul.mubr.bf16.vlgmr.msra.gmra.mrb[32].mxu1 %v2290_v36  ;;  %2128 = vmatpush3.bf16.msra.mxu0 %v2293_v32 }
  0x65   :  { %2167 = vmatpush3.bf16.msra.mxu1 %v2293_v32  ;;  %1280 = vmatprep.mubr.bf16.mxu0 %v2294_v37 }
  0x66   :  { %1377 = vmatprep.mubr.bf16.mxu1 %v2296_v38  ;;  %2129 = vmatprep.subr.bf16.mxu0 %v2300_v39 }
  0x67   :  { %2160 = vmatprep.subr.bf16.mxu1 %v2300_v39 }
  0x68   :  { %2130 = vmatpush3.bf16.msra.mxu0 %v2300_v39 }
  0x69   :  { %2168 = vmatpush3.bf16.msra.mxu1 %v2300_v39  ;;  %2131 = vmatprep.subr.bf16.mxu0 %v2307_v40 }
  0x6a   :  { %2161 = vmatprep.subr.bf16.mxu1 %v2307_v40 }
  0x6b   :  { %1281 = vmatmul.mubr.bf16.gmra.mrb[36].mxu0 %v2298_v41 }
  0x6c   :  { %1378 = vmatmul.mubr.bf16.gmra.mrb[36].mxu1 %v2299_v42  ;;  %1288 = vmatprep.mubr.bf16.mxu0 %v2301_v43 }
  0x6d   :  { %1385 = vmatprep.mubr.bf16.mxu1 %v2303_v44  ;;  %2132 = vmatpush3.bf16.msra.mxu0 %v2307_v40 }
  0x6e   :  { %2169 = vmatpush3.bf16.msra.mxu1 %v2307_v40  ;;  %2133 = vmatprep.subr.bf16.mxu0 %v2314_v45 }
  0x6f   :  { %2162 = vmatprep.subr.bf16.mxu1 %v2314_v45 }
  0x71   :  { %2134 = vmatpush3.bf16.msra.mxu0 %v2314_v45 }
  0x72   :  { %2170 = vmatpush3.bf16.msra.mxu1 %v2314_v45  ;;  %2135 = vmatprep.subr.bf16.mxu0 %v2321_v46 }
  0x73   :  { %1289 = vmatmul.mubr.bf16.gmra.mrb[40].mxu0 %v2305_v47  ;;  %2163 = vmatprep.subr.bf16.mxu1 %v2321_v46 }
  0x74   :  { %1386 = vmatmul.mubr.bf16.gmra.mrb[40].mxu1 %v2306_v48  ;;  %1296 = vmatprep.mubr.bf16.mxu0 %v2308_v49 }
  0x75   :  { %1393 = vmatprep.mubr.bf16.mxu1 %v2310_v50  ;;  %2136 = vmatpush3.bf16.msra.mxu0 %v2321_v46 }
  0x76   :  { %2171 = vmatpush3.bf16.msra.mxu1 %v2321_v46  ;;  %2137 = vmatprep.subr.bf16.mxu0 %v2328_v51 }
  0x77   :  { %2164 = vmatprep.subr.bf16.mxu1 %v2328_v51 }
  0x79   :  { %2138 = vmatpush3.bf16.msra.mxu0 %v2328_v51 }
  0x7a   :  { %2172 = vmatpush3.bf16.msra.mxu1 %v2328_v51  ;;  %2139 = vmatprep.subr.bf16.mxu0 %v2335_v53 }
  0x7b   :  { %1297 = vmatmul.mubr.bf16.gmra.mrb[44].mxu0 %v2312_v52  ;;  %2165 = vmatprep.subr.bf16.mxu1 %v2335_v53 }
  0x7c   :  { %1394 = vmatmul.mubr.bf16.gmra.mrb[44].mxu1 %v2313_v54  ;;  %1304 = vmatprep.mubr.bf16.mxu0 %v2315_v55 }
  0x7d   :  { %1401 = vmatprep.mubr.bf16.mxu1 %v2317_v56  ;;  %2140 = vmatpush3.bf16.msra.mxu0 %v2335_v53 }
  0x7e   :  { %2173 = vmatpush3.bf16.msra.mxu1 %v2335_v53  ;;  %2141 = vmatprep.subr.bf16.mxu0 %v2342_v57 }
  0x7f   :  { %2166 = vmatprep.subr.bf16.mxu1 %v2342_v57 }
  0x81   :  { %2142 = vmatpush3.bf16.msra.mxu0 %v2342_v57 }
  0x82   :  { %2174 = vmatpush3.bf16.msra.mxu1 %v2342_v57 }
  0x83   :  { %1305 = vmatmul.mubr.bf16.gmra.mrb[48].mxu0 %v2319_v58 }
  0x84   :  { %1402 = vmatmul.mubr.bf16.gmra.mrb[48].mxu1 %v2320_v59  ;;  %1312 = vmatprep.mubr.bf16.mxu0 %v2322_v60 }
  0x85   :  { %1409 = vmatprep.mubr.bf16.mxu1 %v2324_v61 }
  0x8b   :  { %1313 = vmatmul.mubr.bf16.gmra.mrb[52].mxu0 %v2326_v62 }
  0x8c   :  { %1410 = vmatmul.mubr.bf16.gmra.mrb[52].mxu1 %v2327_v63  ;;  %1320 = vmatprep.mubr.bf16.mxu0 %v2329_v0 }
  0x8d   :  { %1417 = vmatprep.mubr.bf16.mxu1 %v2331_v1 }
  0x93   :  { %1321 = vmatmul.mubr.bf16.gmra.mrb[56].mxu0 %v2333_v2 }
  0x94   :  { %1418 = vmatmul.mubr.bf16.gmra.mrb[56].mxu1 %v2334_v3  ;;  %1328 = vmatprep.mubr.bf16.mxu0 %v2336_v4 }
  0x95   :  { %1425 = vmatprep.mubr.bf16.mxu1 %v2338_v5 }
  0x9b   :  { %1329 = vmatmul.mubr.bf16.gmra.mrb[60].mxu0 %v2340_v6 }
  0x9c   :  { %1426 = vmatmul.mubr.bf16.gmra.mrb[60].mxu1 %v2341_v7  ;;  %2143 = vmatprep.mubr.bf16.mxu0 %v2343_v8 }
  0x9d   :  { %2151 = vmatprep.mubr.bf16.mxu1 %v2344_v9 }
  0xa3   :  { %2144 = vmatmul.mubr.bf16.vlgmr.msra.gmra.mrb[64].mxu0 %v2345_v10 }
  0xa4   :  { %2152 = vmatmul.mubr.bf16.vlgmr.msra.gmra.mrb[64].mxu1 %v2346_v11  ;;  %2147 = vmatprep.mubr.bf16.mxu0 %v2347_v12 }
  0xa5   :  { %2155 = vmatprep.mubr.bf16.mxu1 %v2348_v13 }
  0xab   :  { %2148 = vmatmul.mubr.bf16.gmra.mrb[68].mxu0 %v2349_v14 }
  0xac   :  { %2156 = vmatmul.mubr.bf16.gmra.mrb[68].mxu1 %v2350_v15 }
  0xf6   :  { %v1871_v16 = vpop.f32.mrb[0].mxu0 }
  0xf7   :  { %v1935_v17 = vpop.f32.mrb[0].mxu1  ;;  %v1872_v19 = vpop.f32.mrb[1].mxu0 }
  0xf8   :  { %v1873_v20 = vadd.f32 %v1872_v19, %v1871_v16  ;;  %v1936_v21 = vpop.f32.mrb[1].mxu1  ;;  %v1874_v22 = vpop.f32.mrb[2].mxu0 }
  0xf9   :  { %v1937_v23 = vadd.f32 %v1936_v21, %v1935_v17  ;;  %v1938_v24 = vpop.f32.mrb[2].mxu1  ;;  %v1875_v25 = vpop.f32.mrb[3].mxu0 }
  0xfa   :  { %v1081_v26 = vadd.f32 %v1873_v20, %v2806_v18  ;;  %v1876_v27 = vadd.f32 %v1875_v25, %v1874_v22  ;;  %v1939_v28 = vpop.f32.mrb[3].mxu1 }
  0xfb   :  { %v1940_v29 = vadd.f32 %v1939_v28, %v1938_v24 }
  0xfc   :  { %v2809_v30 = vadd.f32 %v1937_v23, %v1081_v26  ;;  %v1084_v31 = vadd.f32 %v1876_v27, %v2806_v18 }
  0xfe   :  { %v2812_v32 = vadd.f32 %v1940_v29, %v1084_v31  ;;  %v1877_v33 = vpop.f32.mrb[4].mxu0 }
  0xff   :  { %v1941_v34 = vpop.f32.mrb[4].mxu1  ;;  %v1878_v35 = vpop.f32.mrb[5].mxu0 }
 0x100   :  { %v1879_v36 = vadd.f32 %v1878_v35, %v1877_v33  ;;  %v1942_v37 = vpop.f32.mrb[5].mxu1  ;;  %v1880_v38 = vpop.f32.mrb[6].mxu0 }
 0x101   :  { %v1943_v39 = vadd.f32 %v1942_v37, %v1941_v34  ;;  %v1944_v40 = vpop.f32.mrb[6].mxu1  ;;  %v1881_v41 = vpop.f32.mrb[7].mxu0 }
 0x102   :  { %v1089_v42 = vadd.f32 %v1879_v36, %v2806_v18  ;;  %v1882_v43 = vadd.f32 %v1881_v41, %v1880_v38  ;;  %v1945_v44 = vpop.f32.mrb[7].mxu1 }
 0x103   :  { %v1946_v45 = vadd.f32 %v1945_v44, %v1944_v40 }
 0x104   :  { %v2815_v46 = vadd.f32 %v1943_v39, %v1089_v42  ;;  %v1092_v47 = vadd.f32 %v1882_v43, %v2806_v18 }
 0x106   :  { %v2818_v48 = vadd.f32 %v1946_v45, %v1092_v47  ;;  %v1883_v49 = vpop.f32.mrb[8].mxu0 }
 0x107   :  { %v1947_v50 = vpop.f32.mrb[8].mxu1  ;;  %v1884_v51 = vpop.f32.mrb[9].mxu0 }
 0x108   :  { %v1885_v52 = vadd.f32 %v1884_v51, %v1883_v49  ;;  %v1948_v53 = vpop.f32.mrb[9].mxu1  ;;  %v1886_v54 = vpop.f32.mrb[10].mxu0 }
 0x109   :  { %v1949_v55 = vadd.f32 %v1948_v53, %v1947_v50  ;;  %v1950_v56 = vpop.f32.mrb[10].mxu1  ;;  %v1887_v57 = vpop.f32.mrb[11].mxu0 }
 0x10a   :  { %v1097_v58 = vadd.f32 %v1885_v52, %v2806_v18  ;;  %v1888_v59 = vadd.f32 %v1887_v57, %v1886_v54  ;;  %v1951_v60 = vpop.f32.mrb[11].mxu1 }
 0x10b   :  { %v1952_v61 = vadd.f32 %v1951_v60, %v1950_v56 }
 0x10c   :  { %v2821_v62 = vadd.f32 %v1949_v55, %v1097_v58  ;;  %v1100_v63 = vadd.f32 %v1888_v59, %v2806_v18 }
 0x10e   :  { %v2824_v0 = vadd.f32 %v1952_v61, %v1100_v63  ;;  %v1889_v1 = vpop.f32.mrb[12].mxu0 }
 0x10f   :  { %v1953_v2 = vpop.f32.mrb[12].mxu1  ;;  %v1890_v3 = vpop.f32.mrb[13].mxu0 }
 0x110   :  { %v1891_v4 = vadd.f32 %v1890_v3, %v1889_v1  ;;  %v1954_v5 = vpop.f32.mrb[13].mxu1  ;;  %v1892_v6 = vpop.f32.mrb[14].mxu0 }
 0x111   :  { %v1955_v7 = vadd.f32 %v1954_v5, %v1953_v2  ;;  %v1956_v8 = vpop.f32.mrb[14].mxu1  ;;  %v1893_v9 = vpop.f32.mrb[15].mxu0 }
 0x112   :  { %v1105_v10 = vadd.f32 %v1891_v4, %v2806_v18  ;;  %v1894_v11 = vadd.f32 %v1893_v9, %v1892_v6  ;;  %v1957_v12 = vpop.f32.mrb[15].mxu1 }
 0x113   :  { %v1958_v13 = vadd.f32 %v1957_v12, %v1956_v8 }
 0x114   :  { %v2827_v14 = vadd.f32 %v1955_v7, %v1105_v10  ;;  %v1108_v15 = vadd.f32 %v1894_v11, %v2806_v18 }
 0x116   :  { %v2830_v16 = vadd.f32 %v1958_v13, %v1108_v15  ;;  %v1895_v17 = vpop.f32.mrb[16].mxu0 }
 0x117   :  { %v1959_v19 = vpop.f32.mrb[16].mxu1  ;;  %v1896_v20 = vpop.f32.mrb[17].mxu0 }
 0x118   :  { %v1897_v21 = vadd.f32 %v1896_v20, %v1895_v17  ;;  %v1960_v22 = vpop.f32.mrb[17].mxu1  ;;  %v1898_v23 = vpop.f32.mrb[18].mxu0 }
 0x119   :  { %v1961_v24 = vadd.f32 %v1960_v22, %v1959_v19  ;;  %v1962_v25 = vpop.f32.mrb[18].mxu1  ;;  %v1899_v26 = vpop.f32.mrb[19].mxu0 }
 0x11a   :  { %v1113_v27 = vadd.f32 %v1897_v21, %v2806_v18  ;;  %v1900_v28 = vadd.f32 %v1899_v26, %v1898_v23  ;;  %v1963_v29 = vpop.f32.mrb[19].mxu1 }
 0x11b   :  { %v1964_v31 = vadd.f32 %v1963_v29, %v1962_v25 }
 0x11c   :  { %v2833_v33 = vadd.f32 %v1961_v24, %v1113_v27  ;;  %v1116_v34 = vadd.f32 %v1900_v28, %v2806_v18 }
 0x11e   :  { %v2836_v35 = vadd.f32 %v1964_v31, %v1116_v34  ;;  %v1901_v36 = vpop.f32.mrb[20].mxu0 }
 0x11f   :  { %v1965_v37 = vpop.f32.mrb[20].mxu1  ;;  %v1902_v38 = vpop.f32.mrb[21].mxu0 }
 0x120   :  { %v1903_v39 = vadd.f32 %v1902_v38, %v1901_v36  ;;  %v1966_v40 = vpop.f32.mrb[21].mxu1  ;;  %v1904_v41 = vpop.f32.mrb[22].mxu0 }
 0x121   :  { %v1967_v42 = vadd.f32 %v1966_v40, %v1965_v37  ;;  %v1968_v43 = vpop.f32.mrb[22].mxu1  ;;  %v1905_v44 = vpop.f32.mrb[23].mxu0 }
 0x122   :  { %v1121_v45 = vadd.f32 %v1903_v39, %v2806_v18  ;;  %v1906_v47 = vadd.f32 %v1905_v44, %v1904_v41  ;;  %v1969_v49 = vpop.f32.mrb[23].mxu1 }
 0x123   :  { %v1970_v50 = vadd.f32 %v1969_v49, %v1968_v43 }
 0x124   :  { %v2839_v51 = vadd.f32 %v1967_v42, %v1121_v45  ;;  %v1124_v52 = vadd.f32 %v1906_v47, %v2806_v18 }
 0x126   :  { %v2842_v53 = vadd.f32 %v1970_v50, %v1124_v52  ;;  %v1907_v54 = vpop.f32.mrb[24].mxu0 }
 0x127   :  { %v1971_v55 = vpop.f32.mrb[24].mxu1  ;;  %v1908_v56 = vpop.f32.mrb[25].mxu0 }
 0x128   :  { %v1909_v57 = vadd.f32 %v1908_v56, %v1907_v54  ;;  %v1972_v58 = vpop.f32.mrb[25].mxu1  ;;  %v1910_v59 = vpop.f32.mrb[26].mxu0 }
 0x129   :  { %v1973_v60 = vadd.f32 %v1972_v58, %v1971_v55  ;;  %v1974_v61 = vpop.f32.mrb[26].mxu1  ;;  %v1911_v63 = vpop.f32.mrb[27].mxu0 }
 0x12a   :  { %v1129_v1 = vadd.f32 %v1909_v57, %v2806_v18  ;;  %v1912_v2 = vadd.f32 %v1911_v63, %v1910_v59  ;;  %v1975_v3 = vpop.f32.mrb[27].mxu1 }
 0x12b   :  { %v1976_v4 = vadd.f32 %v1975_v3, %v1974_v61 }
 0x12c   :  { %v2845_v5 = vadd.f32 %v1973_v60, %v1129_v1  ;;  %v1132_v6 = vadd.f32 %v1912_v2, %v2806_v18 }
 0x12e   :  { %v2848_v7 = vadd.f32 %v1976_v4, %v1132_v6  ;;  %v1913_v8 = vpop.f32.mrb[28].mxu0 }
 0x12f   :  { %v1977_v9 = vpop.f32.mrb[28].mxu1  ;;  %v1914_v10 = vpop.f32.mrb[29].mxu0 }
 0x130   :  { %v1915_v11 = vadd.f32 %v1914_v10, %v1913_v8  ;;  %v1978_v12 = vpop.f32.mrb[29].mxu1  ;;  %v1916_v13 = vpop.f32.mrb[30].mxu0 }
 0x131   :  { %v1979_v15 = vadd.f32 %v1978_v12, %v1977_v9  ;;  %v1980_v17 = vpop.f32.mrb[30].mxu1  ;;  %v1917_v19 = vpop.f32.mrb[31].mxu0 }
 0x132   :  { %v1137_v20 = vadd.f32 %v1915_v11, %v2806_v18  ;;  %v1918_v21 = vadd.f32 %v1917_v19, %v1916_v13  ;;  %v1981_v22 = vpop.f32.mrb[31].mxu1 }
 0x133   :  { %v1982_v23 = vadd.f32 %v1981_v22, %v1980_v17 }
 0x134   :  { %v2851_v24 = vadd.f32 %v1979_v15, %v1137_v20  ;;  %v1140_v25 = vadd.f32 %v1918_v21, %v2806_v18 }
 0x136   :  { %v2854_v26 = vadd.f32 %v1982_v23, %v1140_v25  ;;  %v1999_v27 = vpop.f32.mrb[32].mxu0 }
 0x137   :  { %v2063_v28 = vpop.f32.mrb[32].mxu1  ;;  %v2000_v29 = vpop.f32.mrb[33].mxu0 }
 0x138   :  { %v2001_v31 = vadd.f32 %v2000_v29, %v1999_v27  ;;  %v2064_v34 = vpop.f32.mrb[33].mxu1  ;;  %v2002_v36 = vpop.f32.mrb[34].mxu0 }
 0x139   :  { %v2065_v37 = vadd.f32 %v2064_v34, %v2063_v28  ;;  %v2066_v38 = vpop.f32.mrb[34].mxu1  ;;  %v2003_v39 = vpop.f32.mrb[35].mxu0 }
 0x13a   :  { %v1275_v40 = vadd.f32 %v2001_v31, %v2809_v30  ;;  %v2004_v41 = vadd.f32 %v2003_v39, %v2002_v36  ;;  %v2067_v42 = vpop.f32.mrb[35].mxu1 }
 0x13b   :  { %v2068_v43 = vadd.f32 %v2067_v42, %v2066_v38 }
 0x13c   :  { %v1278_v44 = vadd.f32 %v2004_v41, %v2812_v32  ;;  %v2858_v45 = vadd.f32 %v2065_v37, %v1275_v40 }
 0x13e   :  { %v2005_v18 = vpop.f32.mrb[36].mxu0  ;;  %v2860_v47 = vadd.f32 %v2068_v43, %v1278_v44 }
 0x13f   :  { %v2069_v49 = vpop.f32.mrb[36].mxu1  ;;  %v2006_v50 = vpop.f32.mrb[37].mxu0 }
 0x140   :  { %v2007_v52 = vadd.f32 %v2006_v50, %v2005_v18  ;;  %v2070_v54 = vpop.f32.mrb[37].mxu1  ;;  %v2008_v55 = vpop.f32.mrb[38].mxu0 }
 0x141   :  { %v2071_v56 = vadd.f32 %v2070_v54, %v2069_v49  ;;  %v2072_v57 = vpop.f32.mrb[38].mxu1  ;;  %v2009_v58 = vpop.f32.mrb[39].mxu0 }
 0x142   :  { %v1283_v30 = vadd.f32 %v2007_v52, %v2815_v46  ;;  %v2010_v59 = vadd.f32 %v2009_v58, %v2008_v55  ;;  %v2073_v60 = vpop.f32.mrb[39].mxu1 }
 0x143   :  { %v2074_v61 = vadd.f32 %v2073_v60, %v2072_v57 }
 0x144   :  { %v1286_v32 = vadd.f32 %v2010_v59, %v2818_v48  ;;  %v2864_v63 = vadd.f32 %v2071_v56, %v1283_v30 }
 0x146   :  { %v2011_v1 = vpop.f32.mrb[40].mxu0  ;;  %v2866_v2 = vadd.f32 %v2074_v61, %v1286_v32 }
 0x147   :  { %v2075_v3 = vpop.f32.mrb[40].mxu1  ;;  %v2012_v4 = vpop.f32.mrb[41].mxu0 }
 0x148   :  { %v2013_v6 = vadd.f32 %v2012_v4, %v2011_v1  ;;  %v2076_v8 = vpop.f32.mrb[41].mxu1  ;;  %v2014_v9 = vpop.f32.mrb[42].mxu0 }
 0x149   :  { %v2077_v10 = vadd.f32 %v2076_v8, %v2075_v3  ;;  %v2078_v11 = vpop.f32.mrb[42].mxu1  ;;  %v2015_v12 = vpop.f32.mrb[43].mxu0 }
 0x14a   :  { %v1291_v46 = vadd.f32 %v2013_v6, %v2821_v62  ;;  %v2016_v13 = vadd.f32 %v2015_v12, %v2014_v9  ;;  %v2079_v15 = vpop.f32.mrb[43].mxu1 }
 0x14b   :  { %v2080_v17 = vadd.f32 %v2079_v15, %v2078_v11 }
 0x14c   :  { %v1294_v48 = vadd.f32 %v2016_v13, %v2824_v0  ;;  %v2870_v19 = vadd.f32 %v2077_v10, %v1291_v46 }
 0x14e   :  { %v2017_v20 = vpop.f32.mrb[44].mxu0  ;;  %v2872_v21 = vadd.f32 %v2080_v17, %v1294_v48 }
 0x14f   :  { %v2081_v22 = vpop.f32.mrb[44].mxu1  ;;  %v2018_v23 = vpop.f32.mrb[45].mxu0 }
 0x150   :  { %v2019_v25 = vadd.f32 %v2018_v23, %v2017_v20  ;;  %v2082_v27 = vpop.f32.mrb[45].mxu1  ;;  %v2020_v28 = vpop.f32.mrb[46].mxu0 }
 0x151   :  { %v2083_v29 = vadd.f32 %v2082_v27, %v2081_v22  ;;  %v2084_v31 = vpop.f32.mrb[46].mxu1  ;;  %v2021_v34 = vpop.f32.mrb[47].mxu0 }
 0x152   :  { %v1299_v62 = vadd.f32 %v2019_v25, %v2827_v14  ;;  %v2022_v36 = vadd.f32 %v2021_v34, %v2020_v28  ;;  %v2085_v37 = vpop.f32.mrb[47].mxu1 }
 0x153   :  { %v2086_v38 = vadd.f32 %v2085_v37, %v2084_v31 }
 0x154   :  { %v1302_v0 = vadd.f32 %v2022_v36, %v2830_v16  ;;  %v2876_v39 = vadd.f32 %v2083_v29, %v1299_v62 }
 0x156   :  { %v2023_v40 = vpop.f32.mrb[48].mxu0  ;;  %v2878_v41 = vadd.f32 %v2086_v38, %v1302_v0 }
 0x157   :  { %v2087_v42 = vpop.f32.mrb[48].mxu1  ;;  %v2024_v43 = vpop.f32.mrb[49].mxu0 }
 0x158   :  { %v2025_v44 = vadd.f32 %v2024_v43, %v2023_v40  ;;  %v2088_v18 = vpop.f32.mrb[49].mxu1  ;;  %v2026_v49 = vpop.f32.mrb[50].mxu0 }
 0x159   :  { %v2089_v50 = vadd.f32 %v2088_v18, %v2087_v42  ;;  %v2090_v52 = vpop.f32.mrb[50].mxu1  ;;  %v2027_v54 = vpop.f32.mrb[51].mxu0 }
 0x15a   :  { %v1307_v14 = vadd.f32 %v2025_v44, %v2833_v33  ;;  %v2028_v55 = vadd.f32 %v2027_v54, %v2026_v49  ;;  %v2091_v56 = vpop.f32.mrb[51].mxu1 }
 0x15b   :  { %v2092_v57 = vadd.f32 %v2091_v56, %v2090_v52 }
 0x15c   :  { %v1310_v16 = vadd.f32 %v2028_v55, %v2836_v35  ;;  %v1404_v58 = vadd.f32 %v2089_v50, %v1307_v14 }
 0x15e   :  { %v2029_v30 = vpop.f32.mrb[52].mxu0  ;;  %v2882_v59 = vadd.f32 %v2092_v57, %v1310_v16 }
 0x15f   :  { %v2093_v60 = vpop.f32.mrb[52].mxu1  ;;  %v2030_v61 = vpop.f32.mrb[53].mxu0 }
 0x160   :  { %v2031_v32 = vadd.f32 %v2030_v61, %v2029_v30  ;;  %v2094_v1 = vpop.f32.mrb[53].mxu1  ;;  %v2032_v3 = vpop.f32.mrb[54].mxu0 }
 0x161   :  { %v2095_v4 = vadd.f32 %v2094_v1, %v2093_v60  ;;  %v2096_v6 = vpop.f32.mrb[54].mxu1  ;;  %v2033_v8 = vpop.f32.mrb[55].mxu0 }
 0x162   :  { %v1315_v9 = vadd.f32 %v2031_v32, %v2839_v51  ;;  %v2034_v33 = vadd.f32 %v2033_v8, %v2032_v3  ;;  %v2097_v10 = vpop.f32.mrb[55].mxu1 }
 0x163   :  { %v2098_v11 = vadd.f32 %v2097_v10, %v2096_v6 }
 0x164   :  { %v1318_v12 = vadd.f32 %v2034_v33, %v2842_v53  ;;  %v1412_v35 = vadd.f32 %v2095_v4, %v1315_v9 }
 0x166   :  { %v2035_v46 = vpop.f32.mrb[56].mxu0  ;;  %v1415_v13 = vadd.f32 %v2098_v11, %v1318_v12 }
 0x167   :  { %v2099_v15 = vpop.f32.mrb[56].mxu1  ;;  %v2036_v17 = vpop.f32.mrb[57].mxu0 }
 0x168   :  { %v2037_v48 = vadd.f32 %v2036_v17, %v2035_v46  ;;  %v2100_v20 = vpop.f32.mrb[57].mxu1  ;;  %v2038_v22 = vpop.f32.mrb[58].mxu0 }
 0x169   :  { %v2101_v23 = vadd.f32 %v2100_v20, %v2099_v15  ;;  %v2102_v25 = vpop.f32.mrb[58].mxu1  ;;  %v2039_v27 = vpop.f32.mrb[59].mxu0 }
 0x16a   :  { %v1323_v28 = vadd.f32 %v2037_v48, %v2845_v5  ;;  %v2040_v29 = vadd.f32 %v2039_v27, %v2038_v22  ;;  %v2103_v51 = vpop.f32.mrb[59].mxu1 }
 0x16b   :  { %v2104_v31 = vadd.f32 %v2103_v51, %v2102_v25 }
 0x16c   :  { %v1326_v34 = vadd.f32 %v2040_v29, %v2848_v7  ;;  %v1420_v62 = vadd.f32 %v2101_v23, %v1323_v28 }
 0x16e   :  { %v2041_v53 = vpop.f32.mrb[60].mxu0  ;;  %v2888_v36 = vadd.f32 %v2104_v31, %v1326_v34 }
 0x16f   :  { %v2105_v37 = vpop.f32.mrb[60].mxu1  ;;  %v2042_v38 = vpop.f32.mrb[61].mxu0 }
 0x170   :  { %v2043_v0 = vadd.f32 %v2042_v38, %v2041_v53  ;;  %v2106_v40 = vpop.f32.mrb[61].mxu1  ;;  %v2044_v42 = vpop.f32.mrb[62].mxu0 }
 0x171   :  { %v2107_v43 = vadd.f32 %v2106_v40, %v2105_v37  ;;  %v2108_v44 = vpop.f32.mrb[62].mxu1  ;;  %v2045_v18 = vpop.f32.mrb[63].mxu0 }
 0x172   :  { %v1331_v49 = vadd.f32 %v2043_v0, %v2851_v24  ;;  %v2046_v5 = vadd.f32 %v2045_v18, %v2044_v42  ;;  %v2109_v50 = vpop.f32.mrb[63].mxu1 }
 0x173   :  { %v2110_v52 = vadd.f32 %v2109_v50, %v2108_v44 }
 0x174   :  { %v1334_v54 = vadd.f32 %v2046_v5, %v2854_v26  ;;  %v1428_v7 = vadd.f32 %v2107_v43, %v1331_v49 }
 0x176   :  { %v2145_v14 = vpop.f32.mrb[64].mxu0  ;;  %v1431_v55 = vadd.f32 %v2110_v52, %v1334_v54 }
 0x177   :  { %v1477_v56 = vadd.f32 %v2145_v14, %v2864_v63  ;;  %v2153_v57 = vpop.f32.mrb[64].mxu1  ;;  %v1468_v16 = vpop.f32.mrb[65].mxu0 }
 0x178   :  { %v1509_v30 = vadd.f32 %v2153_v57, %v1412_v35  ;;  %v1469_v60 = vadd.f32 %v1468_v16, %v2858_v45  ;;  %v1500_v61 = vpop.f32.mrb[65].mxu1  ;;  %v2146_v32 = vpop.f32.mrb[66].mxu0 }
 0x179   :  { %v1501_v1 = vadd.f32 %v1500_v61, %v1404_v58  ;;  %v1480_v24 = vadd.f32 %v2146_v32, %v2866_v2  ;;  %v2154_v3 = vpop.f32.mrb[66].mxu1  ;;  %v1471_v4 = vpop.f32.mrb[67].mxu0  ;;  %v1533_v9 = vmax.f32 %v1477_v56, 0.0 }
 0x17a   :  { %v1512_v6 = vadd.f32 %v2154_v3, %v1415_v13  ;;  %v1472_v26 = vadd.f32 %v1471_v4, %v2860_v47  ;;  %v1503_v8 = vpop.f32.mrb[67].mxu1  ;;  %v1541_v10 = vmax.f32 %v1509_v30, 0.0  ;;  %v1531_v11 = vmax.f32 %v1469_v60, 0.0 }
 0x17b   :  { %v1534_v33 = vmax.f32 %v1480_v24, 0.0  ;;  %v1504_v63 = vadd.f32 %v1503_v8, %v2882_v59  ;;  %v1539_v45 = vmax.f32 %v1501_v1, 0.0 }
 0x17c   :  { %v1542_v12 = vmax.f32 %v1512_v6, 0.0  ;;  %v1532_v35 = vmax.f32 %v1472_v26, 0.0 }
 0x17d   :  { %v1816_v46 = vpack.c.bf16 %v1534_v33, %v1533_v9  ;;  %v1540_v15 = vmax.f32 %v1504_v63, 0.0 }
 0x17e   :  { %v1836_v58 = vpack.c.bf16 %v1542_v12, %v1541_v10  ;;  %v1811_v17 = vpack.c.bf16 %v1532_v35, %v1531_v11  ;;  %v2149_v2 = vpop.f32.mrb[68].mxu0 }
 0x17f   :  { %1848 = vst [vmem:[%s2929_s3 + $0x8] sm:$0xff] %v1816_v46   ;;  %v1831_v47 = vpack.c.bf16 %v1540_v15, %v1539_v45  ;;  %v1493_v13 = vadd.f32 %v2149_v2, %v2876_v39  ;;  %v2157_v48 = vpop.f32.mrb[68].mxu1  ;;  %v1484_v20 = vpop.f32.mrb[69].mxu0 }
 0x180   :  { %1852 = vst [vmem:[%s2929_s3 + $0x28] sm:$0xff] %v1836_v58   ;;  %1812 = vst [vmem:[%s2929_s3] sm:$0xff] %v1811_v17   ;;  %v1525_v59 = vadd.f32 %v2157_v48, %v1428_v7  ;;  %v1485_v22 = vadd.f32 %v1484_v20, %v2870_v19  ;;  %v1516_v23 = vpop.f32.mrb[69].mxu1  ;;  %v2150_v25 = vpop.f32.mrb[70].mxu0 }
 0x181   :  { %1851 = vst [vmem:[%s2929_s3 + $0x20] sm:$0xff] %v1831_v47   ;;  %v1517_v39 = vadd.f32 %v1516_v23, %v1420_v62  ;;  %v1496_v27 = vadd.f32 %v2150_v25, %v2878_v41  ;;  %v2158_v28 = vpop.f32.mrb[70].mxu1  ;;  %v1487_v29 = vpop.f32.mrb[71].mxu0  ;;  %v1537_v53 = vmax.f32 %v1493_v13, 0.0 }
 0x182   :  { %v1528_v51 = vadd.f32 %v2158_v28, %v1431_v55  ;;  %v1488_v31 = vadd.f32 %v1487_v29, %v2872_v21  ;;  %v1519_v34 = vpop.f32.mrb[71].mxu1  ;;  %v1545_v19 = vmax.f32 %v1525_v59, 0.0  ;;  %v1535_v0 = vmax.f32 %v1485_v22, 0.0 }
 0x183   :  { %v1538_v37 = vmax.f32 %v1496_v27, 0.0  ;;  %v1520_v38 = vadd.f32 %v1519_v34, %v2888_v36  ;;  %v1543_v43 = vmax.f32 %v1517_v39, 0.0 }
 0x184   :  { %v1546_v40 = vmax.f32 %v1528_v51, 0.0  ;;  %v1536_v42 = vmax.f32 %v1488_v31, 0.0 }
 0x185   :  { %v1826_v44 = vpack.c.bf16 %v1538_v37, %v1537_v53  ;;  %v1544_v18 = vmax.f32 %v1520_v38, 0.0 }
 0x186   :  { %v1846_v62 = vpack.c.bf16 %v1546_v40, %v1545_v19  ;;  %v1821_v49 = vpack.c.bf16 %v1536_v42, %v1535_v0 }
 0x187   :  { %1850 = vst [vmem:[%s2929_s3 + $0x18] sm:$0xff] %v1826_v44   ;;  %v1841_v41 = vpack.c.bf16 %v1544_v18, %v1543_v43 }
 0x188   :  { %1854 = vst [vmem:[%s2929_s3 + $0x38] sm:$0xff] %v1846_v62   ;;  %1849 = vst [vmem:[%s2929_s3 + $0x10] sm:$0xff] %v1821_v49  }
 0x189   :  { %1853 = vst [vmem:[%s2929_s3 + $0x30] sm:$0xff] %v1841_v41  }

</bundles_post_ra>
